<compile_context>
chip_gen: v5e
topology: v5e:2x2
jax: 0.10.0
libtpu: 0.0.40
codegen_flags: <defaults>
</compile_context>

<pallas_src>
import functools

import jax
import jax.numpy as jnp
import numpy as np
from jax.experimental import pallas as pl
from jax.experimental.pallas import tpu as pltpu


_HALO = 128   # left halo before the staged data (>= wp1+1 = 31; 128-aligned staging)
_GUARD = 32   # zero guard band written after each stage (>= wp1+1 = 31)


# ----------------------------------------------------------------------------
# Fused forward kernel (one batch tile of TB images per grid step)
# ----------------------------------------------------------------------------
def _fused_kernel(x_ref, w1_ref, b1_ref, w2_ref, b2_ref, w3_ref, b3_ref,
                  w4_ref, b4_ref, wfcT_ref, bfc_ref, s1_ref, m1_ref, m2_ref,
                  o_ref, buf_ref, *, wp1, wp2, tb):
    """Activation layout: rows are (channel, image-in-tile) pairs (row index
    c*tb + t), lanes are the zero-padded flattened spatial grid; the zero
    frame doubles as the conv padding.  Frame positions are re-zeroed (mask
    multiply) whenever a later conv reads them as padding; pool anchors and
    the folded FC weights only ever consume interior positions."""
    f32 = jnp.float32

    # Zero only the left halo, every grid step.  Per-step (not once at step 0)
    # keeps this correct when the batch axis is split across TensorCores
    # (each core has its own scratch and does not necessarily run step 0).
    buf_ref[:, 0:_HALO] = jnp.zeros((buf_ref.shape[0], _HALO), f32)

    def stage(x):
        r, n = x.shape
        buf_ref[0:r, _HALO:_HALO + n] = x
        # Zero a small guard band past the staged region so positive-offset
        # taps issued at (masked / never-consumed) frame positions read
        # deterministic zeros instead of stale data from a wider earlier stage.
        buf_ref[0:r, _HALO + n:_HALO + n + _GUARD] = jnp.zeros((r, _GUARD), f32)

    def tap(r, n, off):
        # statically shifted view of the staged activation (cheap VMEM load)
        return buf_ref[0:r, _HALO + off:_HALO + off + n]

    def conv3x3_relu(x, w_ref, b_ref, wp, mask=None):
        # x: (Cin*tb, N); w_ref: (9, Cout*tb, Cin*tb) per-tap weights,
        # block-diagonal over the batch tile.  9 accumulated MXU matmuls,
        # no materialized im2col patch matrix.
        cin_r, n = x.shape
        cout_r = b_ref.shape[0]
        stage(x)
        acc = jnp.zeros((cout_r, n), f32)
        t = 0
        for dy in range(3):
            for dx in range(3):
                off = (dy - 1) * wp + (dx - 1)
                acc = acc + jnp.dot(w_ref[t], tap(cin_r, n, off),
                                    preferred_element_type=f32)
                t += 1
        h = jnp.maximum(acc + b_ref[...], 0.0)
        return h if mask is None else h * mask[...]

    def windowed_max(x, wp):
        # 2x2 max anchored at every flat position; the stride-2 selection is
        # applied afterwards (by s1 for pool-1, folded into the FC for pool-2).
        r, n = x.shape
        stage(x)
        m = x
        for off in (1, wp, wp + 1):
            m = jnp.maximum(m, tap(r, n, off))
        return m

    # ---- conv_block_1 -------------------------------------------------------
    h = conv3x3_relu(x_ref[...], w1_ref, b1_ref, wp1, m1_ref)
    h = conv3x3_relu(h, w2_ref, b2_ref, wp1)
    m = windowed_max(h, wp1)
    # stride-2 selection + re-pad (zero frame) for block 2 in one MXU matmul
    h = jnp.dot(m, s1_ref[...], preferred_element_type=f32)

    # ---- conv_block_2 -------------------------------------------------------
    h = conv3x3_relu(h, w3_ref, b3_ref, wp2, m2_ref)
    h = conv3x3_relu(h, w4_ref, b4_ref, wp2)
    m = windowed_max(h, wp2)                                  # (hidden*tb, n2)

    # ---- classifier: nn.Flatten + nn.Linear, pool-2 selection pre-folded ----
    hidden = wfcT_ref.shape[0]
    dout = bfc_ref.shape[1]
    logits = jnp.zeros((tb, dout), f32)
    for c in range(hidden):                                   # static, hidden=8
        logits = logits + jnp.dot(m[c * tb:(c + 1) * tb, :], wfcT_ref[c],
                                  preferred_element_type=f32)
    o_ref[...] = logits + bfc_ref[...]


# ----------------------------------------------------------------------------
# Host-side one-time setup: parameter init + kernel-ready repacking
# ----------------------------------------------------------------------------
def init_params(key, input_shape=1, hidden_units=8, output_shape=10):
    """PyTorch-default-style (uniform +/- 1/sqrt(fan_in)) init, torch layout."""
    def conv_p(k, cout, cin):
        k1, k2 = jax.random.split(k)
        bound = 1.0 / jnp.sqrt(cin * 9.0)
        w = jax.random.uniform(k1, (cout, cin, 3, 3), jnp.float32, -bound, bound)
        b = jax.random.uniform(k2, (cout,), jnp.float32, -bound, bound)
        return w, b

    def lin_p(k, dout, din):
        k1, k2 = jax.random.split(k)
        bound = 1.0 / jnp.sqrt(float(din))
        w = jax.random.uniform(k1, (dout, din), jnp.float32, -bound, bound)
        b = jax.random.uniform(k2, (dout,), jnp.float32, -bound, bound)
        return w, b

    ks = jax.random.split(key, 5)
    return {
        "c11": conv_p(ks[0], hidden_units, input_shape),
        "c12": conv_p(ks[1], hidden_units, hidden_units),
        "c21": conv_p(ks[2], hidden_units, hidden_units),
        "c22": conv_p(ks[3], hidden_units, hidden_units),
        "fc": lin_p(ks[4], output_shape, hidden_units * (28 // 4) * (28 // 4)),
    }


def pack_params(torch_params, *, height, width, tb):
    """One-time repack of PyTorch-layout weights into kernel-ready layouts for
    a batch tile of `tb` images stacked along the sublane (row) axis."""
    assert height % 4 == 0 and width % 4 == 0
    hp1, wp1 = height + 2, width + 2
    h2, w2 = height // 2, width // 2
    hp2, wp2 = h2 + 2, w2 + 2
    h3, w3 = h2 // 2, w2 // 2

    def frame_mask(hp, wp):
        m = np.zeros((hp, wp), np.float32)
        m[1:hp - 1, 1:wp - 1] = 1.0
        return jnp.asarray(m.reshape(1, hp * wp))

    def pool1_select():
        # maps the 2x2-window anchor at padded coords (2i+1, 2j+1) of the
        # block-1 grid to padded coords (i+1, j+1) of the block-2 grid
        # (zero frame included), so pooling + re-padding is one matmul.
        s = np.zeros((hp1 * wp1, hp2 * wp2), np.float32)
        for i in range(h2):
            for j in range(w2):
                s[(2 * i + 1) * wp1 + (2 * j + 1), (i + 1) * wp2 + (j + 1)] = 1.0
        return jnp.asarray(s)

    eye = jnp.eye(tb, dtype=jnp.float32)

    def conv_pack(w, b):
        cout, cin = w.shape[0], w.shape[1]
        w_tap = jnp.transpose(w, (2, 3, 0, 1)).reshape(9, cout, cin)
        # block-diagonal over the batch tile: row cout*tb + t, col cin*tb + t
        w_big = (w_tap[:, :, None, :, None] * eye[None, None, :, None, :]
                 ).reshape(9, cout * tb, cin * tb)
        b_big = jnp.repeat(b, tb).reshape(cout * tb, 1)
        return w_big, b_big

    packed = {}
    for name, key in (("1", "c11"), ("2", "c12"), ("3", "c21"), ("4", "c22")):
        w_big, b_big = conv_pack(*torch_params[key])
        packed["w" + name] = w_big
        packed["b" + name] = b_big

    # Classifier: fold the pool-2 stride-2 anchor selection into the FC
    # weights (exact 0/1 gather, no matmul -> no precision loss).  Column
    # order follows torch's NCHW flatten (c*49 + i*7 + j).
    wfc, bfc = torch_params["fc"]
    dout, din = wfc.shape
    hidden = torch_params["c22"][1].shape[0]
    hw = h3 * w3
    assert din == hidden * hw
    anchor = np.array([(2 * i + 1) * wp2 + (2 * j + 1)
                       for i in range(h3) for j in range(w3)], np.int64)
    wfc_np = np.asarray(wfc, np.float32).reshape(dout, hidden, hw)   # [o, c, j]
    wfcT_np = np.zeros((hidden, hp2 * wp2, dout), np.float32)
    wfcT_np[:, anchor, :] = np.transpose(wfc_np, (1, 2, 0))          # [c, j, o]
    packed["wfcT"] = jnp.asarray(wfcT_np)                            # (C, n2, dout)
    packed["bfc"] = bfc.reshape(1, dout)

    packed["s1"] = pool1_select()                                    # (n1, n2)
    packed["mask1"] = frame_mask(hp1, wp1)                           # (1, n1)
    packed["mask2"] = frame_mask(hp2, wp2)                           # (1, n2)
    return packed


def _choose_batch_tile(batch, tb_max=8):
    """Images per grid step.  Keep >= 2 grid steps whenever batch >= 2 so a
    v7x megacore can split the batch across its two TensorCores."""
    if batch <= 1:
        return 1
    return max(1, min(tb_max, batch // 2))


# ----------------------------------------------------------------------------
# Forward pass
# ----------------------------------------------------------------------------
@functools.partial(jax.jit, static_argnames=("tb",))
def cnn_mnist_forward(x_nchw, packed, *, tb):
    """x_nchw: (B, Cin, H, W) float32 -> logits (B, output_shape)."""
    B, cin, H, W = x_nchw.shape
    assert H % 4 == 0 and W % 4 == 0
    hp1, wp1 = H + 2, W + 2
    wp2 = H // 2 + 2
    n1 = hp1 * wp1
    assert wp1 + 1 <= _HALO and wp1 + 1 <= _GUARD

    hidden = packed["b1"].shape[0] // tb
    dout = packed["bfc"].shape[1]

    g = -(-B // tb)                      # grid steps
    bp = g * tb                          # batch padded to a multiple of tb

    # The spatial zero pad below IS the conv padding; rows are (channel,
    # image-in-tile) pairs, row index = c*tb + t, so no NCHW<->NHWC
    # transposes are ever needed.
    x = jnp.pad(x_nchw, ((0, bp - B), (0, 0), (1, 1), (1, 1)))
    x = x.reshape(g, tb, cin, n1).transpose(0, 2, 1, 3).reshape(g, cin * tb, n1)

    rows_in = cin * tb
    buf_rows = ((max(cin, hidden) * tb) + 7) // 8 * 8
    buf_cols = ((_HALO + n1 + _GUARD) + 127) // 128 * 128     # lane-tile aligned

    kernel = functools.partial(_fused_kernel, wp1=wp1, wp2=wp2, tb=tb)

    def const_spec(a):
        # Constant operand: block index never changes, so it is DMA'd once and
        # kept resident.  (pipeline_mode=pl.Buffered(1) would also single-
        # buffer it -- skipped, footprint is only ~2 MB at these shapes.)
        nd = a.ndim
        return pl.BlockSpec(a.shape, lambda gi: (0,) * nd)

    operands = (x, packed["w1"], packed["b1"], packed["w2"], packed["b2"],
                packed["w3"], packed["b3"], packed["w4"], packed["b4"],
                packed["wfcT"], packed["bfc"], packed["s1"],
                packed["mask1"], packed["mask2"])

    out = pl.pallas_call(
        kernel,
        out_shape=jax.ShapeDtypeStruct((g, tb, dout), jnp.float32),
        grid=(g,),
        in_specs=[pl.BlockSpec((None, rows_in, n1), lambda gi: (gi, 0, 0))]
                 + [const_spec(a) for a in operands[1:]],
        out_specs=pl.BlockSpec((None, tb, dout), lambda gi: (gi, 0, 0)),
        scratch_shapes=[pltpu.VMEM((buf_rows, buf_cols), jnp.float32)],
        compiler_params=pltpu.CompilerParams(
            dimension_semantics=("parallel",)),
    )(*operands)

    return out.reshape(bp, dout)[:B]


# ----------------------------------------------------------------------------
# Plain-JAX reference (same math as the PyTorch module), used for validation
# ----------------------------------------------------------------------------
def _reference_forward(x_nchw, torch_params):
    hp = jax.lax.Precision.HIGHEST

    def conv_relu(x, w, b):
        y = jax.lax.conv_general_dilated(
            x, w, window_strides=(1, 1), padding="SAME",
            dimension_numbers=("NCHW", "OIHW", "NCHW"), precision=hp)
        return jax.nn.relu(y + b[None, :, None, None])

    def pool(x):
        return jax.lax.reduce_window(
            x, -jnp.inf, jax.lax.max, (1, 1, 2, 2), (1, 1, 2, 2), "VALID")

    h = conv_relu(x_nchw, *torch_params["c11"])
    h = conv_relu(h, *torch_params["c12"])
    h = pool(h)
    h = conv_relu(h, *torch_params["c21"])
    h = conv_relu(h, *torch_params["c22"])
    h = pool(h)
    wfc, bfc = torch_params["fc"]
    flat = h.reshape(h.shape[0], -1)
    return jnp.dot(flat, wfc.T, precision=hp) + bfc


if __name__ == "__main__":
    key = jax.random.PRNGKey(0)
    k_params, k_x = jax.random.split(key)

    CIN, H, W = 1, 28, 28               # 28x28 input => hidden*7*7 classifier
    HIDDEN, NCLASS = 8, 10

    torch_params = init_params(k_params, CIN, HIDDEN, NCLASS)

    # batch=2 -> tb=1, grid=2 (both v7x cores busy); batch=5 -> tb=2, grid=3
    # (exercises batch tiling along the sublane axis + tail padding).
    for batch in (2, 5):
        xb = jax.random.normal(jax.random.fold_in(k_x, batch),
                               (batch, CIN, H, W), dtype=jnp.float32)
        tb = _choose_batch_tile(batch)
        packed = pack_params(torch_params, height=H, width=W, tb=tb)

        logits = cnn_mnist_forward(xb, packed, tb=tb)
        jax.block_until_ready(logits)
        assert logits.shape == (batch, NCLASS) and logits.dtype == jnp.float32

        # Tight tolerance for the all-f32 path: exact-math diffs are ~1e-5;
        # any accidental half-precision path would show up at >= 1e-2.
        ref = _reference_forward(xb, torch_params)
        max_err = float(jnp.max(jnp.abs(logits - ref)))
        assert jnp.allclose(logits, ref, rtol=1e-3, atol=1e-3), (
            f"batch={batch}: max|diff|={max_err}")

    print("KERNEL_OK")
</pallas_src>

<mosaic_0001>
module attributes {stable_mosaic.version = 11 : i64} {
  func.func @_fused_kernel(%arg0: i32, %arg1: memref<1x1x900xf32, #tpu.memory_space<vmem>>, %arg2: memref<9x8x1xf32, #tpu.memory_space<vmem>>, %arg3: memref<8x1xf32, #tpu.memory_space<vmem>>, %arg4: memref<9x8x8xf32, #tpu.memory_space<vmem>>, %arg5: memref<8x1xf32, #tpu.memory_space<vmem>>, %arg6: memref<9x8x8xf32, #tpu.memory_space<vmem>>, %arg7: memref<8x1xf32, #tpu.memory_space<vmem>>, %arg8: memref<9x8x8xf32, #tpu.memory_space<vmem>>, %arg9: memref<8x1xf32, #tpu.memory_space<vmem>>, %arg10: memref<8x256x10xf32, #tpu.memory_space<vmem>>, %arg11: memref<1x10xf32, #tpu.memory_space<vmem>>, %arg12: memref<900x256xf32, #tpu.memory_space<vmem>>, %arg13: memref<1x900xf32, #tpu.memory_space<vmem>>, %arg14: memref<1x256xf32, #tpu.memory_space<vmem>>, %arg15: memref<1x1x10xf32, #tpu.memory_space<vmem>>, %arg16: memref<8x1152xf32, #tpu.memory_space<vmem>>) attributes {dimension_semantics = [#tpu.dimension_semantics<parallel>], iteration_bounds = array<i64: 2>, scalar_prefetch = 0 : i64, scratch_operands = 1 : i64, tpu.core_type = #tpu.core_type<tc>, window_params = [{transform_indices = @transform_0, window_bounds = array<i64: 1, 1, 900>}, {pipeline_mode = #tpu.pipeline_mode<synchronous>, transform_indices = @transform_1, window_bounds = array<i64: 9, 8, 1>}, {pipeline_mode = #tpu.pipeline_mode<synchronous>, transform_indices = @transform_2, window_bounds = array<i64: 8, 1>}, {pipeline_mode = #tpu.pipeline_mode<synchronous>, transform_indices = @transform_3, window_bounds = array<i64: 9, 8, 8>}, {pipeline_mode = #tpu.pipeline_mode<synchronous>, transform_indices = @transform_4, window_bounds = array<i64: 8, 1>}, {pipeline_mode = #tpu.pipeline_mode<synchronous>, transform_indices = @transform_5, window_bounds = array<i64: 9, 8, 8>}, {pipeline_mode = #tpu.pipeline_mode<synchronous>, transform_indices = @transform_6, window_bounds = array<i64: 8, 1>}, {pipeline_mode = #tpu.pipeline_mode<synchronous>, transform_indices = @transform_7, window_bounds = array<i64: 9, 8, 8>}, {pipeline_mode = #tpu.pipeline_mode<synchronous>, transform_indices = @transform_8, window_bounds = array<i64: 8, 1>}, {pipeline_mode = #tpu.pipeline_mode<synchronous>, transform_indices = @transform_9, window_bounds = array<i64: 8, 256, 10>}, {pipeline_mode = #tpu.pipeline_mode<synchronous>, transform_indices = @transform_10, window_bounds = array<i64: 1, 10>}, {pipeline_mode = #tpu.pipeline_mode<synchronous>, transform_indices = @transform_11, window_bounds = array<i64: 900, 256>}, {pipeline_mode = #tpu.pipeline_mode<synchronous>, transform_indices = @transform_12, window_bounds = array<i64: 1, 900>}, {pipeline_mode = #tpu.pipeline_mode<synchronous>, transform_indices = @transform_13, window_bounds = array<i64: 1, 256>}, {transform_indices = @transform_14, window_bounds = array<i64: 1, 1, 10>}]} {
    %cst = arith.constant 0.000000e+00 : f32
    %0 = vector.broadcast %cst : f32 to vector<8x128xf32>
    %c0 = arith.constant 0 : index
    %c0_0 = arith.constant 0 : index
    %1 = vector.load %arg16[%c0, %c0_0] : memref<8x1152xf32, #tpu.memory_space<vmem>>, vector<8x128xf32>
    tpu.vector_store %arg16[%c0, %c0_0], %0 {strides = array<i32>} : memref<8x1152xf32, #tpu.memory_space<vmem>>, vector<8x128xf32>,
    %c0_1 = arith.constant 0 : index
    %c0_2 = arith.constant 0 : index
    %c0_3 = arith.constant 0 : index
    %2 = vector.load %arg1[%c0_1, %c0_2, %c0_3] : memref<1x1x900xf32, #tpu.memory_space<vmem>>, vector<1x1x900xf32>
    %3 = vector.shape_cast %2 : vector<1x1x900xf32> to vector<1x900xf32>
    %c0_4 = arith.constant 0 : index
    %c128 = arith.constant 128 : index
    %4 = vector.load %arg16[%c0_4, %c128] : memref<8x1152xf32, #tpu.memory_space<vmem>>, vector<1x900xf32>
    tpu.vector_store %arg16[%c0_4, %c128], %3 {strides = array<i32>} : memref<8x1152xf32, #tpu.memory_space<vmem>>, vector<1x900xf32>,
    %cst_5 = arith.constant 0.000000e+00 : f32
    %5 = vector.broadcast %cst_5 : f32 to vector<1x32xf32>
    %c0_6 = arith.constant 0 : index
    %c1028 = arith.constant 1028 : index
    %6 = vector.load %arg16[%c0_6, %c1028] : memref<8x1152xf32, #tpu.memory_space<vmem>>, vector<1x32xf32>
    tpu.vector_store %arg16[%c0_6, %c1028], %5 {strides = array<i32>} : memref<8x1152xf32, #tpu.memory_space<vmem>>, vector<1x32xf32>,
    %cst_7 = arith.constant 0.000000e+00 : f32
    %7 = vector.broadcast %cst_7 : f32 to vector<8x900xf32>
    %c0_8 = arith.constant 0 : index
    %c0_9 = arith.constant 0 : index
    %c0_10 = arith.constant 0 : index
    %8 = vector.load %arg2[%c0_8, %c0_9, %c0_10] : memref<9x8x1xf32, #tpu.memory_space<vmem>>, vector<1x8x1xf32>
    %9 = vector.shape_cast %8 : vector<1x8x1xf32> to vector<8x1xf32>
    %c0_11 = arith.constant 0 : index
    %c97 = arith.constant 97 : index
    %10 = vector.load %arg16[%c0_11, %c97] : memref<8x1152xf32, #tpu.memory_space<vmem>>, vector<1x900xf32>
    %cst_12 = arith.constant dense<0.000000e+00> : vector<8x900xf32>
    %11 = tpu.matmul %9, %10, %cst_12 {dimension_numbers = #tpu.dot_dimension_numbers<[1], [0], [0], [1], [0, 0, 1, 1], [], []>} : vector<8x1xf32>, vector<1x900xf32>, vector<8x900xf32> -> vector<8x900xf32>
    %12 = arith.addf %7, %11 : vector<8x900xf32>
    %c1 = arith.constant 1 : index
    %c0_13 = arith.constant 0 : index
    %c0_14 = arith.constant 0 : index
    %13 = vector.load %arg2[%c1, %c0_13, %c0_14] : memref<9x8x1xf32, #tpu.memory_space<vmem>>, vector<1x8x1xf32>
    %14 = vector.shape_cast %13 : vector<1x8x1xf32> to vector<8x1xf32>
    %c0_15 = arith.constant 0 : index
    %c98 = arith.constant 98 : index
    %15 = vector.load %arg16[%c0_15, %c98] : memref<8x1152xf32, #tpu.memory_space<vmem>>, vector<1x900xf32>
    %cst_16 = arith.constant dense<0.000000e+00> : vector<8x900xf32>
    %16 = tpu.matmul %14, %15, %cst_16 {dimension_numbers = #tpu.dot_dimension_numbers<[1], [0], [0], [1], [0, 0, 1, 1], [], []>} : vector<8x1xf32>, vector<1x900xf32>, vector<8x900xf32> -> vector<8x900xf32>
    %17 = arith.addf %12, %16 : vector<8x900xf32>
    %c2 = arith.constant 2 : index
    %c0_17 = arith.constant 0 : index
    %c0_18 = arith.constant 0 : index
    %18 = vector.load %arg2[%c2, %c0_17, %c0_18] : memref<9x8x1xf32, #tpu.memory_space<vmem>>, vector<1x8x1xf32>
    %19 = vector.shape_cast %18 : vector<1x8x1xf32> to vector<8x1xf32>
    %c0_19 = arith.constant 0 : index
    %c99 = arith.constant 99 : index
    %20 = vector.load %arg16[%c0_19, %c99] : memref<8x1152xf32, #tpu.memory_space<vmem>>, vector<1x900xf32>
    %cst_20 = arith.constant dense<0.000000e+00> : vector<8x900xf32>
    %21 = tpu.matmul %19, %20, %cst_20 {dimension_numbers = #tpu.dot_dimension_numbers<[1], [0], [0], [1], [0, 0, 1, 1], [], []>} : vector<8x1xf32>, vector<1x900xf32>, vector<8x900xf32> -> vector<8x900xf32>
    %22 = arith.addf %17, %21 : vector<8x900xf32>
    %c3 = arith.constant 3 : index
    %c0_21 = arith.constant 0 : index
    %c0_22 = arith.constant 0 : index
    %23 = vector.load %arg2[%c3, %c0_21, %c0_22] : memref<9x8x1xf32, #tpu.memory_space<vmem>>, vector<1x8x1xf32>
    %24 = vector.shape_cast %23 : vector<1x8x1xf32> to vector<8x1xf32>
    %c0_23 = arith.constant 0 : index
    %c127 = arith.constant 127 : index
    %25 = vector.load %arg16[%c0_23, %c127] : memref<8x1152xf32, #tpu.memory_space<vmem>>, vector<1x900xf32>
    %cst_24 = arith.constant dense<0.000000e+00> : vector<8x900xf32>
    %26 = tpu.matmul %24, %25, %cst_24 {dimension_numbers = #tpu.dot_dimension_numbers<[1], [0], [0], [1], [0, 0, 1, 1], [], []>} : vector<8x1xf32>, vector<1x900xf32>, vector<8x900xf32> -> vector<8x900xf32>
    %27 = arith.addf %22, %26 : vector<8x900xf32>
    %c4 = arith.constant 4 : index
    %c0_25 = arith.constant 0 : index
    %c0_26 = arith.constant 0 : index
    %28 = vector.load %arg2[%c4, %c0_25, %c0_26] : memref<9x8x1xf32, #tpu.memory_space<vmem>>, vector<1x8x1xf32>
    %29 = vector.shape_cast %28 : vector<1x8x1xf32> to vector<8x1xf32>
    %c0_27 = arith.constant 0 : index
    %c128_28 = arith.constant 128 : index
    %30 = vector.load %arg16[%c0_27, %c128_28] : memref<8x1152xf32, #tpu.memory_space<vmem>>, vector<1x900xf32>
    %cst_29 = arith.constant dense<0.000000e+00> : vector<8x900xf32>
    %31 = tpu.matmul %29, %30, %cst_29 {dimension_numbers = #tpu.dot_dimension_numbers<[1], [0], [0], [1], [0, 0, 1, 1], [], []>} : vector<8x1xf32>, vector<1x900xf32>, vector<8x900xf32> -> vector<8x900xf32>
    %32 = arith.addf %27, %31 : vector<8x900xf32>
    %c5 = arith.constant 5 : index
    %c0_30 = arith.constant 0 : index
    %c0_31 = arith.constant 0 : index
    %33 = vector.load %arg2[%c5, %c0_30, %c0_31] : memref<9x8x1xf32, #tpu.memory_space<vmem>>, vector<1x8x1xf32>
    %34 = vector.shape_cast %33 : vector<1x8x1xf32> to vector<8x1xf32>
    %c0_32 = arith.constant 0 : index
    %c129 = arith.constant 129 : index
    %35 = vector.load %arg16[%c0_32, %c129] : memref<8x1152xf32, #tpu.memory_space<vmem>>, vector<1x900xf32>
    %cst_33 = arith.constant dense<0.000000e+00> : vector<8x900xf32>
    %36 = tpu.matmul %34, %35, %cst_33 {dimension_numbers = #tpu.dot_dimension_numbers<[1], [0], [0], [1], [0, 0, 1, 1], [], []>} : vector<8x1xf32>, vector<1x900xf32>, vector<8x900xf32> -> vector<8x900xf32>
    %37 = arith.addf %32, %36 : vector<8x900xf32>
    %c6 = arith.constant 6 : index
    %c0_34 = arith.constant 0 : index
    %c0_35 = arith.constant 0 : index
    %38 = vector.load %arg2[%c6, %c0_34, %c0_35] : memref<9x8x1xf32, #tpu.memory_space<vmem>>, vector<1x8x1xf32>
    %39 = vector.shape_cast %38 : vector<1x8x1xf32> to vector<8x1xf32>
    %c0_36 = arith.constant 0 : index
    %c157 = arith.constant 157 : index
    %40 = vector.load %arg16[%c0_36, %c157] : memref<8x1152xf32, #tpu.memory_space<vmem>>, vector<1x900xf32>
    %cst_37 = arith.constant dense<0.000000e+00> : vector<8x900xf32>
    %41 = tpu.matmul %39, %40, %cst_37 {dimension_numbers = #tpu.dot_dimension_numbers<[1], [0], [0], [1], [0, 0, 1, 1], [], []>} : vector<8x1xf32>, vector<1x900xf32>, vector<8x900xf32> -> vector<8x900xf32>
    %42 = arith.addf %37, %41 : vector<8x900xf32>
    %c7 = arith.constant 7 : index
    %c0_38 = arith.constant 0 : index
    %c0_39 = arith.constant 0 : index
    %43 = vector.load %arg2[%c7, %c0_38, %c0_39] : memref<9x8x1xf32, #tpu.memory_space<vmem>>, vector<1x8x1xf32>
    %44 = vector.shape_cast %43 : vector<1x8x1xf32> to vector<8x1xf32>
    %c0_40 = arith.constant 0 : index
    %c158 = arith.constant 158 : index
    %45 = vector.load %arg16[%c0_40, %c158] : memref<8x1152xf32, #tpu.memory_space<vmem>>, vector<1x900xf32>
    %cst_41 = arith.constant dense<0.000000e+00> : vector<8x900xf32>
    %46 = tpu.matmul %44, %45, %cst_41 {dimension_numbers = #tpu.dot_dimension_numbers<[1], [0], [0], [1], [0, 0, 1, 1], [], []>} : vector<8x1xf32>, vector<1x900xf32>, vector<8x900xf32> -> vector<8x900xf32>
    %47 = arith.addf %42, %46 : vector<8x900xf32>
    %c8 = arith.constant 8 : index
    %c0_42 = arith.constant 0 : index
    %c0_43 = arith.constant 0 : index
    %48 = vector.load %arg2[%c8, %c0_42, %c0_43] : memref<9x8x1xf32, #tpu.memory_space<vmem>>, vector<1x8x1xf32>
    %49 = vector.shape_cast %48 : vector<1x8x1xf32> to vector<8x1xf32>
    %c0_44 = arith.constant 0 : index
    %c159 = arith.constant 159 : index
    %50 = vector.load %arg16[%c0_44, %c159] : memref<8x1152xf32, #tpu.memory_space<vmem>>, vector<1x900xf32>
    %cst_45 = arith.constant dense<0.000000e+00> : vector<8x900xf32>
    %51 = tpu.matmul %49, %50, %cst_45 {dimension_numbers = #tpu.dot_dimension_numbers<[1], [0], [0], [1], [0, 0, 1, 1], [], []>} : vector<8x1xf32>, vector<1x900xf32>, vector<8x900xf32> -> vector<8x900xf32>
    %52 = arith.addf %47, %51 : vector<8x900xf32>
    %c0_46 = arith.constant 0 : index
    %c0_47 = arith.constant 0 : index
    %53 = vector.load %arg3[%c0_46, %c0_47] : memref<8x1xf32, #tpu.memory_space<vmem>>, vector<8x1xf32>
    %54 = vector.broadcast %53 : vector<8x1xf32> to vector<8x900xf32>
    %55 = arith.addf %52, %54 : vector<8x900xf32>
    %cst_48 = arith.constant 0.000000e+00 : f32
    %56 = vector.broadcast %cst_48 : f32 to vector<8x900xf32>
    %57 = arith.maximumf %55, %56 : vector<8x900xf32>
    %c0_49 = arith.constant 0 : index
    %c0_50 = arith.constant 0 : index
    %58 = vector.load %arg13[%c0_49, %c0_50] : memref<1x900xf32, #tpu.memory_space<vmem>>, vector<1x900xf32>
    %59 = vector.broadcast %58 : vector<1x900xf32> to vector<8x900xf32>
    %60 = arith.mulf %57, %59 : vector<8x900xf32>
    %c0_51 = arith.constant 0 : index
    %c128_52 = arith.constant 128 : index
    %61 = vector.load %arg16[%c0_51, %c128_52] : memref<8x1152xf32, #tpu.memory_space<vmem>>, vector<8x900xf32>
    tpu.vector_store %arg16[%c0_51, %c128_52], %60 {strides = array<i32>} : memref<8x1152xf32, #tpu.memory_space<vmem>>, vector<8x900xf32>,
    %cst_53 = arith.constant 0.000000e+00 : f32
    %62 = vector.broadcast %cst_53 : f32 to vector<8x32xf32>
    %c0_54 = arith.constant 0 : index
    %c1028_55 = arith.constant 1028 : index
    %63 = vector.load %arg16[%c0_54, %c1028_55] : memref<8x1152xf32, #tpu.memory_space<vmem>>, vector<8x32xf32>
    tpu.vector_store %arg16[%c0_54, %c1028_55], %62 {strides = array<i32>} : memref<8x1152xf32, #tpu.memory_space<vmem>>, vector<8x32xf32>,
    %cst_56 = arith.constant 0.000000e+00 : f32
    %64 = vector.broadcast %cst_56 : f32 to vector<8x900xf32>
    %c0_57 = arith.constant 0 : index
    %c0_58 = arith.constant 0 : index
    %c0_59 = arith.constant 0 : index
    %65 = vector.load %arg4[%c0_57, %c0_58, %c0_59] : memref<9x8x8xf32, #tpu.memory_space<vmem>>, vector<1x8x8xf32>
    %66 = vector.shape_cast %65 : vector<1x8x8xf32> to vector<8x8xf32>
    %c0_60 = arith.constant 0 : index
    %c97_61 = arith.constant 97 : index
    %67 = vector.load %arg16[%c0_60, %c97_61] : memref<8x1152xf32, #tpu.memory_space<vmem>>, vector<8x900xf32>
    %cst_62 = arith.constant dense<0.000000e+00> : vector<8x900xf32>
    %68 = tpu.matmul %66, %67, %cst_62 {dimension_numbers = #tpu.dot_dimension_numbers<[1], [0], [0], [1], [0, 0, 1, 1], [], []>} : vector<8x8xf32>, vector<8x900xf32>, vector<8x900xf32> -> vector<8x900xf32>
    %69 = arith.addf %64, %68 : vector<8x900xf32>
    %c1_63 = arith.constant 1 : index
    %c0_64 = arith.constant 0 : index
    %c0_65 = arith.constant 0 : index
    %70 = vector.load %arg4[%c1_63, %c0_64, %c0_65] : memref<9x8x8xf32, #tpu.memory_space<vmem>>, vector<1x8x8xf32>
    %71 = vector.shape_cast %70 : vector<1x8x8xf32> to vector<8x8xf32>
    %c0_66 = arith.constant 0 : index
    %c98_67 = arith.constant 98 : index
    %72 = vector.load %arg16[%c0_66, %c98_67] : memref<8x1152xf32, #tpu.memory_space<vmem>>, vector<8x900xf32>
    %cst_68 = arith.constant dense<0.000000e+00> : vector<8x900xf32>
    %73 = tpu.matmul %71, %72, %cst_68 {dimension_numbers = #tpu.dot_dimension_numbers<[1], [0], [0], [1], [0, 0, 1, 1], [], []>} : vector<8x8xf32>, vector<8x900xf32>, vector<8x900xf32> -> vector<8x900xf32>
    %74 = arith.addf %69, %73 : vector<8x900xf32>
    %c2_69 = arith.constant 2 : index
    %c0_70 = arith.constant 0 : index
    %c0_71 = arith.constant 0 : index
    %75 = vector.load %arg4[%c2_69, %c0_70, %c0_71] : memref<9x8x8xf32, #tpu.memory_space<vmem>>, vector<1x8x8xf32>
    %76 = vector.shape_cast %75 : vector<1x8x8xf32> to vector<8x8xf32>
    %c0_72 = arith.constant 0 : index
    %c99_73 = arith.constant 99 : index
    %77 = vector.load %arg16[%c0_72, %c99_73] : memref<8x1152xf32, #tpu.memory_space<vmem>>, vector<8x900xf32>
    %cst_74 = arith.constant dense<0.000000e+00> : vector<8x900xf32>
    %78 = tpu.matmul %76, %77, %cst_74 {dimension_numbers = #tpu.dot_dimension_numbers<[1], [0], [0], [1], [0, 0, 1, 1], [], []>} : vector<8x8xf32>, vector<8x900xf32>, vector<8x900xf32> -> vector<8x900xf32>
    %79 = arith.addf %74, %78 : vector<8x900xf32>
    %c3_75 = arith.constant 3 : index
    %c0_76 = arith.constant 0 : index
    %c0_77 = arith.constant 0 : index
    %80 = vector.load %arg4[%c3_75, %c0_76, %c0_77] : memref<9x8x8xf32, #tpu.memory_space<vmem>>, vector<1x8x8xf32>
    %81 = vector.shape_cast %80 : vector<1x8x8xf32> to vector<8x8xf32>
    %c0_78 = arith.constant 0 : index
    %c127_79 = arith.constant 127 : index
    %82 = vector.load %arg16[%c0_78, %c127_79] : memref<8x1152xf32, #tpu.memory_space<vmem>>, vector<8x900xf32>
    %cst_80 = arith.constant dense<0.000000e+00> : vector<8x900xf32>
    %83 = tpu.matmul %81, %82, %cst_80 {dimension_numbers = #tpu.dot_dimension_numbers<[1], [0], [0], [1], [0, 0, 1, 1], [], []>} : vector<8x8xf32>, vector<8x900xf32>, vector<8x900xf32> -> vector<8x900xf32>
    %84 = arith.addf %79, %83 : vector<8x900xf32>
    %c4_81 = arith.constant 4 : index
    %c0_82 = arith.constant 0 : index
    %c0_83 = arith.constant 0 : index
    %85 = vector.load %arg4[%c4_81, %c0_82, %c0_83] : memref<9x8x8xf32, #tpu.memory_space<vmem>>, vector<1x8x8xf32>
    %86 = vector.shape_cast %85 : vector<1x8x8xf32> to vector<8x8xf32>
    %c0_84 = arith.constant 0 : index
    %c128_85 = arith.constant 128 : index
    %87 = vector.load %arg16[%c0_84, %c128_85] : memref<8x1152xf32, #tpu.memory_space<vmem>>, vector<8x900xf32>
    %cst_86 = arith.constant dense<0.000000e+00> : vector<8x900xf32>
    %88 = tpu.matmul %86, %87, %cst_86 {dimension_numbers = #tpu.dot_dimension_numbers<[1], [0], [0], [1], [0, 0, 1, 1], [], []>} : vector<8x8xf32>, vector<8x900xf32>, vector<8x900xf32> -> vector<8x900xf32>
    %89 = arith.addf %84, %88 : vector<8x900xf32>
    %c5_87 = arith.constant 5 : index
    %c0_88 = arith.constant 0 : index
    %c0_89 = arith.constant 0 : index
    %90 = vector.load %arg4[%c5_87, %c0_88, %c0_89] : memref<9x8x8xf32, #tpu.memory_space<vmem>>, vector<1x8x8xf32>
    %91 = vector.shape_cast %90 : vector<1x8x8xf32> to vector<8x8xf32>
    %c0_90 = arith.constant 0 : index
    %c129_91 = arith.constant 129 : index
    %92 = vector.load %arg16[%c0_90, %c129_91] : memref<8x1152xf32, #tpu.memory_space<vmem>>, vector<8x900xf32>
    %cst_92 = arith.constant dense<0.000000e+00> : vector<8x900xf32>
    %93 = tpu.matmul %91, %92, %cst_92 {dimension_numbers = #tpu.dot_dimension_numbers<[1], [0], [0], [1], [0, 0, 1, 1], [], []>} : vector<8x8xf32>, vector<8x900xf32>, vector<8x900xf32> -> vector<8x900xf32>
    %94 = arith.addf %89, %93 : vector<8x900xf32>
    %c6_93 = arith.constant 6 : index
    %c0_94 = arith.constant 0 : index
    %c0_95 = arith.constant 0 : index
    %95 = vector.load %arg4[%c6_93, %c0_94, %c0_95] : memref<9x8x8xf32, #tpu.memory_space<vmem>>, vector<1x8x8xf32>
    %96 = vector.shape_cast %95 : vector<1x8x8xf32> to vector<8x8xf32>
    %c0_96 = arith.constant 0 : index
    %c157_97 = arith.constant 157 : index
    %97 = vector.load %arg16[%c0_96, %c157_97] : memref<8x1152xf32, #tpu.memory_space<vmem>>, vector<8x900xf32>
    %cst_98 = arith.constant dense<0.000000e+00> : vector<8x900xf32>
    %98 = tpu.matmul %96, %97, %cst_98 {dimension_numbers = #tpu.dot_dimension_numbers<[1], [0], [0], [1], [0, 0, 1, 1], [], []>} : vector<8x8xf32>, vector<8x900xf32>, vector<8x900xf32> -> vector<8x900xf32>
    %99 = arith.addf %94, %98 : vector<8x900xf32>
    %c7_99 = arith.constant 7 : index
    %c0_100 = arith.constant 0 : index
    %c0_101 = arith.constant 0 : index
    %100 = vector.load %arg4[%c7_99, %c0_100, %c0_101] : memref<9x8x8xf32, #tpu.memory_space<vmem>>, vector<1x8x8xf32>
    %101 = vector.shape_cast %100 : vector<1x8x8xf32> to vector<8x8xf32>
    %c0_102 = arith.constant 0 : index
    %c158_103 = arith.constant 158 : index
    %102 = vector.load %arg16[%c0_102, %c158_103] : memref<8x1152xf32, #tpu.memory_space<vmem>>, vector<8x900xf32>
    %cst_104 = arith.constant dense<0.000000e+00> : vector<8x900xf32>
    %103 = tpu.matmul %101, %102, %cst_104 {dimension_numbers = #tpu.dot_dimension_numbers<[1], [0], [0], [1], [0, 0, 1, 1], [], []>} : vector<8x8xf32>, vector<8x900xf32>, vector<8x900xf32> -> vector<8x900xf32>
    %104 = arith.addf %99, %103 : vector<8x900xf32>
    %c8_105 = arith.constant 8 : index
    %c0_106 = arith.constant 0 : index
    %c0_107 = arith.constant 0 : index
    %105 = vector.load %arg4[%c8_105, %c0_106, %c0_107] : memref<9x8x8xf32, #tpu.memory_space<vmem>>, vector<1x8x8xf32>
    %106 = vector.shape_cast %105 : vector<1x8x8xf32> to vector<8x8xf32>
    %c0_108 = arith.constant 0 : index
    %c159_109 = arith.constant 159 : index
    %107 = vector.load %arg16[%c0_108, %c159_109] : memref<8x1152xf32, #tpu.memory_space<vmem>>, vector<8x900xf32>
    %cst_110 = arith.constant dense<0.000000e+00> : vector<8x900xf32>
    %108 = tpu.matmul %106, %107, %cst_110 {dimension_numbers = #tpu.dot_dimension_numbers<[1], [0], [0], [1], [0, 0, 1, 1], [], []>} : vector<8x8xf32>, vector<8x900xf32>, vector<8x900xf32> -> vector<8x900xf32>
    %109 = arith.addf %104, %108 : vector<8x900xf32>
    %c0_111 = arith.constant 0 : index
    %c0_112 = arith.constant 0 : index
    %110 = vector.load %arg5[%c0_111, %c0_112] : memref<8x1xf32, #tpu.memory_space<vmem>>, vector<8x1xf32>
    %111 = vector.broadcast %110 : vector<8x1xf32> to vector<8x900xf32>
    %112 = arith.addf %109, %111 : vector<8x900xf32>
    %cst_113 = arith.constant 0.000000e+00 : f32
    %113 = vector.broadcast %cst_113 : f32 to vector<8x900xf32>
    %114 = arith.maximumf %112, %113 : vector<8x900xf32>
    %c0_114 = arith.constant 0 : index
    %c128_115 = arith.constant 128 : index
    %115 = vector.load %arg16[%c0_114, %c128_115] : memref<8x1152xf32, #tpu.memory_space<vmem>>, vector<8x900xf32>
    tpu.vector_store %arg16[%c0_114, %c128_115], %114 {strides = array<i32>} : memref<8x1152xf32, #tpu.memory_space<vmem>>, vector<8x900xf32>,
    %cst_116 = arith.constant 0.000000e+00 : f32
    %116 = vector.broadcast %cst_116 : f32 to vector<8x32xf32>
    %c0_117 = arith.constant 0 : index
    %c1028_118 = arith.constant 1028 : index
    %117 = vector.load %arg16[%c0_117, %c1028_118] : memref<8x1152xf32, #tpu.memory_space<vmem>>, vector<8x32xf32>
    tpu.vector_store %arg16[%c0_117, %c1028_118], %116 {strides = array<i32>} : memref<8x1152xf32, #tpu.memory_space<vmem>>, vector<8x32xf32>,
    %c0_119 = arith.constant 0 : index
    %c129_120 = arith.constant 129 : index
    %118 = vector.load %arg16[%c0_119, %c129_120] : memref<8x1152xf32, #tpu.memory_space<vmem>>, vector<8x900xf32>
    %119 = arith.maximumf %114, %118 : vector<8x900xf32>
    %c0_121 = arith.constant 0 : index
    %c158_122 = arith.constant 158 : index
    %120 = vector.load %arg16[%c0_121, %c158_122] : memref<8x1152xf32, #tpu.memory_space<vmem>>, vector<8x900xf32>
    %121 = arith.maximumf %119, %120 : vector<8x900xf32>
    %c0_123 = arith.constant 0 : index
    %c159_124 = arith.constant 159 : index
    %122 = vector.load %arg16[%c0_123, %c159_124] : memref<8x1152xf32, #tpu.memory_space<vmem>>, vector<8x900xf32>
    %123 = arith.maximumf %121, %122 : vector<8x900xf32>
    %c0_125 = arith.constant 0 : index
    %c0_126 = arith.constant 0 : index
    %124 = vector.load %arg12[%c0_125, %c0_126] : memref<900x256xf32, #tpu.memory_space<vmem>>, vector<900x256xf32>
    %cst_127 = arith.constant dense<0.000000e+00> : vector<8x256xf32>
    %125 = tpu.matmul %123, %124, %cst_127 {dimension_numbers = #tpu.dot_dimension_numbers<[1], [0], [0], [1], [0, 0, 1, 1], [], []>} : vector<8x900xf32>, vector<900x256xf32>, vector<8x256xf32> -> vector<8x256xf32>
    %c0_128 = arith.constant 0 : index
    %c128_129 = arith.constant 128 : index
    %126 = vector.load %arg16[%c0_128, %c128_129] : memref<8x1152xf32, #tpu.memory_space<vmem>>, vector<8x256xf32>
    tpu.vector_store %arg16[%c0_128, %c128_129], %125 {strides = array<i32>} : memref<8x1152xf32, #tpu.memory_space<vmem>>, vector<8x256xf32>,
    %cst_130 = arith.constant 0.000000e+00 : f32
    %127 = vector.broadcast %cst_130 : f32 to vector<8x32xf32>
    %c0_131 = arith.constant 0 : index
    %c384 = arith.constant 384 : index
    %128 = vector.load %arg16[%c0_131, %c384] : memref<8x1152xf32, #tpu.memory_space<vmem>>, vector<8x32xf32>
    tpu.vector_store %arg16[%c0_131, %c384], %127 {strides = array<i32>} : memref<8x1152xf32, #tpu.memory_space<vmem>>, vector<8x32xf32>,
    %cst_132 = arith.constant 0.000000e+00 : f32
    %129 = vector.broadcast %cst_132 : f32 to vector<8x256xf32>
    %c0_133 = arith.constant 0 : index
    %c0_134 = arith.constant 0 : index
    %c0_135 = arith.constant 0 : index
    %130 = vector.load %arg6[%c0_133, %c0_134, %c0_135] : memref<9x8x8xf32, #tpu.memory_space<vmem>>, vector<1x8x8xf32>
    %131 = vector.shape_cast %130 : vector<1x8x8xf32> to vector<8x8xf32>
    %c0_136 = arith.constant 0 : index
    %c111 = arith.constant 111 : index
    %132 = vector.load %arg16[%c0_136, %c111] : memref<8x1152xf32, #tpu.memory_space<vmem>>, vector<8x256xf32>
    %cst_137 = arith.constant dense<0.000000e+00> : vector<8x256xf32>
    %133 = tpu.matmul %131, %132, %cst_137 {dimension_numbers = #tpu.dot_dimension_numbers<[1], [0], [0], [1], [0, 0, 1, 1], [], []>} : vector<8x8xf32>, vector<8x256xf32>, vector<8x256xf32> -> vector<8x256xf32>
    %134 = arith.addf %129, %133 : vector<8x256xf32>
    %c1_138 = arith.constant 1 : index
    %c0_139 = arith.constant 0 : index
    %c0_140 = arith.constant 0 : index
    %135 = vector.load %arg6[%c1_138, %c0_139, %c0_140] : memref<9x8x8xf32, #tpu.memory_space<vmem>>, vector<1x8x8xf32>
    %136 = vector.shape_cast %135 : vector<1x8x8xf32> to vector<8x8xf32>
    %c0_141 = arith.constant 0 : index
    %c112 = arith.constant 112 : index
    %137 = vector.load %arg16[%c0_141, %c112] : memref<8x1152xf32, #tpu.memory_space<vmem>>, vector<8x256xf32>
    %cst_142 = arith.constant dense<0.000000e+00> : vector<8x256xf32>
    %138 = tpu.matmul %136, %137, %cst_142 {dimension_numbers = #tpu.dot_dimension_numbers<[1], [0], [0], [1], [0, 0, 1, 1], [], []>} : vector<8x8xf32>, vector<8x256xf32>, vector<8x256xf32> -> vector<8x256xf32>
    %139 = arith.addf %134, %138 : vector<8x256xf32>
    %c2_143 = arith.constant 2 : index
    %c0_144 = arith.constant 0 : index
    %c0_145 = arith.constant 0 : index
    %140 = vector.load %arg6[%c2_143, %c0_144, %c0_145] : memref<9x8x8xf32, #tpu.memory_space<vmem>>, vector<1x8x8xf32>
    %141 = vector.shape_cast %140 : vector<1x8x8xf32> to vector<8x8xf32>
    %c0_146 = arith.constant 0 : index
    %c113 = arith.constant 113 : index
    %142 = vector.load %arg16[%c0_146, %c113] : memref<8x1152xf32, #tpu.memory_space<vmem>>, vector<8x256xf32>
    %cst_147 = arith.constant dense<0.000000e+00> : vector<8x256xf32>
    %143 = tpu.matmul %141, %142, %cst_147 {dimension_numbers = #tpu.dot_dimension_numbers<[1], [0], [0], [1], [0, 0, 1, 1], [], []>} : vector<8x8xf32>, vector<8x256xf32>, vector<8x256xf32> -> vector<8x256xf32>
    %144 = arith.addf %139, %143 : vector<8x256xf32>
    %c3_148 = arith.constant 3 : index
    %c0_149 = arith.constant 0 : index
    %c0_150 = arith.constant 0 : index
    %145 = vector.load %arg6[%c3_148, %c0_149, %c0_150] : memref<9x8x8xf32, #tpu.memory_space<vmem>>, vector<1x8x8xf32>
    %146 = vector.shape_cast %145 : vector<1x8x8xf32> to vector<8x8xf32>
    %c0_151 = arith.constant 0 : index
    %c127_152 = arith.constant 127 : index
    %147 = vector.load %arg16[%c0_151, %c127_152] : memref<8x1152xf32, #tpu.memory_space<vmem>>, vector<8x256xf32>
    %cst_153 = arith.constant dense<0.000000e+00> : vector<8x256xf32>
    %148 = tpu.matmul %146, %147, %cst_153 {dimension_numbers = #tpu.dot_dimension_numbers<[1], [0], [0], [1], [0, 0, 1, 1], [], []>} : vector<8x8xf32>, vector<8x256xf32>, vector<8x256xf32> -> vector<8x256xf32>
    %149 = arith.addf %144, %148 : vector<8x256xf32>
    %c4_154 = arith.constant 4 : index
    %c0_155 = arith.constant 0 : index
    %c0_156 = arith.constant 0 : index
    %150 = vector.load %arg6[%c4_154, %c0_155, %c0_156] : memref<9x8x8xf32, #tpu.memory_space<vmem>>, vector<1x8x8xf32>
    %151 = vector.shape_cast %150 : vector<1x8x8xf32> to vector<8x8xf32>
    %c0_157 = arith.constant 0 : index
    %c128_158 = arith.constant 128 : index
    %152 = vector.load %arg16[%c0_157, %c128_158] : memref<8x1152xf32, #tpu.memory_space<vmem>>, vector<8x256xf32>
    %cst_159 = arith.constant dense<0.000000e+00> : vector<8x256xf32>
    %153 = tpu.matmul %151, %152, %cst_159 {dimension_numbers = #tpu.dot_dimension_numbers<[1], [0], [0], [1], [0, 0, 1, 1], [], []>} : vector<8x8xf32>, vector<8x256xf32>, vector<8x256xf32> -> vector<8x256xf32>
    %154 = arith.addf %149, %153 : vector<8x256xf32>
    %c5_160 = arith.constant 5 : index
    %c0_161 = arith.constant 0 : index
    %c0_162 = arith.constant 0 : index
    %155 = vector.load %arg6[%c5_160, %c0_161, %c0_162] : memref<9x8x8xf32, #tpu.memory_space<vmem>>, vector<1x8x8xf32>
    %156 = vector.shape_cast %155 : vector<1x8x8xf32> to vector<8x8xf32>
    %c0_163 = arith.constant 0 : index
    %c129_164 = arith.constant 129 : index
    %157 = vector.load %arg16[%c0_163, %c129_164] : memref<8x1152xf32, #tpu.memory_space<vmem>>, vector<8x256xf32>
    %cst_165 = arith.constant dense<0.000000e+00> : vector<8x256xf32>
    %158 = tpu.matmul %156, %157, %cst_165 {dimension_numbers = #tpu.dot_dimension_numbers<[1], [0], [0], [1], [0, 0, 1, 1], [], []>} : vector<8x8xf32>, vector<8x256xf32>, vector<8x256xf32> -> vector<8x256xf32>
    %159 = arith.addf %154, %158 : vector<8x256xf32>
    %c6_166 = arith.constant 6 : index
    %c0_167 = arith.constant 0 : index
    %c0_168 = arith.constant 0 : index
    %160 = vector.load %arg6[%c6_166, %c0_167, %c0_168] : memref<9x8x8xf32, #tpu.memory_space<vmem>>, vector<1x8x8xf32>
    %161 = vector.shape_cast %160 : vector<1x8x8xf32> to vector<8x8xf32>
    %c0_169 = arith.constant 0 : index
    %c143 = arith.constant 143 : index
    %162 = vector.load %arg16[%c0_169, %c143] : memref<8x1152xf32, #tpu.memory_space<vmem>>, vector<8x256xf32>
    %cst_170 = arith.constant dense<0.000000e+00> : vector<8x256xf32>
    %163 = tpu.matmul %161, %162, %cst_170 {dimension_numbers = #tpu.dot_dimension_numbers<[1], [0], [0], [1], [0, 0, 1, 1], [], []>} : vector<8x8xf32>, vector<8x256xf32>, vector<8x256xf32> -> vector<8x256xf32>
    %164 = arith.addf %159, %163 : vector<8x256xf32>
    %c7_171 = arith.constant 7 : index
    %c0_172 = arith.constant 0 : index
    %c0_173 = arith.constant 0 : index
    %165 = vector.load %arg6[%c7_171, %c0_172, %c0_173] : memref<9x8x8xf32, #tpu.memory_space<vmem>>, vector<1x8x8xf32>
    %166 = vector.shape_cast %165 : vector<1x8x8xf32> to vector<8x8xf32>
    %c0_174 = arith.constant 0 : index
    %c144 = arith.constant 144 : index
    %167 = vector.load %arg16[%c0_174, %c144] : memref<8x1152xf32, #tpu.memory_space<vmem>>, vector<8x256xf32>
    %cst_175 = arith.constant dense<0.000000e+00> : vector<8x256xf32>
    %168 = tpu.matmul %166, %167, %cst_175 {dimension_numbers = #tpu.dot_dimension_numbers<[1], [0], [0], [1], [0, 0, 1, 1], [], []>} : vector<8x8xf32>, vector<8x256xf32>, vector<8x256xf32> -> vector<8x256xf32>
    %169 = arith.addf %164, %168 : vector<8x256xf32>
    %c8_176 = arith.constant 8 : index
    %c0_177 = arith.constant 0 : index
    %c0_178 = arith.constant 0 : index
    %170 = vector.load %arg6[%c8_176, %c0_177, %c0_178] : memref<9x8x8xf32, #tpu.memory_space<vmem>>, vector<1x8x8xf32>
    %171 = vector.shape_cast %170 : vector<1x8x8xf32> to vector<8x8xf32>
    %c0_179 = arith.constant 0 : index
    %c145 = arith.constant 145 : index
    %172 = vector.load %arg16[%c0_179, %c145] : memref<8x1152xf32, #tpu.memory_space<vmem>>, vector<8x256xf32>
    %cst_180 = arith.constant dense<0.000000e+00> : vector<8x256xf32>
    %173 = tpu.matmul %171, %172, %cst_180 {dimension_numbers = #tpu.dot_dimension_numbers<[1], [0], [0], [1], [0, 0, 1, 1], [], []>} : vector<8x8xf32>, vector<8x256xf32>, vector<8x256xf32> -> vector<8x256xf32>
    %174 = arith.addf %169, %173 : vector<8x256xf32>
    %c0_181 = arith.constant 0 : index
    %c0_182 = arith.constant 0 : index
    %175 = vector.load %arg7[%c0_181, %c0_182] : memref<8x1xf32, #tpu.memory_space<vmem>>, vector<8x1xf32>
    %176 = vector.broadcast %175 : vector<8x1xf32> to vector<8x256xf32>
    %177 = arith.addf %174, %176 : vector<8x256xf32>
    %cst_183 = arith.constant 0.000000e+00 : f32
    %178 = vector.broadcast %cst_183 : f32 to vector<8x256xf32>
    %179 = arith.maximumf %177, %178 : vector<8x256xf32>
    %c0_184 = arith.constant 0 : index
    %c0_185 = arith.constant 0 : index
    %180 = vector.load %arg14[%c0_184, %c0_185] : memref<1x256xf32, #tpu.memory_space<vmem>>, vector<1x256xf32>
    %181 = vector.broadcast %180 : vector<1x256xf32> to vector<8x256xf32>
    %182 = arith.mulf %179, %181 : vector<8x256xf32>
    %c0_186 = arith.constant 0 : index
    %c128_187 = arith.constant 128 : index
    %183 = vector.load %arg16[%c0_186, %c128_187] : memref<8x1152xf32, #tpu.memory_space<vmem>>, vector<8x256xf32>
    tpu.vector_store %arg16[%c0_186, %c128_187], %182 {strides = array<i32>} : memref<8x1152xf32, #tpu.memory_space<vmem>>, vector<8x256xf32>,
    %cst_188 = arith.constant 0.000000e+00 : f32
    %184 = vector.broadcast %cst_188 : f32 to vector<8x32xf32>
    %c0_189 = arith.constant 0 : index
    %c384_190 = arith.constant 384 : index
    %185 = vector.load %arg16[%c0_189, %c384_190] : memref<8x1152xf32, #tpu.memory_space<vmem>>, vector<8x32xf32>
    tpu.vector_store %arg16[%c0_189, %c384_190], %184 {strides = array<i32>} : memref<8x1152xf32, #tpu.memory_space<vmem>>, vector<8x32xf32>,
    %cst_191 = arith.constant 0.000000e+00 : f32
    %186 = vector.broadcast %cst_191 : f32 to vector<8x256xf32>
    %c0_192 = arith.constant 0 : index
    %c0_193 = arith.constant 0 : index
    %c0_194 = arith.constant 0 : index
    %187 = vector.load %arg8[%c0_192, %c0_193, %c0_194] : memref<9x8x8xf32, #tpu.memory_space<vmem>>, vector<1x8x8xf32>
    %188 = vector.shape_cast %187 : vector<1x8x8xf32> to vector<8x8xf32>
    %c0_195 = arith.constant 0 : index
    %c111_196 = arith.constant 111 : index
    %189 = vector.load %arg16[%c0_195, %c111_196] : memref<8x1152xf32, #tpu.memory_space<vmem>>, vector<8x256xf32>
    %cst_197 = arith.constant dense<0.000000e+00> : vector<8x256xf32>
    %190 = tpu.matmul %188, %189, %cst_197 {dimension_numbers = #tpu.dot_dimension_numbers<[1], [0], [0], [1], [0, 0, 1, 1], [], []>} : vector<8x8xf32>, vector<8x256xf32>, vector<8x256xf32> -> vector<8x256xf32>
    %191 = arith.addf %186, %190 : vector<8x256xf32>
    %c1_198 = arith.constant 1 : index
    %c0_199 = arith.constant 0 : index
    %c0_200 = arith.constant 0 : index
    %192 = vector.load %arg8[%c1_198, %c0_199, %c0_200] : memref<9x8x8xf32, #tpu.memory_space<vmem>>, vector<1x8x8xf32>
    %193 = vector.shape_cast %192 : vector<1x8x8xf32> to vector<8x8xf32>
    %c0_201 = arith.constant 0 : index
    %c112_202 = arith.constant 112 : index
    %194 = vector.load %arg16[%c0_201, %c112_202] : memref<8x1152xf32, #tpu.memory_space<vmem>>, vector<8x256xf32>
    %cst_203 = arith.constant dense<0.000000e+00> : vector<8x256xf32>
    %195 = tpu.matmul %193, %194, %cst_203 {dimension_numbers = #tpu.dot_dimension_numbers<[1], [0], [0], [1], [0, 0, 1, 1], [], []>} : vector<8x8xf32>, vector<8x256xf32>, vector<8x256xf32> -> vector<8x256xf32>
    %196 = arith.addf %191, %195 : vector<8x256xf32>
    %c2_204 = arith.constant 2 : index
    %c0_205 = arith.constant 0 : index
    %c0_206 = arith.constant 0 : index
    %197 = vector.load %arg8[%c2_204, %c0_205, %c0_206] : memref<9x8x8xf32, #tpu.memory_space<vmem>>, vector<1x8x8xf32>
    %198 = vector.shape_cast %197 : vector<1x8x8xf32> to vector<8x8xf32>
    %c0_207 = arith.constant 0 : index
    %c113_208 = arith.constant 113 : index
    %199 = vector.load %arg16[%c0_207, %c113_208] : memref<8x1152xf32, #tpu.memory_space<vmem>>, vector<8x256xf32>
    %cst_209 = arith.constant dense<0.000000e+00> : vector<8x256xf32>
    %200 = tpu.matmul %198, %199, %cst_209 {dimension_numbers = #tpu.dot_dimension_numbers<[1], [0], [0], [1], [0, 0, 1, 1], [], []>} : vector<8x8xf32>, vector<8x256xf32>, vector<8x256xf32> -> vector<8x256xf32>
    %201 = arith.addf %196, %200 : vector<8x256xf32>
    %c3_210 = arith.constant 3 : index
    %c0_211 = arith.constant 0 : index
    %c0_212 = arith.constant 0 : index
    %202 = vector.load %arg8[%c3_210, %c0_211, %c0_212] : memref<9x8x8xf32, #tpu.memory_space<vmem>>, vector<1x8x8xf32>
    %203 = vector.shape_cast %202 : vector<1x8x8xf32> to vector<8x8xf32>
    %c0_213 = arith.constant 0 : index
    %c127_214 = arith.constant 127 : index
    %204 = vector.load %arg16[%c0_213, %c127_214] : memref<8x1152xf32, #tpu.memory_space<vmem>>, vector<8x256xf32>
    %cst_215 = arith.constant dense<0.000000e+00> : vector<8x256xf32>
    %205 = tpu.matmul %203, %204, %cst_215 {dimension_numbers = #tpu.dot_dimension_numbers<[1], [0], [0], [1], [0, 0, 1, 1], [], []>} : vector<8x8xf32>, vector<8x256xf32>, vector<8x256xf32> -> vector<8x256xf32>
    %206 = arith.addf %201, %205 : vector<8x256xf32>
    %c4_216 = arith.constant 4 : index
    %c0_217 = arith.constant 0 : index
    %c0_218 = arith.constant 0 : index
    %207 = vector.load %arg8[%c4_216, %c0_217, %c0_218] : memref<9x8x8xf32, #tpu.memory_space<vmem>>, vector<1x8x8xf32>
    %208 = vector.shape_cast %207 : vector<1x8x8xf32> to vector<8x8xf32>
    %c0_219 = arith.constant 0 : index
    %c128_220 = arith.constant 128 : index
    %209 = vector.load %arg16[%c0_219, %c128_220] : memref<8x1152xf32, #tpu.memory_space<vmem>>, vector<8x256xf32>
    %cst_221 = arith.constant dense<0.000000e+00> : vector<8x256xf32>
    %210 = tpu.matmul %208, %209, %cst_221 {dimension_numbers = #tpu.dot_dimension_numbers<[1], [0], [0], [1], [0, 0, 1, 1], [], []>} : vector<8x8xf32>, vector<8x256xf32>, vector<8x256xf32> -> vector<8x256xf32>
    %211 = arith.addf %206, %210 : vector<8x256xf32>
    %c5_222 = arith.constant 5 : index
    %c0_223 = arith.constant 0 : index
    %c0_224 = arith.constant 0 : index
    %212 = vector.load %arg8[%c5_222, %c0_223, %c0_224] : memref<9x8x8xf32, #tpu.memory_space<vmem>>, vector<1x8x8xf32>
    %213 = vector.shape_cast %212 : vector<1x8x8xf32> to vector<8x8xf32>
    %c0_225 = arith.constant 0 : index
    %c129_226 = arith.constant 129 : index
    %214 = vector.load %arg16[%c0_225, %c129_226] : memref<8x1152xf32, #tpu.memory_space<vmem>>, vector<8x256xf32>
    %cst_227 = arith.constant dense<0.000000e+00> : vector<8x256xf32>
    %215 = tpu.matmul %213, %214, %cst_227 {dimension_numbers = #tpu.dot_dimension_numbers<[1], [0], [0], [1], [0, 0, 1, 1], [], []>} : vector<8x8xf32>, vector<8x256xf32>, vector<8x256xf32> -> vector<8x256xf32>
    %216 = arith.addf %211, %215 : vector<8x256xf32>
    %c6_228 = arith.constant 6 : index
    %c0_229 = arith.constant 0 : index
    %c0_230 = arith.constant 0 : index
    %217 = vector.load %arg8[%c6_228, %c0_229, %c0_230] : memref<9x8x8xf32, #tpu.memory_space<vmem>>, vector<1x8x8xf32>
    %218 = vector.shape_cast %217 : vector<1x8x8xf32> to vector<8x8xf32>
    %c0_231 = arith.constant 0 : index
    %c143_232 = arith.constant 143 : index
    %219 = vector.load %arg16[%c0_231, %c143_232] : memref<8x1152xf32, #tpu.memory_space<vmem>>, vector<8x256xf32>
    %cst_233 = arith.constant dense<0.000000e+00> : vector<8x256xf32>
    %220 = tpu.matmul %218, %219, %cst_233 {dimension_numbers = #tpu.dot_dimension_numbers<[1], [0], [0], [1], [0, 0, 1, 1], [], []>} : vector<8x8xf32>, vector<8x256xf32>, vector<8x256xf32> -> vector<8x256xf32>
    %221 = arith.addf %216, %220 : vector<8x256xf32>
    %c7_234 = arith.constant 7 : index
    %c0_235 = arith.constant 0 : index
    %c0_236 = arith.constant 0 : index
    %222 = vector.load %arg8[%c7_234, %c0_235, %c0_236] : memref<9x8x8xf32, #tpu.memory_space<vmem>>, vector<1x8x8xf32>
    %223 = vector.shape_cast %222 : vector<1x8x8xf32> to vector<8x8xf32>
    %c0_237 = arith.constant 0 : index
    %c144_238 = arith.constant 144 : index
    %224 = vector.load %arg16[%c0_237, %c144_238] : memref<8x1152xf32, #tpu.memory_space<vmem>>, vector<8x256xf32>
    %cst_239 = arith.constant dense<0.000000e+00> : vector<8x256xf32>
    %225 = tpu.matmul %223, %224, %cst_239 {dimension_numbers = #tpu.dot_dimension_numbers<[1], [0], [0], [1], [0, 0, 1, 1], [], []>} : vector<8x8xf32>, vector<8x256xf32>, vector<8x256xf32> -> vector<8x256xf32>
    %226 = arith.addf %221, %225 : vector<8x256xf32>
    %c8_240 = arith.constant 8 : index
    %c0_241 = arith.constant 0 : index
    %c0_242 = arith.constant 0 : index
    %227 = vector.load %arg8[%c8_240, %c0_241, %c0_242] : memref<9x8x8xf32, #tpu.memory_space<vmem>>, vector<1x8x8xf32>
    %228 = vector.shape_cast %227 : vector<1x8x8xf32> to vector<8x8xf32>
    %c0_243 = arith.constant 0 : index
    %c145_244 = arith.constant 145 : index
    %229 = vector.load %arg16[%c0_243, %c145_244] : memref<8x1152xf32, #tpu.memory_space<vmem>>, vector<8x256xf32>
    %cst_245 = arith.constant dense<0.000000e+00> : vector<8x256xf32>
    %230 = tpu.matmul %228, %229, %cst_245 {dimension_numbers = #tpu.dot_dimension_numbers<[1], [0], [0], [1], [0, 0, 1, 1], [], []>} : vector<8x8xf32>, vector<8x256xf32>, vector<8x256xf32> -> vector<8x256xf32>
    %231 = arith.addf %226, %230 : vector<8x256xf32>
    %c0_246 = arith.constant 0 : index
    %c0_247 = arith.constant 0 : index
    %232 = vector.load %arg9[%c0_246, %c0_247] : memref<8x1xf32, #tpu.memory_space<vmem>>, vector<8x1xf32>
    %233 = vector.broadcast %232 : vector<8x1xf32> to vector<8x256xf32>
    %234 = arith.addf %231, %233 : vector<8x256xf32>
    %cst_248 = arith.constant 0.000000e+00 : f32
    %235 = vector.broadcast %cst_248 : f32 to vector<8x256xf32>
    %236 = arith.maximumf %234, %235 : vector<8x256xf32>
    %c0_249 = arith.constant 0 : index
    %c128_250 = arith.constant 128 : index
    %237 = vector.load %arg16[%c0_249, %c128_250] : memref<8x1152xf32, #tpu.memory_space<vmem>>, vector<8x256xf32>
    tpu.vector_store %arg16[%c0_249, %c128_250], %236 {strides = array<i32>} : memref<8x1152xf32, #tpu.memory_space<vmem>>, vector<8x256xf32>,
    %cst_251 = arith.constant 0.000000e+00 : f32
    %238 = vector.broadcast %cst_251 : f32 to vector<8x32xf32>
    %c0_252 = arith.constant 0 : index
    %c384_253 = arith.constant 384 : index
    %239 = vector.load %arg16[%c0_252, %c384_253] : memref<8x1152xf32, #tpu.memory_space<vmem>>, vector<8x32xf32>
    tpu.vector_store %arg16[%c0_252, %c384_253], %238 {strides = array<i32>} : memref<8x1152xf32, #tpu.memory_space<vmem>>, vector<8x32xf32>,
    %c0_254 = arith.constant 0 : index
    %c129_255 = arith.constant 129 : index
    %240 = vector.load %arg16[%c0_254, %c129_255] : memref<8x1152xf32, #tpu.memory_space<vmem>>, vector<8x256xf32>
    %241 = arith.maximumf %236, %240 : vector<8x256xf32>
    %c0_256 = arith.constant 0 : index
    %c144_257 = arith.constant 144 : index
    %242 = vector.load %arg16[%c0_256, %c144_257] : memref<8x1152xf32, #tpu.memory_space<vmem>>, vector<8x256xf32>
    %243 = arith.maximumf %241, %242 : vector<8x256xf32>
    %c0_258 = arith.constant 0 : index
    %c145_259 = arith.constant 145 : index
    %244 = vector.load %arg16[%c0_258, %c145_259] : memref<8x1152xf32, #tpu.memory_space<vmem>>, vector<8x256xf32>
    %245 = arith.maximumf %243, %244 : vector<8x256xf32>
    %cst_260 = arith.constant 0.000000e+00 : f32
    %246 = vector.broadcast %cst_260 : f32 to vector<1x10xf32>
    %247 = vector.extract_strided_slice %245 {offsets = [0, 0], sizes = [1, 256], strides = [1, 1]} : vector<8x256xf32> to vector<1x256xf32>
    %c0_261 = arith.constant 0 : index
    %c0_262 = arith.constant 0 : index
    %c0_263 = arith.constant 0 : index
    %248 = vector.load %arg10[%c0_261, %c0_262, %c0_263] : memref<8x256x10xf32, #tpu.memory_space<vmem>>, vector<1x256x10xf32>
    %249 = vector.shape_cast %248 : vector<1x256x10xf32> to vector<256x10xf32>
    %cst_264 = arith.constant dense<0.000000e+00> : vector<1x10xf32>
    %250 = tpu.matmul %247, %249, %cst_264 {dimension_numbers = #tpu.dot_dimension_numbers<[1], [0], [0], [1], [0, 0, 1, 1], [], []>} : vector<1x256xf32>, vector<256x10xf32>, vector<1x10xf32> -> vector<1x10xf32>
    %251 = arith.addf %246, %250 : vector<1x10xf32>
    %252 = vector.extract_strided_slice %245 {offsets = [1, 0], sizes = [1, 256], strides = [1, 1]} : vector<8x256xf32> to vector<1x256xf32>
    %c1_265 = arith.constant 1 : index
    %c0_266 = arith.constant 0 : index
    %c0_267 = arith.constant 0 : index
    %253 = vector.load %arg10[%c1_265, %c0_266, %c0_267] : memref<8x256x10xf32, #tpu.memory_space<vmem>>, vector<1x256x10xf32>
    %254 = vector.shape_cast %253 : vector<1x256x10xf32> to vector<256x10xf32>
    %cst_268 = arith.constant dense<0.000000e+00> : vector<1x10xf32>
    %255 = tpu.matmul %252, %254, %cst_268 {dimension_numbers = #tpu.dot_dimension_numbers<[1], [0], [0], [1], [0, 0, 1, 1], [], []>} : vector<1x256xf32>, vector<256x10xf32>, vector<1x10xf32> -> vector<1x10xf32>
    %256 = arith.addf %251, %255 : vector<1x10xf32>
    %257 = vector.extract_strided_slice %245 {offsets = [2, 0], sizes = [1, 256], strides = [1, 1]} : vector<8x256xf32> to vector<1x256xf32>
    %c2_269 = arith.constant 2 : index
    %c0_270 = arith.constant 0 : index
    %c0_271 = arith.constant 0 : index
    %258 = vector.load %arg10[%c2_269, %c0_270, %c0_271] : memref<8x256x10xf32, #tpu.memory_space<vmem>>, vector<1x256x10xf32>
    %259 = vector.shape_cast %258 : vector<1x256x10xf32> to vector<256x10xf32>
    %cst_272 = arith.constant dense<0.000000e+00> : vector<1x10xf32>
    %260 = tpu.matmul %257, %259, %cst_272 {dimension_numbers = #tpu.dot_dimension_numbers<[1], [0], [0], [1], [0, 0, 1, 1], [], []>} : vector<1x256xf32>, vector<256x10xf32>, vector<1x10xf32> -> vector<1x10xf32>
    %261 = arith.addf %256, %260 : vector<1x10xf32>
    %262 = vector.extract_strided_slice %245 {offsets = [3, 0], sizes = [1, 256], strides = [1, 1]} : vector<8x256xf32> to vector<1x256xf32>
    %c3_273 = arith.constant 3 : index
    %c0_274 = arith.constant 0 : index
    %c0_275 = arith.constant 0 : index
    %263 = vector.load %arg10[%c3_273, %c0_274, %c0_275] : memref<8x256x10xf32, #tpu.memory_space<vmem>>, vector<1x256x10xf32>
    %264 = vector.shape_cast %263 : vector<1x256x10xf32> to vector<256x10xf32>
    %cst_276 = arith.constant dense<0.000000e+00> : vector<1x10xf32>
    %265 = tpu.matmul %262, %264, %cst_276 {dimension_numbers = #tpu.dot_dimension_numbers<[1], [0], [0], [1], [0, 0, 1, 1], [], []>} : vector<1x256xf32>, vector<256x10xf32>, vector<1x10xf32> -> vector<1x10xf32>
    %266 = arith.addf %261, %265 : vector<1x10xf32>
    %267 = vector.extract_strided_slice %245 {offsets = [4, 0], sizes = [1, 256], strides = [1, 1]} : vector<8x256xf32> to vector<1x256xf32>
    %c4_277 = arith.constant 4 : index
    %c0_278 = arith.constant 0 : index
    %c0_279 = arith.constant 0 : index
    %268 = vector.load %arg10[%c4_277, %c0_278, %c0_279] : memref<8x256x10xf32, #tpu.memory_space<vmem>>, vector<1x256x10xf32>
    %269 = vector.shape_cast %268 : vector<1x256x10xf32> to vector<256x10xf32>
    %cst_280 = arith.constant dense<0.000000e+00> : vector<1x10xf32>
    %270 = tpu.matmul %267, %269, %cst_280 {dimension_numbers = #tpu.dot_dimension_numbers<[1], [0], [0], [1], [0, 0, 1, 1], [], []>} : vector<1x256xf32>, vector<256x10xf32>, vector<1x10xf32> -> vector<1x10xf32>
    %271 = arith.addf %266, %270 : vector<1x10xf32>
    %272 = vector.extract_strided_slice %245 {offsets = [5, 0], sizes = [1, 256], strides = [1, 1]} : vector<8x256xf32> to vector<1x256xf32>
    %c5_281 = arith.constant 5 : index
    %c0_282 = arith.constant 0 : index
    %c0_283 = arith.constant 0 : index
    %273 = vector.load %arg10[%c5_281, %c0_282, %c0_283] : memref<8x256x10xf32, #tpu.memory_space<vmem>>, vector<1x256x10xf32>
    %274 = vector.shape_cast %273 : vector<1x256x10xf32> to vector<256x10xf32>
    %cst_284 = arith.constant dense<0.000000e+00> : vector<1x10xf32>
    %275 = tpu.matmul %272, %274, %cst_284 {dimension_numbers = #tpu.dot_dimension_numbers<[1], [0], [0], [1], [0, 0, 1, 1], [], []>} : vector<1x256xf32>, vector<256x10xf32>, vector<1x10xf32> -> vector<1x10xf32>
    %276 = arith.addf %271, %275 : vector<1x10xf32>
    %277 = vector.extract_strided_slice %245 {offsets = [6, 0], sizes = [1, 256], strides = [1, 1]} : vector<8x256xf32> to vector<1x256xf32>
    %c6_285 = arith.constant 6 : index
    %c0_286 = arith.constant 0 : index
    %c0_287 = arith.constant 0 : index
    %278 = vector.load %arg10[%c6_285, %c0_286, %c0_287] : memref<8x256x10xf32, #tpu.memory_space<vmem>>, vector<1x256x10xf32>
    %279 = vector.shape_cast %278 : vector<1x256x10xf32> to vector<256x10xf32>
    %cst_288 = arith.constant dense<0.000000e+00> : vector<1x10xf32>
    %280 = tpu.matmul %277, %279, %cst_288 {dimension_numbers = #tpu.dot_dimension_numbers<[1], [0], [0], [1], [0, 0, 1, 1], [], []>} : vector<1x256xf32>, vector<256x10xf32>, vector<1x10xf32> -> vector<1x10xf32>
    %281 = arith.addf %276, %280 : vector<1x10xf32>
    %282 = vector.extract_strided_slice %245 {offsets = [7, 0], sizes = [1, 256], strides = [1, 1]} : vector<8x256xf32> to vector<1x256xf32>
    %c7_289 = arith.constant 7 : index
    %c0_290 = arith.constant 0 : index
    %c0_291 = arith.constant 0 : index
    %283 = vector.load %arg10[%c7_289, %c0_290, %c0_291] : memref<8x256x10xf32, #tpu.memory_space<vmem>>, vector<1x256x10xf32>
    %284 = vector.shape_cast %283 : vector<1x256x10xf32> to vector<256x10xf32>
    %cst_292 = arith.constant dense<0.000000e+00> : vector<1x10xf32>
    %285 = tpu.matmul %282, %284, %cst_292 {dimension_numbers = #tpu.dot_dimension_numbers<[1], [0], [0], [1], [0, 0, 1, 1], [], []>} : vector<1x256xf32>, vector<256x10xf32>, vector<1x10xf32> -> vector<1x10xf32>
    %286 = arith.addf %281, %285 : vector<1x10xf32>
    %c0_293 = arith.constant 0 : index
    %c0_294 = arith.constant 0 : index
    %287 = vector.load %arg11[%c0_293, %c0_294] : memref<1x10xf32, #tpu.memory_space<vmem>>, vector<1x10xf32>
    %288 = arith.addf %286, %287 : vector<1x10xf32>
    %c0_295 = arith.constant 0 : index
    %c0_296 = arith.constant 0 : index
    %c0_297 = arith.constant 0 : index
    %289 = vector.load %arg15[%c0_295, %c0_296, %c0_297] : memref<1x1x10xf32, #tpu.memory_space<vmem>>, vector<1x1x10xf32>
    %290 = vector.shape_cast %289 : vector<1x1x10xf32> to vector<1x10xf32>
    %291 = vector.shape_cast %288 : vector<1x10xf32> to vector<1x1x10xf32>
    tpu.vector_store %arg15[%c0_295, %c0_296, %c0_297], %291 {strides = array<i32>} : memref<1x1x10xf32, #tpu.memory_space<vmem>>, vector<1x1x10xf32>,
    return
  }
  func.func @transform_0(%arg0: i32) -> (i32, i32, i32) {
    %c0_i32 = arith.constant 0 : i32
    %c0_i32_0 = arith.constant 0 : i32
    %c0_i32_1 = arith.constant 0 : i32
    return %arg0, %c0_i32, %c0_i32_0 : i32, i32, i32
  }
  func.func @transform_1(%arg0: i32) -> (i32, i32, i32) {
    %c0_i32 = arith.constant 0 : i32
    %c0_i32_0 = arith.constant 0 : i32
    %c0_i32_1 = arith.constant 0 : i32
    %c0_i32_2 = arith.constant 0 : i32
    return %c0_i32, %c0_i32_0, %c0_i32_1 : i32, i32, i32
  }
  func.func @transform_2(%arg0: i32) -> (i32, i32) {
    %c0_i32 = arith.constant 0 : i32
    %c0_i32_0 = arith.constant 0 : i32
    %c0_i32_1 = arith.constant 0 : i32
    return %c0_i32, %c0_i32_0 : i32, i32
  }
  func.func @transform_3(%arg0: i32) -> (i32, i32, i32) {
    %c0_i32 = arith.constant 0 : i32
    %c0_i32_0 = arith.constant 0 : i32
    %c0_i32_1 = arith.constant 0 : i32
    %c0_i32_2 = arith.constant 0 : i32
    return %c0_i32, %c0_i32_0, %c0_i32_1 : i32, i32, i32
  }
  func.func @transform_4(%arg0: i32) -> (i32, i32) {
    %c0_i32 = arith.constant 0 : i32
    %c0_i32_0 = arith.constant 0 : i32
    %c0_i32_1 = arith.constant 0 : i32
    return %c0_i32, %c0_i32_0 : i32, i32
  }
  func.func @transform_5(%arg0: i32) -> (i32, i32, i32) {
    %c0_i32 = arith.constant 0 : i32
    %c0_i32_0 = arith.constant 0 : i32
    %c0_i32_1 = arith.constant 0 : i32
    %c0_i32_2 = arith.constant 0 : i32
    return %c0_i32, %c0_i32_0, %c0_i32_1 : i32, i32, i32
  }
  func.func @transform_6(%arg0: i32) -> (i32, i32) {
    %c0_i32 = arith.constant 0 : i32
    %c0_i32_0 = arith.constant 0 : i32
    %c0_i32_1 = arith.constant 0 : i32
    return %c0_i32, %c0_i32_0 : i32, i32
  }
  func.func @transform_7(%arg0: i32) -> (i32, i32, i32) {
    %c0_i32 = arith.constant 0 : i32
    %c0_i32_0 = arith.constant 0 : i32
    %c0_i32_1 = arith.constant 0 : i32
    %c0_i32_2 = arith.constant 0 : i32
    return %c0_i32, %c0_i32_0, %c0_i32_1 : i32, i32, i32
  }
  func.func @transform_8(%arg0: i32) -> (i32, i32) {
    %c0_i32 = arith.constant 0 : i32
    %c0_i32_0 = arith.constant 0 : i32
    %c0_i32_1 = arith.constant 0 : i32
    return %c0_i32, %c0_i32_0 : i32, i32
  }
  func.func @transform_9(%arg0: i32) -> (i32, i32, i32) {
    %c0_i32 = arith.constant 0 : i32
    %c0_i32_0 = arith.constant 0 : i32
    %c0_i32_1 = arith.constant 0 : i32
    %c0_i32_2 = arith.constant 0 : i32
    return %c0_i32, %c0_i32_0, %c0_i32_1 : i32, i32, i32
  }
  func.func @transform_10(%arg0: i32) -> (i32, i32) {
    %c0_i32 = arith.constant 0 : i32
    %c0_i32_0 = arith.constant 0 : i32
    %c0_i32_1 = arith.constant 0 : i32
    return %c0_i32, %c0_i32_0 : i32, i32
  }
  func.func @transform_11(%arg0: i32) -> (i32, i32) {
    %c0_i32 = arith.constant 0 : i32
    %c0_i32_0 = arith.constant 0 : i32
    %c0_i32_1 = arith.constant 0 : i32
    return %c0_i32, %c0_i32_0 : i32, i32
  }
  func.func @transform_12(%arg0: i32) -> (i32, i32) {
    %c0_i32 = arith.constant 0 : i32
    %c0_i32_0 = arith.constant 0 : i32
    %c0_i32_1 = arith.constant 0 : i32
    return %c0_i32, %c0_i32_0 : i32, i32
  }
  func.func @transform_13(%arg0: i32) -> (i32, i32) {
    %c0_i32 = arith.constant 0 : i32
    %c0_i32_0 = arith.constant 0 : i32
    %c0_i32_1 = arith.constant 0 : i32
    return %c0_i32, %c0_i32_0 : i32, i32
  }
  func.func @transform_14(%arg0: i32) -> (i32, i32, i32) {
    %c0_i32 = arith.constant 0 : i32
    %c0_i32_0 = arith.constant 0 : i32
    %c0_i32_1 = arith.constant 0 : i32
    return %arg0, %c0_i32, %c0_i32_0 : i32, i32, i32
  }
}

</mosaic_0001>

<bundles_post_ra>
// kernel: cnn_mnist_forward.1
= control target key start
LH: loop header
LB: loop body
LE: loop exit
PB: predicated region body
PF: predicated region fallthrough
CT: control target
= control target key end

     0   :  { %s10589_s0 = inlined_call_operand.vmem [shape: f32[2,1,900], index: 0, kind: input, shape index: {}]   ;;  %s10590_s1 = inlined_call_operand.vmem [shape: f32[9,8,1], index: 1, kind: input, shape index: {}]   ;;  %s10591_s2 = inlined_call_operand.vmem [shape: f32[8,1], index: 2, kind: input, shape index: {}]   ;;  %s10592_s3 = inlined_call_operand.vmem [shape: f32[9,8,8], index: 3, kind: input, shape index: {}]   ;;  %s10593_s4 = inlined_call_operand.vmem [shape: f32[8,1], index: 4, kind: input, shape index: {}]   ;;  %s10594_s5 = inlined_call_operand.vmem [shape: f32[9,8,8], index: 5, kind: input, shape index: {}]   ;;  %s10595_s6 = inlined_call_operand.vmem [shape: f32[8,1], index: 6, kind: input, shape index: {}]   ;;  %s10596_s7 = inlined_call_operand.vmem [shape: f32[9,8,8], index: 7, kind: input, shape index: {}]   ;;  %s10597_s8 = inlined_call_operand.vmem [shape: f32[8,1], index: 8, kind: input, shape index: {}]   ;;  %s10598_s9 = inlined_call_operand.vmem [shape: f32[8,256,10], index: 9, kind: input, shape index: {}]   ;;  %s10599_s10 = inlined_call_operand.vmem [shape: f32[1,10], index: 10, kind: input, shape index: {}]   ;;  %s10600_s11 = inlined_call_operand.vmem [shape: f32[900,256], index: 11, kind: input, shape index: {}]   ;;  %s10601_s12 = inlined_call_operand.vmem [shape: f32[1,900], index: 12, kind: input, shape index: {}]   ;;  %s10602_s13 = inlined_call_operand.vmem [shape: f32[1,256], index: 13, kind: input, shape index: {}]   ;;  %s10603_s14 = inlined_call_operand.hbm [shape: f32[2,1,10], index: 14, kind: output, shape index: {}]  }
   0x1   :  { %10614 = sst [smem:[#allocation17_spill]] %s10589_s0 }
   0x2   :  { %10615 = sst [smem:[#allocation18_spill]] %s10590_s1 }
   0x3   :  { %10616 = sst [smem:[#allocation19_spill]] %s10591_s2 }
   0x4   :  { %10617 = sst [smem:[#allocation20_spill]] %s10592_s3 }
   0x5   :  { %10618 = sst [smem:[#allocation21_spill]] %s10593_s4 }
   0x6   :  { %10619 = sst [smem:[#allocation22_spill]] %s10601_s12 }
   0x7   :  { %19 = vsyncpa [#allocation4], 0 }
   0x8   :  { %21 = vsyncpa [#allocation4 + $0x1], 0  ;;  %s7826_s29 = smov 0   ;;  %s7828_s30 = smov 0  }
   0x9   :  { %s7830_s15 = smov 0   ;;  %s7832_s16 = smov 0  }
   0xa LB: > { %s7847_s17 = sadd.s32 4294967295, %s7733_s16   ;;  %s6795_s18 = sadd.s32 4294967294, %s7733_s16   ;;  %s7733_s16 = sphi %s7832_s16, %s10678_s16   ;;  %s7729_s15 = sphi %s7830_s15, %s10677_s15   ;;  %s7725_s30 = sphi %s7828_s30, %s10676_s30   ;;  %s7721_s29 = sphi %s7826_s29, %s10675_s29  }
   0xb   : > { %s7851_s19 = sadd.s32 1, %s7733_s16   ;;  %s333_s20 = sadd.s32 1, %s7729_s15 }
   0xc   : > { %s330_s21 = ssub.s32 %s7733_s16, %s7851_s19  ;;  %p343_p0 = scmp.ne.s32.totalorder %s7729_s15, %s7725_s30 }
   0xd   : > { %p331_p1 = scmp.eq.s32.totalorder %s330_s21, 0  ;;  %p344_p2 = scmp.eq.s32.totalorder %s7847_s17, 1 }
   0xe   : > { %p349_p3 = scmp.ne.s32.totalorder %s7725_s30, %s7721_s29  ;;  %p350_p4 = scmp.eq.s32.totalorder %s6795_s18, 1 }
   0xf   : > { %s7862_s22 = scalar_select %p331_p1, %s7729_s15, %s333_s20  }
  0x10   : > { %p7864_p5 = por %p344_p2, %p343_p0  ;;  %p7868_p6 = por %p350_p4, %p349_p3 }
  0x11   : > { %10620 = sst [smem:[#allocation6_spill]] %s7862_s22  ;;  %p6798_p7 = scmp.ge.s32.totalorder %s7733_s16, 1 }
  0x12   : > { %p414_p8 = scmp.lt.s32.totalorder %s7733_s16, 3 }
  0x14   : > { %p415_p9 = pnand %p6798_p7, %p414_p8 }
  0x16   : > { %418 = sbr.rel (%p415_p9) target bundleno = 2125 (0x84d), region = 76 }
  0x1b   : > { %p458_p10 = scmp.lt.s32.totalorder %s7847_s17, 1  ;;  %v464_v0 = vlaneseq  ;;  %v7735_v1 = vmov 0.0   ;;  %s10623_s0 = sld [smem:[#allocation17_spill]]  ;;  %vm471_vm1 = vcmask 286752   ;;  %vm504_vm2 = vcmask 244736  }
  0x1c   : > { %462 = vst [vmem:[#allocation2] sm:$0xff] %v7735_v1  ;;  %s7736_s20 = smov 30   ;;  %s7737_s21 = smov 31   ;;  %vm516_vm3 = vcmask 1040384   ;;  %vm512_vm4 = vcmask 7168   ;;  %vm709_vm5 = vcmask 252928  }
  0x1d   : > { %s459_s25 = scalar_select %p458_p10, %s7847_s17, 1  ;;  %vm466_vm0 = vcmp.lt.s32.totalorder %v464_v0, 900  ;;  %vm914_vm6 = vcmask 236544   ;;  %vm1559_vm7 = vcmask 1039360   ;;  %vm1772_vm8 = vcmask 809984  }
  0x1e   : > { %s10604_s27 = smov 127   ;;  %s10606_s28 = smov 99   ;;  %vm1985_vm9 = vcmask 801792   ;;  %vm2198_vm10 = vcmask 793600   ;;  %vm2448_vm11 = vcmask 31744   ;;  %vm2450_vm12 = vcmask 293920  }
  0x1f   : > { %s6799_s26 = sshll.u32 %s459_s25, 3  ;;  %s7738_s25 = smov 29   ;;  %vm2502_vm13 = vcmask 64512   ;;  %vm5000_vm14 = vcmask 261120   ;;  %vm4671_vm15 = vcmask 1043456  }
  0x20   : > { %s10624_s1 = sld [smem:[#allocation18_spill]]  ;;  %s7746_s22 = smov 16  }
  0x21   : > { %s461_s18 = scalar_lea.vmem %s10623_s0, %s6799_s26  ;;  %s10612_s26 = smov 1  }
  0x22   : > { %v463_v2 = vld [vmem:[%s461_s18] sm:$0xff]  ;;  %s10625_s2 = sld [smem:[#allocation19_spill]]  ;;  %s10651_s18 = smov 97  }
  0x23   : > { %469 = vst.msk [vmem:[#allocation2 + $0x8] ss:$8 sm:$0xf] %vm466_vm0, %v463_v2  ;;  %s10636_s12 = sld [smem:[#allocation22_spill]]  ;;  %s7747_s0 = smov 15  }
  0x24   : > { %470 = vst.msk [vmem:[#allocation2 + $0x8] ss:$8 sm:$0xf0] %vm466_vm0, %v463_v2  ;;  %s10652_s3 = sld [smem:[#allocation20_spill]]  ;;  %vm5017_vm0 = vcmask 130048  }
  0x25   : > { %472 = vst.msk [vmem:[#allocation2 + $0x40] sm:$0x1] %vm471_vm1, %v7735_v1  ;;  %s10653_s4 = sld [smem:[#allocation21_spill]]  ;;  %vm5071_vm1 = vcmask 138240  }
  0x26   : > { %v6800_v44 = vld [vmem:[%s10624_s1 + $0x8] sm:$0xff]  ;;  %v473_v61 = vld [vmem:[%s10624_s1] sm:$0xff] }
  0x2a   : > { %v474_v3 = vld [vmem:[#allocation2] ss:$8 sm:$0xf] }
  0x2b   : > { %v475_v4 = vld [vmem:[#allocation2] ss:$8 sm:$0xf0] }
  0x2c   : > { %v476_v5 = vor.u32 %v475_v4, %v474_v3  ;;  %v1111_v14 = vld [vmem:[#allocation2] ss:$8 sm:$0xf] }
  0x2d   : > { %v1112_v15 = vld [vmem:[#allocation2] ss:$8 sm:$0xf0] }
  0x2e   : > { %v484_v6 = vperm.slane %v476_v5, 4  ;;  %v482_v7 = vperm.slane %v476_v5, 2  ;;  %v481_v8 = vperm.slane %v476_v5, 1  ;;  %v483_v9 = vperm.slane %v476_v5, 3  ;;  %v7667_v24 = vld [vmem:[#allocation2 + $0x40] ss:$0 sm:$0xff] }
  0x2f   : > { %v480_v10 = vperm.slane %v476_v5, 0  ;;  %v486_v11 = vperm.slane %v476_v5, 6  ;;  %v487_v12 = vperm.slane %v476_v5, 7  ;;  %v485_v13 = vperm.slane %v476_v5, 5 }
  0x30   : > { %496 = vrot.lane.b32.xlu1 %v484_v6, %s7736_s20  ;;  %492 = vrot.lane.b32.xlu0 %v482_v7, %s7736_s20  ;;  %v1113_v16 = vor.u32 %v1112_v15, %v1111_v14  ;;  %v1342_v25 = vld [vmem:[#allocation2 + $0x8] ss:$8 sm:$0xf] }
  0x31   : > { %490 = vrot.lane.b32.xlu2 %v481_v8, %s7736_s20  ;;  %v1343_v26 = vld [vmem:[#allocation2 + $0x8] ss:$8 sm:$0xf0] }
  0x32   : > { %v1120_v17 = vperm.slane %v1113_v16, 2  ;;  %v1121_v18 = vperm.slane %v1113_v16, 3  ;;  %v1122_v19 = vperm.slane %v1113_v16, 4  ;;  %v1118_v20 = vperm.slane %v1113_v16, 0 }
  0x33   : > { %v1119_v21 = vperm.slane %v1113_v16, 1  ;;  %v1124_v22 = vperm.slane %v1113_v16, 6  ;;  %v1125_v23 = vperm.slane %v1113_v16, 7  ;;  %v1123_v27 = vperm.slane %v1113_v16, 5 }
  0x34   : > { %v1344_v28 = vor.u32 %v1343_v26, %v1342_v25  ;;  %v6850_v26 = vld [vmem:[%s10624_s1 + $0x18] sm:$0xff] }
  0x36   : > { %v7912_v29 = vperm.slane %v1344_v28, 2  ;;  %v7914_v30 = vperm.slane %v1344_v28, 3  ;;  %v7916_v31 = vperm.slane %v1344_v28, 4  ;;  %v7924_v33 = vperm.slane %v1344_v28, 0 }
  0x37   : > { %v7926_v34 = vperm.slane %v1344_v28, 1  ;;  %v7928_v35 = vperm.slane %v1344_v28, 6  ;;  %v7936_v37 = vperm.slane %v1344_v28, 7  ;;  %v7938_v38 = vperm.slane %v1344_v28, 5 }
  0x38   : > { %494 = vrot.lane.b32.xlu0 %v483_v9, %s7736_s20  ;;  %488 = vrot.lane.b32.xlu1 %v480_v10, %s7736_s20 }
  0x39   : > { %500 = vrot.lane.b32.xlu2 %v486_v11, %s7736_s20 }
  0x40   : > { %502 = vrot.lane.b32.xlu0 %v487_v12, %s7736_s20  ;;  %498 = vrot.lane.b32.xlu1 %v485_v13, %s7736_s20 }
  0x41   : > { %697 = vrot.lane.b32.xlu2 %v482_v7, %s7737_s21 }
  0x48   : > { %699 = vrot.lane.b32.xlu0 %v483_v9, %s7737_s21  ;;  %701 = vrot.lane.b32.xlu1 %v484_v6, %s7737_s21 }
  0x49   : > { %693 = vrot.lane.b32.xlu2 %v480_v10, %s7737_s21 }
  0x50   : > { %695 = vrot.lane.b32.xlu0 %v481_v8, %s7737_s21  ;;  %705 = vrot.lane.b32.xlu1 %v486_v11, %s7737_s21 }
  0x51   : > { %707 = vrot.lane.b32.xlu2 %v487_v12, %s7737_s21 }
  0x58   : > { %703 = vrot.lane.b32.xlu0 %v485_v13, %s7737_s21  ;;  %902 = vrot.lane.b32.xlu1 %v482_v7, %s7738_s25 }
  0x59   : > { %904 = vrot.lane.b32.xlu2 %v483_v9, %s7738_s25 }
  0x60   : > { %906 = vrot.lane.b32.xlu0 %v484_v6, %s7738_s25  ;;  %898 = vrot.lane.b32.xlu1 %v480_v10, %s7738_s25  ;;  %v6833_v10 = vld [vmem:[%s10624_s1 + $0x10] sm:$0xff] }
  0x61   : > { %900 = vrot.lane.b32.xlu2 %v481_v8, %s7738_s25 }
  0x68   : > { %910 = vrot.lane.b32.xlu0 %v486_v11, %s7738_s25  ;;  %912 = vrot.lane.b32.xlu1 %v487_v12, %s7738_s25 }
  0x69   : > { %908 = vrot.lane.b32.xlu2 %v485_v13, %s7738_s25 }
  0x70   : > { %1131 = vrot.lane.b32.xlu0 %v1120_v17, %s10612_s26  ;;  %1133 = vrot.lane.b32.xlu1 %v1121_v18, %s10612_s26 }
  0x71   : > { %1135 = vrot.lane.b32.xlu2 %v1122_v19, %s10612_s26 }
  0x78   : > { %1127 = vrot.lane.b32.xlu0 %v1118_v20, %s10612_s26  ;;  %1129 = vrot.lane.b32.xlu1 %v1119_v21, %s10612_s26 }
  0x79   : > { %1139 = vrot.lane.b32.xlu2 %v1124_v22, %s10612_s26 }
  0x80   : > { %1141 = vrot.lane.b32.xlu0 %v1125_v23, %s10612_s26  ;;  %1143 = vrot.lane.b32.xlu1 %v7667_v24, %s10612_s26 }
  0x81   : > { %1137 = vrot.lane.b32.xlu2 %v1123_v27, %s10612_s26  ;;  %s7691_s26 = scalar_lea.hbm %s10603_s14, 2 }
  0x88   : > { %1547 = vrot.lane.b32.xlu0 %v7912_v29, %s10604_s27  ;;  %1549 = vrot.lane.b32.xlu1 %v7914_v30, %s10604_s27 }
  0x89   : > { %1551 = vrot.lane.b32.xlu2 %v7916_v31, %s10604_s27 }
  0x8b   : > { %v491_v32 = vpop.permute.xlu2 %490 }
  0x90   : > { %1543 = vrot.lane.b32.xlu0 %v7924_v33, %s10604_s27  ;;  %1545 = vrot.lane.b32.xlu1 %v7926_v34, %s10604_s27 }
  0x91   : > { %1555 = vrot.lane.b32.xlu2 %v7928_v35, %s10604_s27 }
  0x93   : > { %v501_v36 = vpop.permute.xlu2 %500 }
  0x98   : > { %1557 = vrot.lane.b32.xlu0 %v7936_v37, %s10604_s27  ;;  %1553 = vrot.lane.b32.xlu1 %v7938_v38, %s10604_s27  ;;  %s10608_s27 = smov 98  }
  0x99   : > { %1760 = vrot.lane.b32.xlu2 %v7912_v29, %s10606_s28 }
  0x9b   : > { %v7946_v39 = vpop.permute.xlu2 %697 }
  0xa0   : > { %1762 = vrot.lane.b32.xlu0 %v7914_v30, %s10606_s28  ;;  %1764 = vrot.lane.b32.xlu1 %v7916_v31, %s10606_s28 }
  0xa1   : > { %1756 = vrot.lane.b32.xlu2 %v7924_v33, %s10606_s28 }
  0xa2   : > { %v497_v40 = vpop.permute.xlu1 %496  ;;  %v493_v41 = vpop.permute.xlu0 %492 }
  0xa3   : > { %v506_v42 = vsel %vm504_vm2, %v491_v32, %v493_v41  ;;  %v694_v43 = vpop.permute.xlu2 %693 }
  0xa4   : > { %6803 = vmatpush.msk.msra.mxu1 %vm516_vm3, %v506_v42 }
  0xa5   : > { %6804 = vmatmul.msk.f32.vlgmr.msra.gmra.mxu1 %vm512_vm4, %v6800_v44 }
  0xa8   : > { %1758 = vrot.lane.b32.xlu0 %v7926_v34, %s10606_s28  ;;  %1768 = vrot.lane.b32.xlu1 %v7928_v35, %s10606_s28 }
  0xa9   : > { %1770 = vrot.lane.b32.xlu2 %v7936_v37, %s10606_s28 }
  0xaa   : > { %v495_v45 = vpop.permute.xlu0 %494  ;;  %v489_v46 = vpop.permute.xlu1 %488 }
  0xab   : > { %v505_v47 = vsel %vm504_vm2, %v489_v46, %v491_v32  ;;  %v507_v48 = vsel %vm504_vm2, %v493_v41, %v495_v45  ;;  %v508_v49 = vsel %vm504_vm2, %v495_v45, %v497_v40  ;;  %v708_v50 = vpop.permute.xlu2 %707 }
  0xac   : > { %6801 = vmatpush.msk.msra.mxu0 %vm516_vm3, %v505_v47  ;;  %6805 = vmatpush.msk.msra.mxu2 %vm516_vm3, %v507_v48 }
  0xad   : > { %6807 = vmatpush.msk.msra.mxu3 %vm516_vm3, %v508_v49  ;;  %6806 = vmatmul.msk.f32.vlgmr.msra.gmra.mxu2 %vm512_vm4, %v6800_v44 }
  0xae   : > { %6802 = vmatmul.msk.f32.vlgmr.msra.gmra.mxu0 %vm512_vm4, %v6800_v44  ;;  %6808 = vmatmul.msk.f32.vlgmr.msra.gmra.mxu3 %vm512_vm4, %v6800_v44 }
  0xb0   : > { %1766 = vrot.lane.b32.xlu0 %v7938_v38, %s10606_s28  ;;  %1973 = vrot.lane.b32.xlu1 %v7912_v29, %s10608_s27  ;;  %s10610_s28 = smov 97  }
  0xb1   : > { %1975 = vrot.lane.b32.xlu2 %v7914_v30, %s10608_s27 }
  0xb2   : > { %v503_v51 = vpop.permute.xlu0 %502  ;;  %v499_v52 = vpop.permute.xlu1 %498 }
  0xb3   : > { %6815 = vmatpush.msk.msrb.mxu3 %vm516_vm3, %v503_v51  ;;  %v509_v53 = vsel %vm504_vm2, %v497_v40, %v499_v52  ;;  %v510_v54 = vsel %vm504_vm2, %v499_v52, %v501_v36  ;;  %v511_v55 = vsel %vm504_vm2, %v501_v36, %v503_v51  ;;  %v7985_v56 = vpop.permute.xlu2 %904 }
  0xb4   : > { %6809 = vmatpush.msk.msrb.mxu0 %vm516_vm3, %v509_v53  ;;  %6811 = vmatpush.msk.msrb.mxu1 %vm516_vm3, %v510_v54  ;;  %v6884_v54 = vld [vmem:[%s10624_s1 + $0x28] sm:$0xff] }
  0xb5   : > { %6813 = vmatpush.msk.msrb.mxu2 %vm516_vm3, %v511_v55  ;;  %6812 = vmatmul.msk.f32.vlgmr.msrb.gmra.mxu1 %vm512_vm4, %v6800_v44 }
  0xb6   : > { %6814 = vmatmul.msk.f32.vlgmr.msrb.gmra.mxu2 %vm512_vm4, %v6800_v44  ;;  %6810 = vmatmul.msk.f32.vlgmr.msrb.gmra.mxu0 %vm512_vm4, %v6800_v44 }
  0xb7   : > { %6816 = vmatmul.msk.f32.vlgmr.msrb.gmra.mxu3 %vm512_vm4, %v6800_v44 }
  0xb8   : > { %1977 = vrot.lane.b32.xlu0 %v7916_v31, %s10608_s27  ;;  %1969 = vrot.lane.b32.xlu1 %v7924_v33, %s10608_s27 }
  0xb9   : > { %1971 = vrot.lane.b32.xlu2 %v7926_v34, %s10608_s27 }
  0xba   : > { %v700_v57 = vpop.permute.xlu0 %699  ;;  %v702_v58 = vpop.permute.xlu1 %701 }
  0xbb   : > { %v712_v59 = vsel %vm709_vm5, %v7946_v39, %v700_v57  ;;  %v713_v60 = vsel %vm709_vm5, %v700_v57, %v702_v58  ;;  %v901_v62 = vpop.permute.xlu2 %900 }
  0xbc   : > { %6821 = vmatpush.msk.msra.mxu2 %vm516_vm3, %v712_v59  ;;  %6823 = vmatpush.msk.msra.mxu3 %vm516_vm3, %v713_v60 }
  0xbe   : > { %6831 = vmatpush.msk.msrb.mxu3 %vm516_vm3, %v708_v50  ;;  %6822 = vmatmul.msk.f32.vlgmr.msra.gmra.mxu2 %vm512_vm4, %v473_v61 }
  0xbf   : > { %6824 = vmatmul.msk.f32.vlgmr.msra.gmra.mxu3 %vm512_vm4, %v473_v61 }
  0xc0   : > { %1981 = vrot.lane.b32.xlu0 %v7928_v35, %s10608_s27  ;;  %1983 = vrot.lane.b32.xlu1 %v7936_v37, %s10608_s27 }
  0xc1   : > { %1979 = vrot.lane.b32.xlu2 %v7938_v38, %s10608_s27  ;;  %s10647_s27 = smov 1  }
  0xc2   : > { %v696_v63 = vpop.permute.xlu0 %695  ;;  %v706_v0 = vpop.permute.xlu1 %705 }
  0xc3   : > { %v710_v1 = vsel %vm709_vm5, %v694_v43, %v696_v63  ;;  %v711_v2 = vsel %vm709_vm5, %v696_v63, %v7946_v39  ;;  %v716_v3 = vsel %vm709_vm5, %v706_v0, %v708_v50  ;;  %v909_v4 = vpop.permute.xlu2 %908 }
  0xc4   : > { %6817 = vmatpush.msk.msra.mxu0 %vm516_vm3, %v710_v1  ;;  %6819 = vmatpush.msk.msra.mxu1 %vm516_vm3, %v711_v2  ;;  %v6901_v2 = vld [vmem:[%s10624_s1 + $0x30] sm:$0xff] }
  0xc5   : > { %6829 = vmatpush.msk.msrb.mxu2 %vm516_vm3, %v716_v3  ;;  %6818 = vmatmul.msk.f32.vlgmr.msra.gmra.mxu0 %vm512_vm4, %v473_v61 }
  0xc6   : > { %6820 = vmatmul.msk.f32.vlgmr.msra.gmra.mxu1 %vm512_vm4, %v473_v61  ;;  %6830 = vmatmul.msk.f32.vlgmr.msrb.gmra.mxu2 %vm512_vm4, %v473_v61 }
  0xc7   : > { %6832 = vmatmul.msk.f32.vlgmr.msrb.gmra.mxu3 %vm512_vm4, %v473_v61 }
  0xc8   : > { %2186 = vrot.lane.b32.xlu0 %v7912_v29, %s10610_s28  ;;  %2188 = vrot.lane.b32.xlu1 %v7914_v30, %s10610_s28 }
  0xc9   : > { %2190 = vrot.lane.b32.xlu2 %v7916_v31, %s10610_s28 }
  0xca   : > { %v704_v5 = vpop.permute.xlu0 %703  ;;  %v903_v6 = vpop.permute.xlu1 %902 }
  0xcb   : > { %v714_v7 = vsel %vm709_vm5, %v702_v58, %v704_v5  ;;  %v715_v8 = vsel %vm709_vm5, %v704_v5, %v706_v0  ;;  %v917_v9 = vsel %vm914_vm6, %v903_v6, %v7985_v56  ;;  %v1136_v11 = vpop.permute.xlu2 %1135  ;;  %v916_v12 = vsel %vm914_vm6, %v901_v62, %v903_v6 }
  0xcc   : > { %6825 = vmatpush.msk.msrb.mxu0 %vm516_vm3, %v714_v7  ;;  %6827 = vmatpush.msk.msrb.mxu1 %vm516_vm3, %v715_v8 }
  0xcd   : > { %6838 = vmatpush.msk.msra.mxu2 %vm516_vm3, %v917_v9  ;;  %6826 = vmatmul.msk.f32.vlgmr.msrb.gmra.mxu0 %vm512_vm4, %v473_v61 }
  0xce   : > { %6828 = vmatmul.msk.f32.vlgmr.msrb.gmra.mxu1 %vm512_vm4, %v473_v61  ;;  %6839 = vmatmul.msk.f32.vlgmr.msra.gmra.mxu2 %vm512_vm4, %v6833_v10 }
  0xcf   : > { %6836 = vmatpush.msk.msra.mxu1 %vm516_vm3, %v916_v12 }
  0xd0   : > { %2182 = vrot.lane.b32.xlu0 %v7924_v33, %s10610_s28  ;;  %2184 = vrot.lane.b32.xlu1 %v7926_v34, %s10610_s28 }
  0xd1   : > { %2194 = vrot.lane.b32.xlu2 %v7928_v35, %s10610_s28 }
  0xd2   : > { %v907_v13 = vpop.permute.xlu0 %906  ;;  %v899_v14 = vpop.permute.xlu1 %898 }
  0xd3   : > { %v918_v15 = vsel %vm914_vm6, %v7985_v56, %v907_v13  ;;  %v919_v16 = vsel %vm914_vm6, %v907_v13, %v909_v4  ;;  %v915_v17 = vsel %vm914_vm6, %v899_v14, %v901_v62  ;;  %v1140_v18 = vpop.permute.xlu2 %1139 }
  0xd4   : > { %6834 = vmatpush.msk.msra.mxu0 %vm516_vm3, %v915_v17  ;;  %6840 = vmatpush.msk.msra.mxu3 %vm516_vm3, %v918_v15 }
  0xd5   : > { %6835 = vmatmul.msk.f32.vlgmr.msra.gmra.mxu0 %vm512_vm4, %v6833_v10  ;;  %6841 = vmatmul.msk.f32.vlgmr.msra.gmra.mxu3 %vm512_vm4, %v6833_v10 }
  0xd6   : > { %6837 = vmatmul.msk.f32.vlgmr.msra.gmra.mxu1 %vm512_vm4, %v6833_v10  ;;  %6842 = vmatpush.msk.msrb.mxu0 %vm516_vm3, %v919_v16  ;;  %v6918_v16 = vld [vmem:[%s10624_s1 + $0x38] sm:$0xff] }
  0xd8   : > { %2196 = vrot.lane.b32.xlu0 %v7936_v37, %s10610_s28  ;;  %2192 = vrot.lane.b32.xlu1 %v7938_v38, %s10610_s28  ;;  %s456_s28 = sand.u32 1, %s7725_s30  }
  0xda   : > { %v911_v19 = vpop.permute.xlu0 %910  ;;  %v913_v20 = vpop.permute.xlu1 %912 }
  0xdb   : > { %v920_v21 = vsel %vm914_vm6, %v909_v4, %v911_v19  ;;  %v921_v22 = vsel %vm914_vm6, %v911_v19, %v913_v20  ;;  %6848 = vmatpush.msk.msrb.mxu3 %vm516_vm3, %v913_v20  ;;  %v1138_v23 = vpop.permute.xlu2 %1137 }
  0xdc   : > { %6844 = vmatpush.msk.msrb.mxu1 %vm516_vm3, %v920_v21  ;;  %6846 = vmatpush.msk.msrb.mxu2 %vm516_vm3, %v921_v22  ;;  %v1149_v40 = vsel %vm512_vm4, %v1136_v11, %v1138_v23  ;;  %v1150_v41 = vsel %vm512_vm4, %v1138_v23, %v1140_v18 }
  0xdd   : > { %6843 = vmatmul.msk.f32.vlgmr.msrb.gmra.mxu0 %vm512_vm4, %v6833_v10  ;;  %6847 = vmatmul.msk.f32.vlgmr.msrb.gmra.mxu2 %vm512_vm4, %v6833_v10 }
  0xde   : > { %6845 = vmatmul.msk.f32.vlgmr.msrb.gmra.mxu1 %vm512_vm4, %v6833_v10  ;;  %6849 = vmatmul.msk.f32.vlgmr.msrb.gmra.mxu3 %vm512_vm4, %v6833_v10 }
  0xe2   : > { %v1132_v24 = vpop.permute.xlu0 %1131  ;;  %v1134_v25 = vpop.permute.xlu1 %1133 }
  0xe3   : > { %v1147_v27 = vsel %vm512_vm4, %v1132_v24, %v1134_v25  ;;  %v1148_v28 = vsel %vm512_vm4, %v1134_v25, %v1136_v11  ;;  %v8083_v32 = vpop.permute.xlu2 %1551 }
  0xe4   : > { %6855 = vmatpush.msk.msra.mxu2 %vm516_vm3, %v1147_v27  ;;  %6857 = vmatpush.msk.msra.mxu3 %vm516_vm3, %v1148_v28 }
  0xe5   : > { %6856 = vmatmul.msk.f32.vlgmr.msra.gmra.mxu2 %vm512_vm4, %v6850_v26 }
  0xe6   : > { %6858 = vmatmul.msk.f32.vlgmr.msra.gmra.mxu3 %vm512_vm4, %v6850_v26 }
  0xea   : > { %v1128_v36 = vpop.permute.xlu0 %1127  ;;  %v1130_v39 = vpop.permute.xlu1 %1129 }
  0xeb   : > { %v1145_v42 = vsel %vm512_vm4, %v1128_v36, %v1130_v39  ;;  %v1146_v43 = vsel %vm512_vm4, %v1130_v39, %v1132_v24  ;;  %v1556_v44 = vpop.permute.xlu2 %1555 }
  0xec   : > { %6851 = vmatpush.msk.msra.mxu0 %vm516_vm3, %v1145_v42  ;;  %6853 = vmatpush.msk.msra.mxu1 %vm516_vm3, %v1146_v43  ;;  %v6935_v43 = vld [vmem:[%s10624_s1 + $0x40] sm:$0xff] }
  0xed   : > { %6852 = vmatmul.msk.f32.vlgmr.msra.gmra.mxu0 %vm512_vm4, %v6850_v26  ;;  %6854 = vmatmul.msk.f32.vlgmr.msra.gmra.mxu1 %vm512_vm4, %v6850_v26 }
  0xee   : > { %6859 = vmatpush.msk.msrb.mxu0 %vm516_vm3, %v1149_v40  ;;  %6861 = vmatpush.msk.msrb.mxu1 %vm516_vm3, %v1150_v41 }
  0xf0   : > { %6868 = vmatpush.msk.msra.mxu0 %vm516_vm3, %v7924_v33  ;;  %6870 = vmatpush.msk.msra.mxu1 %vm516_vm3, %v7926_v34 }
  0xf2   : > { %v1142_v45 = vpop.permute.xlu0 %1141  ;;  %v1144_v46 = vpop.permute.xlu1 %1143 }
  0xf3   : > { %v1151_v47 = vsel %vm512_vm4, %v1140_v18, %v1142_v45  ;;  %v1152_v48 = vsel %vm512_vm4, %v1142_v45, %v1144_v46  ;;  %v1761_v33 = vpop.permute.xlu2 %1760 }
  0xf4   : > { %6863 = vmatpush.msk.msrb.mxu2 %vm516_vm3, %v1151_v47  ;;  %6865 = vmatpush.msk.msrb.mxu3 %vm516_vm3, %v1152_v48  ;;  %v2393_v47 = vld [vmem:[%s10625_s2] sm:$0xff]  ;;  %s7750_s2 = smov 111  }
  0xf5   : > { %6860 = vmatmul.msk.f32.vlgmr.msrb.gmra.mxu0 %vm512_vm4, %v6850_v26  ;;  %6862 = vmatmul.msk.f32.vlgmr.msrb.gmra.mxu1 %vm512_vm4, %v6850_v26 }
  0xf6   : > { %6864 = vmatmul.msk.f32.vlgmr.msrb.gmra.mxu2 %vm512_vm4, %v6850_v26  ;;  %6866 = vmatmul.msk.f32.vlgmr.msrb.gmra.mxu3 %vm512_vm4, %v6850_v26 }
  0xf7   : > { %6872 = vmatpush.msk.msra.mxu2 %vm516_vm3, %v7912_v29  ;;  %6874 = vmatpush.msk.msra.mxu3 %vm516_vm3, %v7914_v30  ;;  %v6867_v29 = vld [vmem:[%s10624_s1 + $0x20] sm:$0xff]  ;;  %s7749_s1 = smov 112  }
  0xf8   : > { %6876 = vmatpush.msk.msrb.mxu0 %vm516_vm3, %v7916_v31  ;;  %6878 = vmatpush.msk.msrb.mxu1 %vm516_vm3, %v7938_v38 }
  0xf9   : > { %6880 = vmatpush.msk.msrb.mxu2 %vm516_vm3, %v7928_v35  ;;  %6882 = vmatpush.msk.msrb.mxu3 %vm516_vm3, %v7936_v37 }
  0xfa   : > { %v1548_v34 = vpop.permute.xlu0 %1547  ;;  %v1550_v49 = vpop.permute.xlu1 %1549 }
  0xfb   : > { %v1562_v30 = vsel %vm1559_vm7, %v1548_v34, %v1550_v49  ;;  %v1563_v35 = vsel %vm1559_vm7, %v1550_v49, %v8083_v32  ;;  %v1757_v31 = vpop.permute.xlu2 %1756 }
  0xfd   : > { %6869 = vmatmul.msk.f32.vlgmr.msra.gmra.mxu0 %vm512_vm4, %v6867_v29  ;;  %6871 = vmatmul.msk.f32.vlgmr.msra.gmra.mxu1 %vm512_vm4, %v6867_v29 }
  0xfe   : > { %6873 = vmatmul.msk.f32.vlgmr.msra.gmra.mxu2 %vm512_vm4, %v6867_v29  ;;  %6875 = vmatmul.msk.f32.vlgmr.msra.gmra.mxu3 %vm512_vm4, %v6867_v29 }
  0xff   : > { %6889 = vmatpush.msk.msra.mxu2 %vm516_vm3, %v1562_v30  ;;  %6891 = vmatpush.msk.msra.mxu3 %vm516_vm3, %v1563_v35 }
 0x102   : > { %v1544_v37 = vpop.permute.xlu0 %1543  ;;  %v1546_v38 = vpop.permute.xlu1 %1545 }
 0x103   : > { %v1560_v50 = vsel %vm1559_vm7, %v1544_v37, %v1546_v38  ;;  %v1561_v51 = vsel %vm1559_vm7, %v1546_v38, %v1548_v34  ;;  %v1771_v58 = vpop.permute.xlu2 %1770 }
 0x104   : > { %6885 = vmatpush.msk.msra.mxu0 %vm516_vm3, %v1560_v50  ;;  %6887 = vmatpush.msk.msra.mxu1 %vm516_vm3, %v1561_v51 }
 0x105   : > { %6877 = vmatmul.msk.f32.vlgmr.msrb.gmra.mxu0 %vm512_vm4, %v6867_v29  ;;  %6879 = vmatmul.msk.f32.vlgmr.msrb.gmra.mxu1 %vm512_vm4, %v6867_v29 }
 0x106   : > { %6881 = vmatmul.msk.f32.vlgmr.msrb.gmra.mxu2 %vm512_vm4, %v6867_v29  ;;  %6883 = vmatmul.msk.f32.vlgmr.msrb.gmra.mxu3 %vm512_vm4, %v6867_v29 }
 0x10a   : > { %v1558_v52 = vpop.permute.xlu0 %1557  ;;  %v1554_v53 = vpop.permute.xlu1 %1553 }
 0x10b   : > { %v1566_v55 = vsel %vm1559_vm7, %v1556_v44, %v1558_v52  ;;  %v1564_v56 = vsel %vm1559_vm7, %v8083_v32, %v1554_v53  ;;  %v1565_v57 = vsel %vm1559_vm7, %v1554_v53, %v1556_v44  ;;  %6899 = vmatpush.msk.msrb.mxu3 %vm516_vm3, %v1558_v52  ;;  %v1976_v63 = vpop.permute.xlu2 %1975 }
 0x10c   : > { %6893 = vmatpush.msk.msrb.mxu0 %vm516_vm3, %v1564_v56  ;;  %6895 = vmatpush.msk.msrb.mxu1 %vm516_vm3, %v1565_v57 }
 0x10d   : > { %6897 = vmatpush.msk.msrb.mxu2 %vm516_vm3, %v1566_v55  ;;  %6886 = vmatmul.msk.f32.vlgmr.msra.gmra.mxu0 %vm512_vm4, %v6884_v54 }
 0x10e   : > { %6888 = vmatmul.msk.f32.vlgmr.msra.gmra.mxu1 %vm512_vm4, %v6884_v54  ;;  %6890 = vmatmul.msk.f32.vlgmr.msra.gmra.mxu2 %vm512_vm4, %v6884_v54 }
 0x10f   : > { %6892 = vmatmul.msk.f32.vlgmr.msra.gmra.mxu3 %vm512_vm4, %v6884_v54 }
 0x112   : > { %v1763_v59 = vpop.permute.xlu0 %1762  ;;  %v1765_v60 = vpop.permute.xlu1 %1764 }
 0x113   : > { %v1775_v61 = vsel %vm1772_vm8, %v1761_v33, %v1763_v59  ;;  %v1776_v62 = vsel %vm1772_vm8, %v1763_v59, %v1765_v60  ;;  %v1972_v6 = vpop.permute.xlu2 %1971 }
 0x114   : > { %6906 = vmatpush.msk.msra.mxu2 %vm516_vm3, %v1775_v61  ;;  %6908 = vmatpush.msk.msra.mxu3 %vm516_vm3, %v1776_v62 }
 0x115   : > { %6894 = vmatmul.msk.f32.vlgmr.msrb.gmra.mxu0 %vm512_vm4, %v6884_v54 }
 0x116   : > { %6896 = vmatmul.msk.f32.vlgmr.msrb.gmra.mxu1 %vm512_vm4, %v6884_v54  ;;  %6898 = vmatmul.msk.f32.vlgmr.msrb.gmra.mxu2 %vm512_vm4, %v6884_v54 }
 0x117   : > { %6900 = vmatmul.msk.f32.vlgmr.msrb.gmra.mxu3 %vm512_vm4, %v6884_v54 }
 0x118   : > { %6916 = vmatpush.msk.msrb.mxu3 %vm516_vm3, %v1771_v58 }
 0x11a   : > { %v1759_v0 = vpop.permute.xlu0 %1758  ;;  %v1769_v1 = vpop.permute.xlu1 %1768 }
 0x11b   : > { %v1773_v3 = vsel %vm1772_vm8, %v1757_v31, %v1759_v0  ;;  %v1774_v4 = vsel %vm1772_vm8, %v1759_v0, %v1761_v33  ;;  %v1779_v5 = vsel %vm1772_vm8, %v1769_v1, %v1771_v58  ;;  %v1980_v13 = vpop.permute.xlu2 %1979  ;;  %v7744_v33 = vmov 0  }
 0x11c   : > { %6902 = vmatpush.msk.msra.mxu0 %vm516_vm3, %v1773_v3  ;;  %6904 = vmatpush.msk.msra.mxu1 %vm516_vm3, %v1774_v4 }
 0x11d   : > { %6903 = vmatmul.msk.f32.vlgmr.msra.gmra.mxu0 %vm512_vm4, %v6901_v2  ;;  %6914 = vmatpush.msk.msrb.mxu2 %vm516_vm3, %v1779_v5 }
 0x11e   : > { %6905 = vmatmul.msk.f32.vlgmr.msra.gmra.mxu1 %vm512_vm4, %v6901_v2  ;;  %6907 = vmatmul.msk.f32.vlgmr.msra.gmra.mxu2 %vm512_vm4, %v6901_v2 }
 0x11f   : > { %6909 = vmatmul.msk.f32.vlgmr.msra.gmra.mxu3 %vm512_vm4, %v6901_v2  ;;  %7369 = vset.pattern.permute.xlu2 %v7744_v33 }
 0x120   : > { %7525 = vset.pattern.permute.xlu1 %v7744_v33  ;;  %2396 = vperm.xlu2 %7369, %v2393_v47  }
 0x121   : > { %7611 = vset.pattern.permute.xlu0 %v7744_v33 }
 0x122   : > { %v1767_v7 = vpop.permute.xlu0 %1766  ;;  %v1974_v8 = vpop.permute.xlu1 %1973 }
 0x123   : > { %v1777_v9 = vsel %vm1772_vm8, %v1765_v60, %v1767_v7  ;;  %v1778_v10 = vsel %vm1772_vm8, %v1767_v7, %v1769_v1  ;;  %v1987_v11 = vsel %vm1985_vm9, %v1972_v6, %v1974_v8  ;;  %v1988_v12 = vsel %vm1985_vm9, %v1974_v8, %v1976_v63  ;;  %v8207_v21 = vpop.f32.mrf.mxu1  ;;  %v2191_v28 = vpop.permute.xlu2 %2190 }
 0x124   : > { %6910 = vmatpush.msk.msrb.mxu0 %vm516_vm3, %v1777_v9  ;;  %6912 = vmatpush.msk.msrb.mxu1 %vm516_vm3, %v1778_v10 }
 0x125   : > { %6911 = vmatmul.msk.f32.vlgmr.msrb.gmra.mxu0 %vm512_vm4, %v6901_v2  ;;  %6923 = vmatpush.msk.msra.mxu2 %vm516_vm3, %v1988_v12 }
 0x126   : > { %6921 = vmatpush.msk.msra.mxu1 %vm516_vm3, %v1987_v11  ;;  %6915 = vmatmul.msk.f32.vlgmr.msrb.gmra.mxu2 %vm512_vm4, %v6901_v2 }
 0x127   : > { %6913 = vmatmul.msk.f32.vlgmr.msrb.gmra.mxu1 %vm512_vm4, %v6901_v2  ;;  %6917 = vmatmul.msk.f32.vlgmr.msrb.gmra.mxu3 %vm512_vm4, %v6901_v2 }
 0x12a   : > { %v1978_v14 = vpop.permute.xlu0 %1977  ;;  %v1970_v15 = vpop.permute.xlu1 %1969 }
 0x12b   : > { %v1989_v17 = vsel %vm1985_vm9, %v1976_v63, %v1978_v14  ;;  %v1986_v18 = vsel %vm1985_vm9, %v1970_v15, %v1972_v6  ;;  %v1990_v19 = vsel %vm1985_vm9, %v1978_v14, %v1980_v13  ;;  %v8205_v20 = vpop.f32.mrf.mxu0  ;;  %v2195_v35 = vpop.permute.xlu2 %2194 }
 0x12c   : > { %6919 = vmatpush.msk.msra.mxu0 %vm516_vm3, %v1986_v18  ;;  %6925 = vmatpush.msk.msra.mxu3 %vm516_vm3, %v1989_v17 }
 0x12d   : > { %6920 = vmatmul.msk.f32.vlgmr.msra.gmra.mxu0 %vm512_vm4, %v6918_v16 }
 0x12e   : > { %6924 = vmatmul.msk.f32.vlgmr.msra.gmra.mxu2 %vm512_vm4, %v6918_v16  ;;  %6927 = vmatpush.msk.msrb.mxu0 %vm516_vm3, %v1990_v19 }
 0x12f   : > { %6922 = vmatmul.msk.f32.vlgmr.msra.gmra.mxu1 %vm512_vm4, %v6918_v16  ;;  %6926 = vmatmul.msk.f32.vlgmr.msra.gmra.mxu3 %vm512_vm4, %v6918_v16 }
 0x130   : > { %v8219_v27 = vpop.f32.mrf.mxu2 }
 0x131   : > { %v8215_v26 = vpop.f32.mrf.mxu3 }
 0x132   : > { %v1982_v22 = vpop.permute.xlu0 %1981  ;;  %v1984_v23 = vpop.permute.xlu1 %1983 }
 0x133   : > { %v1991_v24 = vsel %vm1985_vm9, %v1980_v13, %v1982_v22  ;;  %v1992_v25 = vsel %vm1985_vm9, %v1982_v22, %v1984_v23  ;;  %6933 = vmatpush.msk.msrb.mxu3 %vm516_vm3, %v1984_v23  ;;  %v8222_v32 = vpop.f32.mrf.mxu0  ;;  %v8224_v36 = vpop.f32.mrf.mxu1 }
 0x134   : > { %6929 = vmatpush.msk.msrb.mxu1 %vm516_vm3, %v1991_v24  ;;  %6931 = vmatpush.msk.msrb.mxu2 %vm516_vm3, %v1992_v25 }
 0x135   : > { %6928 = vmatmul.msk.f32.vlgmr.msrb.gmra.mxu0 %vm512_vm4, %v6918_v16 }
 0x136   : > { %6932 = vmatmul.msk.f32.vlgmr.msrb.gmra.mxu2 %vm512_vm4, %v6918_v16 }
 0x137   : > { %6930 = vmatmul.msk.f32.vlgmr.msrb.gmra.mxu1 %vm512_vm4, %v6918_v16  ;;  %6934 = vmatmul.msk.f32.vlgmr.msrb.gmra.mxu3 %vm512_vm4, %v6918_v16 }
 0x139   : > { %v8237_v45 = vpop.f32.mrf.mxu2 }
 0x13a   : > { %v2187_v39 = vpop.permute.xlu0 %2186  ;;  %v2189_v40 = vpop.permute.xlu1 %2188 }
 0x13b   : > { %v2201_v41 = vsel %vm2198_vm10, %v2187_v39, %v2189_v40  ;;  %v2202_v42 = vsel %vm2198_vm10, %v2189_v40, %v2191_v28  ;;  %v8235_v44 = vpop.f32.mrf.mxu3 }
 0x13c   : > { %6940 = vmatpush.msk.msra.mxu2 %vm516_vm3, %v2201_v41  ;;  %6942 = vmatpush.msk.msra.mxu3 %vm516_vm3, %v2202_v42 }
 0x13e   : > { %6941 = vmatmul.msk.f32.vlgmr.msra.gmra.mxu2 %vm512_vm4, %v6935_v43 }
 0x13f   : > { %6943 = vmatmul.msk.f32.vlgmr.msra.gmra.mxu3 %vm512_vm4, %v6935_v43 }
 0x141   : > { %v793_v38 = vpop.f32.mrf.mxu2 }
 0x142   : > { %v2183_v46 = vpop.permute.xlu0 %2182  ;;  %v2185_v48 = vpop.permute.xlu1 %2184 }
 0x143   : > { %v8242_v34 = vpop.f32.mrf.mxu0  ;;  %v8244_v49 = vpop.f32.mrf.mxu1  ;;  %v2199_v29 = vsel %vm2198_vm10, %v2183_v46, %v2185_v48  ;;  %v2200_v30 = vsel %vm2198_vm10, %v2185_v48, %v2187_v39 }
 0x144   : > { %6936 = vmatpush.msk.msra.mxu0 %vm516_vm3, %v2199_v29  ;;  %6938 = vmatpush.msk.msra.mxu1 %vm516_vm3, %v2200_v30  ;;  %v8252_v31 = vpop.f32.mrf.mxu3 }
 0x145   : > { %6937 = vmatmul.msk.f32.vlgmr.msra.gmra.mxu0 %vm512_vm4, %v6935_v43  ;;  %6939 = vmatmul.msk.f32.vlgmr.msra.gmra.mxu1 %vm512_vm4, %v6935_v43 }
 0x149   : > { %v8271_v57 = vpop.f32.mrf.mxu2 }
 0x14a   : > { %v2197_v37 = vpop.permute.xlu0 %2196  ;;  %v2193_v51 = vpop.permute.xlu1 %2192 }
 0x14b   : > { %v2205_v50 = vsel %vm2198_vm10, %v2195_v35, %v2197_v37  ;;  %6950 = vmatpush.msk.msrb.mxu3 %vm516_vm3, %v2197_v37  ;;  %v2203_v52 = vsel %vm2198_vm10, %v2191_v28, %v2193_v51  ;;  %v2204_v53 = vsel %vm2198_vm10, %v2193_v51, %v2195_v35  ;;  %v8262_v54 = vpop.f32.mrf.mxu0  ;;  %v8264_v55 = vpop.f32.mrf.mxu1  ;;  %v814_v51 = vadd.f32 %v8252_v31, %v8215_v26 }
 0x14c   : > { %6948 = vmatpush.msk.msrb.mxu2 %vm516_vm3, %v2205_v50  ;;  %6951 = vmatmul.msk.f32.vlgmr.msrb.gmra.mxu3 %vm512_vm4, %v6935_v43  ;;  %v8269_v56 = vpop.f32.mrf.mxu3  ;;  %v794_v50 = vadd.f32 %v793_v38, %v8219_v27 }
 0x14d   : > { %6944 = vmatpush.msk.msrb.mxu0 %vm516_vm3, %v2203_v52  ;;  %6946 = vmatpush.msk.msrb.mxu1 %vm516_vm3, %v2204_v53  ;;  %v754_v52 = vadd.f32 %v8242_v34, %v8205_v20  ;;  %vm5352_vm3 = vcmask 924672  }
 0x14e   : > { %6945 = vmatmul.msk.f32.vlgmr.msrb.gmra.mxu0 %vm512_vm4, %v6935_v43  ;;  %6947 = vmatmul.msk.f32.vlgmr.msrb.gmra.mxu1 %vm512_vm4, %v6935_v43 }
 0x14f   : > { %6949 = vmatmul.msk.f32.vlgmr.msrb.gmra.mxu2 %vm512_vm4, %v6935_v43 }
 0x151   : > { %v998_v61 = vpop.f32.mrf.mxu2 }
 0x152   : > { %v1103_v53 = vadd.f32 %v998_v61, %v794_v50 }
 0x153   : > { %v958_v58 = vpop.f32.mrf.mxu0  ;;  %v978_v59 = vpop.f32.mrf.mxu1 }
 0x158   : > { %v1018_v60 = vpop.f32.mrf.mxu3 }
 0x15b   : > { %v8273_v62 = vpop.f32.mrf.mxu0  ;;  %v8275_v63 = vpop.f32.mrf.mxu1 }
 0x160   : > { %v8277_v0 = vpop.f32.mrf.mxu2 }
 0x161   : > { %v8279_v1 = vpop.f32.mrf.mxu3 }
 0x168   : > { %v1229_v4 = vpop.f32.mrf.mxu2 }
 0x169   : > { %v1249_v5 = vpop.f32.mrf.mxu3 }
 0x16a   : > { %v1189_v2 = vpop.f32.mrf.mxu0  ;;  %v1209_v3 = vpop.f32.mrf.mxu1 }
 0x172   : > { %v8281_v6 = vpop.f32.mrf.mxu0  ;;  %v8283_v7 = vpop.f32.mrf.mxu1 }
 0x179   : > { %v8285_v8 = vpop.f32.mrf.mxu2  ;;  %v8287_v9 = vpop.f32.mrf.mxu3 }
 0x17a   : > { %10626 = vst [vmem:[#allocation7_spill] sm:$0xff] %v8285_v8  ;;  %v1390_v10 = vpop.f32.mrf.mxu0  ;;  %v1410_v11 = vpop.f32.mrf.mxu1 }
 0x181   : > { %v1430_v12 = vpop.f32.mrf.mxu2  ;;  %v1450_v13 = vpop.f32.mrf.mxu3  ;;  %v10640_v50 = vld [vmem:[#allocation7_spill] sm:$0xff] }
 0x182   : > { %v8289_v14 = vpop.f32.mrf.mxu0  ;;  %v8291_v15 = vpop.f32.mrf.mxu1 }
 0x189   : > { %v8293_v16 = vpop.f32.mrf.mxu2  ;;  %v8295_v17 = vpop.f32.mrf.mxu3 }
 0x18a   : > { %10627 = vst [vmem:[#allocation8_spill] sm:$0xff] %v8293_v16  ;;  %v1603_v18 = vpop.f32.mrf.mxu0  ;;  %v774_v16 = vadd.f32 %v8244_v49, %v8207_v21 }
 0x18b   : > { %10628 = vst [vmem:[#allocation9_spill] sm:$0xff] %v8295_v17  ;;  %v1623_v19 = vpop.f32.mrf.mxu1 }
 0x18c   : > { %v1102_v8 = vadd.f32 %v978_v59, %v774_v16  ;;  %v854_v59 = vadd.f32 %v8264_v55, %v8224_v36  ;;  %v8337_v36 = vld [vmem:[%s10636_s12] sm:$0xff]  ;;  %v874_v55 = vadd.f32 %v8271_v57, %v8237_v45  ;;  %s7745_s12 = smov 17  }
 0x191   : > { %v1643_v22 = vpop.f32.mrf.mxu2 }
 0x192   : > { %v1663_v23 = vpop.f32.mrf.mxu3  ;;  %v8297_v24 = vpop.f32.mrf.mxu0 }
 0x193   : > { %v8299_v25 = vpop.f32.mrf.mxu1 }
 0x194   : > { %10629 = vst [vmem:[#allocation10_spill] sm:$0xff] %v8299_v25  ;;  %v1333_v25 = vadd.f32 %v1209_v3, %v1102_v8 }
 0x196   : > { %v1534_v49 = vadd.f32 %v1410_v11, %v1333_v25  ;;  %v2419_v25 = vperm.slane %v8337_v36, 2 }
 0x199   : > { %v8301_v28 = vpop.f32.mrf.mxu2 }
 0x19a   : > { %10630 = vst [vmem:[#allocation11_spill] sm:$0xff] %v8301_v28  ;;  %v8303_v39 = vpop.f32.mrf.mxu3  ;;  %v1816_v40 = vpop.f32.mrf.mxu0  ;;  %v1104_v28 = vadd.f32 %v1018_v60, %v814_v51  ;;  %v834_v60 = vadd.f32 %v8262_v54, %v8222_v32 }
 0x19b   : > { %10631 = vst [vmem:[#allocation12_spill] sm:$0xff] %v8303_v39  ;;  %v1836_v41 = vpop.f32.mrf.mxu1  ;;  %v1334_v39 = vadd.f32 %v1229_v4, %v1103_v53 }
 0x19c   : > { %v1105_v4 = vadd.f32 %v8273_v62, %v834_v60 }
 0x19d   : > { %v1535_v17 = vadd.f32 %v1430_v12, %v1334_v39  ;;  %v1747_v12 = vadd.f32 %v1623_v19, %v1534_v49  ;;  %v10643_v49 = vld [vmem:[#allocation8_spill] sm:$0xff] }
 0x19e   : > { %v1336_v54 = vadd.f32 %v8281_v6, %v1105_v4 }
 0x19f   : > { %v1748_v34 = vadd.f32 %v1643_v22, %v1535_v17 }
 0x1a0   : > { %v1537_v17 = vadd.f32 %v8289_v14, %v1336_v54  ;;  %v2418_v54 = vperm.slane %v8337_v36, 1 }
 0x1a1   : > { %v1856_v42 = vpop.f32.mrf.mxu2 }
 0x1a2   : > { %v1876_v43 = vpop.f32.mrf.mxu3  ;;  %v8305_v46 = vpop.f32.mrf.mxu0  ;;  %v1961_v61 = vadd.f32 %v1856_v42, %v1748_v34  ;;  %v1750_v57 = vadd.f32 %v8297_v24, %v1537_v17 }
 0x1a3   : > { %10632 = vst [vmem:[#allocation13_spill] sm:$0xff] %v8305_v46 }
 0x1a4   : > { %v8307_v47 = vpop.f32.mrf.mxu1 }
 0x1a5   : > { %10633 = vst [vmem:[#allocation14_spill] sm:$0xff] %v8307_v47 }
 0x1a9   : > { %v8309_v48 = vpop.f32.mrf.mxu2 }
 0x1aa   : > { %10634 = vst [vmem:[#allocation15_spill] sm:$0xff] %v8309_v48  ;;  %v8311_v33 = vpop.f32.mrf.mxu3  ;;  %v2029_v29 = vpop.f32.mrf.mxu0  ;;  %v1101_v48 = vadd.f32 %v958_v58, %v754_v52 }
 0x1ab   : > { %10635 = vst [vmem:[#allocation16_spill] sm:$0xff] %v8311_v33  ;;  %v1335_v33 = vadd.f32 %v1249_v5, %v1104_v28 }
 0x1ac   : > { %v2049_v30 = vpop.f32.mrf.mxu1  ;;  %v1332_v46 = vadd.f32 %v1189_v2, %v1101_v48  ;;  %v894_v2 = vadd.f32 %v8269_v56, %v8235_v44  ;;  %v8339_v44 = vpop.permute.xlu2 %2396  ;;  %v1960_v56 = vadd.f32 %v1836_v41, %v1747_v12  ;;  %v2417_v41 = vperm.slane %v8337_v36, 0  ;;  %v10641_v52 = vld [vmem:[#allocation14_spill] sm:$0xff] }
 0x1ad   : > { %v1536_v38 = vadd.f32 %v1450_v13, %v1335_v33 }
 0x1ae   : > { %v1533_v20 = vadd.f32 %v1390_v10, %v1332_v46  ;;  %v1106_v10 = vadd.f32 %v8275_v63, %v854_v59  ;;  %v1108_v32 = vadd.f32 %v8279_v1, %v894_v2  ;;  %v10637_v46 = vld [vmem:[#allocation10_spill] sm:$0xff] }
 0x1af   : > { %v1749_v21 = vadd.f32 %v1663_v23, %v1536_v38  ;;  %v2173_v23 = vadd.f32 %v2049_v30, %v1960_v56  ;;  %v2421_v56 = vperm.slane %v8337_v36, 4 }
 0x1b0   : > { %v1746_v58 = vadd.f32 %v1603_v18, %v1533_v20  ;;  %v1337_v1 = vadd.f32 %v8283_v7, %v1106_v10  ;;  %v1339_v6 = vadd.f32 %v8287_v9, %v1108_v32  ;;  %v10642_v20 = vld [vmem:[#allocation12_spill] sm:$0xff]  ;;  %v10645_v32 = vld [vmem:[#allocation11_spill] sm:$0xff] }
 0x1b1   : > { %v2069_v35 = vpop.f32.mrf.mxu2  ;;  %v1962_v5 = vadd.f32 %v1876_v43, %v1749_v21  ;;  %v1107_v43 = vadd.f32 %v8277_v0, %v874_v55 }
 0x1b2   : > { %v2089_v37 = vpop.f32.mrf.mxu3  ;;  %v2109_v26 = vpop.f32.mrf.mxu0  ;;  %v1959_v3 = vadd.f32 %v1816_v40, %v1746_v58  ;;  %v2174_v8 = vadd.f32 %v2069_v35, %v1961_v61  ;;  %v1538_v45 = vadd.f32 %v8291_v15, %v1337_v1  ;;  %v2420_v40 = vperm.slane %v8337_v36, 3  ;;  %v10639_v15 = vld [vmem:[#allocation13_spill] sm:$0xff] }
 0x1b3   : > { %v2175_v11 = vadd.f32 %v2089_v37, %v1962_v5  ;;  %v1963_v35 = vadd.f32 %v10639_v15, %v1750_v57  ;;  %v1338_v51 = vadd.f32 %v10640_v50, %v1107_v43  ;;  %v10644_v5 = vld [vmem:[#allocation16_spill] sm:$0xff] }
 0x1b4   : > { %v2129_v31 = vpop.f32.mrf.mxu1  ;;  %v2172_v62 = vadd.f32 %v2029_v29, %v1959_v3  ;;  %v1751_v48 = vadd.f32 %v10637_v46, %v1538_v45  ;;  %v10638_v29 = vld [vmem:[#allocation9_spill] sm:$0xff] }
 0x1b5   : > { %v1540_v30 = vadd.f32 %v10638_v29, %v1339_v6  ;;  %v2176_v60 = vadd.f32 %v2109_v26, %v1963_v35  ;;  %v1539_v58 = vadd.f32 %v10643_v49, %v1338_v51 }
 0x1b6   : > { %v1964_v53 = vadd.f32 %v10641_v52, %v1751_v48 }
 0x1b7   : > { %v1753_v34 = vadd.f32 %v10642_v20, %v1540_v30  ;;  %v1752_v26 = vadd.f32 %v10645_v32, %v1539_v58 }
 0x1b8   : > { %v2177_v61 = vadd.f32 %v2129_v31, %v1964_v53 }
 0x1b9   : > { %v8320_v47 = vpop.f32.mrf.mxu2  ;;  %v1966_v12 = vadd.f32 %v10644_v5, %v1753_v34 }
 0x1ba   : > { %v8322_v27 = vpop.f32.mrf.mxu3 }
 0x1bb   : > { %v2179_v31 = vadd.f32 %v8322_v27, %v1966_v12 }
 0x1c1   : > { %v2282_v13 = vpop.f32.mrf.mxu2 }
 0x1c2   : > { %v2387_v16 = vadd.f32 %v2282_v13, %v2174_v8  ;;  %v2302_v63 = vpop.f32.mrf.mxu3  ;;  %v2242_v19 = vpop.f32.mrf.mxu0  ;;  %v7668_v8 = vld [vmem:[#allocation2] sm:$0xff] }
 0x1c3   : > { %v2388_v18 = vadd.f32 %v2302_v63, %v2175_v11  ;;  %v2262_v22 = vpop.f32.mrf.mxu1  ;;  %v2385_v39 = vadd.f32 %v2242_v19, %v2172_v62  ;;  %v10646_v62 = vld [vmem:[#allocation15_spill] sm:$0xff] }
 0x1c4   : > { %v2401_v28 = vadd.f32 %v8339_v44, %v2387_v16  ;;  %v2386_v42 = vadd.f32 %v2262_v22, %v2173_v23  ;;  %v1965_v16 = vadd.f32 %v10646_v62, %v1752_v26  ;;  %v2424_v23 = vperm.slane %v8337_v36, 7 }
 0x1c5   : > { %v2402_v7 = vadd.f32 %v8339_v44, %v2388_v18  ;;  %v2399_v14 = vadd.f32 %v8339_v44, %v2385_v39  ;;  %v2422_v39 = vperm.slane %v8337_v36, 5 }
 0x1c6   : > { %v2409_v9 = vmax.f32 %v2401_v28, 0.0  ;;  %v2400_v21 = vadd.f32 %v8339_v44, %v2386_v42  ;;  %v2178_v17 = vadd.f32 %v8320_v47, %v1965_v16 }
 0x1c7   : > { %v2410_v33 = vmax.f32 %v2402_v7, 0.0  ;;  %v2407_v37 = vmax.f32 %v2399_v14, 0.0  ;;  %v2423_v7 = vperm.slane %v8337_v36, 6 }
 0x1c8   : > { %v8358_v24 = vmul.f32 %v2419_v25, %v2409_v9  ;;  %v2408_v13 = vmax.f32 %v2400_v21, 0.0 }
 0x1c9   : > { %v8362_v38 = vmul.f32 %v2420_v40, %v2410_v33  ;;  %v8365_v0 = vmul.f32 %v2417_v41, %v2407_v37 }
 0x1ca   : > { %v8383_v19 = vmul.f32 %v2418_v54, %v2408_v13 }
 0x1cb   : > { %v2322_v59 = vpop.f32.mrf.mxu0  ;;  %v2342_v2 = vpop.f32.mrf.mxu1  ;;  %v7375_v4 = vpack.i.bf16 %v8362_v38, %v8358_v24  ;;  %v7370_v10 = vpack.i.bf16 %v8365_v0, %v7668_v8 }
 0x1cc   : > { %v2389_v3 = vadd.f32 %v2322_v59, %v2176_v60  ;;  %v2390_v11 = vadd.f32 %v2342_v2, %v2177_v61  ;;  %v7450_v48 = vpack.i.bf16 %v8383_v19, %v8365_v0  ;;  %v6952_v60 = vld [vmem:[%s10652_s3 + $0x8] sm:$0xff] }
 0x1cd   : > { %7376 = vrot.lane.b32.xlu1 %v7375_v4, %s7736_s20  ;;  %7371 = vrot.lane.b32.xlu0 %v7370_v10, %s7736_s20 }
 0x1ce   : > { %v2403_v55 = vadd.f32 %v8339_v44, %v2389_v3  ;;  %v2404_v18 = vadd.f32 %v8339_v44, %v2390_v11 }
 0x1cf   : > { %v2382_v63 = vpop.f32.mrf.mxu3 }
 0x1d0   : > { %v2411_v1 = vmax.f32 %v2403_v55, 0.0  ;;  %v2392_v6 = vadd.f32 %v2382_v63, %v2179_v31  ;;  %v2412_v40 = vmax.f32 %v2404_v18, 0.0  ;;  %v2452_v55 = vld [vmem:[%s10652_s3] sm:$0xff] }
 0x1d2   : > { %v8385_v22 = vmul.f32 %v2421_v56, %v2411_v1  ;;  %v2406_v27 = vadd.f32 %v8339_v44, %v2392_v6  ;;  %v2362_v25 = vpop.f32.mrf.mxu2  ;;  %v8397_v41 = vmul.f32 %v2422_v39, %v2412_v40 }
 0x1d3   : > { %v2391_v28 = vadd.f32 %v2362_v25, %v2178_v17 }
 0x1d4   : > { %v2414_v45 = vmax.f32 %v2406_v27, 0.0  ;;  %v7380_v57 = vpack.i.bf16 %v8385_v22, %v8383_v19  ;;  %v7460_v43 = vpack.i.bf16 %v8397_v41, %v8358_v24  ;;  %v7475_v33 = vpack.i.bf16 %v8385_v22, %v8362_v38 }
 0x1d5   : > { %v2405_v47 = vadd.f32 %v8339_v44, %v2391_v28  ;;  %7391 = vrot.lane.b32.xlu1 %v7370_v10, %s7737_s21 }
 0x1d6   : > { %v2440_v9 = vmul.f32 %v2424_v23, %v2414_v45  ;;  %7381 = vrot.lane.b32.xlu2 %v7380_v57, %s7736_s20 }
 0x1d7   : > { %v2413_v14 = vmax.f32 %v2405_v47, 0.0 }
 0x1d8   : > { %2449 = vst.msk [vmem:[#allocation2 + $0x40] sm:$0xff] %vm2448_vm11, %v2440_v9 }
 0x1d9   : > { %2451 = vst.msk [vmem:[#allocation2 + $0x40] sm:$0xff] %vm2450_vm12, %v7668_v8  ;;  %v8400_v42 = vmul.f32 %v2423_v7, %v2413_v14 }
 0x1db   : > { %v7405_v44 = vpack.i.bf16 %v8397_v41, %v8400_v42 }
 0x1dd   : > { %7406 = vrot.lane.b32.xlu1 %v7405_v44, %s7737_s21  ;;  %7386 = vrot.lane.b32.xlu0 %v7405_v44, %s7736_s20  ;;  %s10648_s20 = smov 127  }
 0x1de   : > { %7396 = vrot.lane.b32.xlu2 %v7375_v4, %s7737_s21 }
 0x1e0   : > { %v8417_v36 = vld [vmem:[#allocation2 + $0x40] sm:$0xff] }
 0x1e1   : > { %v7445_v46 = vpack.i.bf16 %v8417_v36, %v8400_v42  ;;  %v7465_v29 = vpack.i.bf16 %v8400_v42, %v8417_v36 }
 0x1e5   : > { %7421 = vrot.lane.b32.xlu1 %v7380_v57, %s7738_s25  ;;  %7401 = vrot.lane.b32.xlu0 %v7380_v57, %s7737_s21  ;;  %s10649_s21 = smov 99  }
 0x1e6   : > { %7411 = vrot.lane.b32.xlu2 %v7370_v10, %s7738_s25 }
 0x1ed   : > { %7436 = vrot.lane.b32.xlu1 %v7375_v4, %s10647_s27  ;;  %7416 = vrot.lane.b32.xlu0 %v7375_v4, %s7738_s25 }
 0x1ee   : > { %7426 = vrot.lane.b32.xlu2 %v7405_v44, %s7738_s25  ;;  %s10650_s25 = smov 98  }
 0x1f5   : > { %3096 = vrot.lane.b32.xlu1 %v8397_v41, %s10647_s27  ;;  %7431 = vrot.lane.b32.xlu0 %v7370_v10, %s10647_s27 }
 0x1f6   : > { %7441 = vrot.lane.b32.xlu2 %v7380_v57, %s10647_s27 }
 0x1fd   : > { %7461 = vrot.lane.b32.xlu1 %v7460_v43, %s10648_s20  ;;  %7446 = vrot.lane.b32.xlu0 %v7445_v46, %s10647_s27 }
 0x1fe   : > { %7451 = vrot.lane.b32.xlu2 %v7450_v48, %s10648_s20 }
 0x205   : > { %7476 = vrot.lane.b32.xlu1 %v7475_v33, %s10649_s21  ;;  %7456 = vrot.lane.b32.xlu0 %v7475_v33, %s10648_s20 }
 0x206   : > { %7466 = vrot.lane.b32.xlu2 %v7465_v29, %s10648_s20 }
 0x20d   : > { %7491 = vrot.lane.b32.xlu1 %v7450_v48, %s10650_s25  ;;  %7471 = vrot.lane.b32.xlu0 %v7450_v48, %s10649_s21 }
 0x20e   : > { %7481 = vrot.lane.b32.xlu2 %v7460_v43, %s10649_s21 }
 0x215   : > { %7506 = vrot.lane.b32.xlu1 %v7465_v29, %s10650_s25  ;;  %7486 = vrot.lane.b32.xlu0 %v7465_v29, %s10649_s21  ;;  %s7748_s21 = smov 113  }
 0x216   : > { %7496 = vrot.lane.b32.xlu2 %v7475_v33, %s10650_s25 }
 0x21d   : > { %7521 = vrot.lane.b32.xlu1 %v7460_v43, %s10651_s18  ;;  %7501 = vrot.lane.b32.xlu0 %v7460_v43, %s10650_s25 }
 0x21e   : > { %7511 = vrot.lane.b32.xlu2 %v7450_v48, %s10651_s18 }
 0x225   : > { %7516 = vrot.lane.b32.xlu0 %v7475_v33, %s10651_s18 }
 0x226   : > { %4090 = vrot.lane.b32.xlu2 %v8417_v36, %s10651_s18 }
 0x22d   : > { %4088 = vrot.lane.b32.xlu0 %v8400_v42, %s10651_s18 }
 0x230   : > { %v7382_v30 = vpop.permute.xlu2 %7381 }
 0x231   : > { %v7383_v35 = vunpack.i.l.bf16 %v7382_v30  ;;  %v7384_v21 = vunpack.i.h.bf16 %v7382_v30 }
 0x238   : > { %v7397_v2 = vpop.permute.xlu2 %7396 }
 0x239   : > { %v7399_v10 = vunpack.i.h.bf16 %v7397_v2  ;;  %v7398_v32 = vunpack.i.l.bf16 %v7397_v2 }
 0x23b   : > { %v2685_v62 = vsel %vm709_vm5, %v7398_v32, %v7399_v10 }
 0x23f   : > { %v7377_v15 = vpop.permute.xlu1 %7376  ;;  %v7372_v51 = vpop.permute.xlu0 %7371 }
 0x240   : > { %v7379_v37 = vunpack.i.h.bf16 %v7377_v15  ;;  %v7378_v50 = vunpack.i.l.bf16 %v7377_v15  ;;  %v7374_v52 = vunpack.i.h.bf16 %v7372_v51  ;;  %v7373_v53 = vunpack.i.l.bf16 %v7372_v51  ;;  %v7412_v11 = vpop.permute.xlu2 %7411 }
 0x241   : > { %v7414_v17 = vunpack.i.h.bf16 %v7412_v11  ;;  %v7413_v18 = vunpack.i.l.bf16 %v7412_v11 }
 0x242   : > { %v2489_v20 = vsel %vm504_vm2, %v7383_v35, %v7378_v50  ;;  %v2490_v34 = vsel %vm504_vm2, %v7378_v50, %v7379_v37  ;;  %v2487_v49 = vsel %vm504_vm2, %v7373_v53, %v7374_v52  ;;  %v2488_v58 = vsel %vm504_vm2, %v7374_v52, %v7383_v35  ;;  %v6969_v50 = vld [vmem:[%s10652_s3 + $0x10] sm:$0xff] }
 0x243   : > { %2561 = vmatpush.msra.mxu2 %v2489_v20  ;;  %2581 = vmatpush.msra.mxu3 %v2490_v34  ;;  %v2491_v61 = vsel %vm504_vm2, %v7379_v37, %v7384_v21  ;;  %v2878_v47 = vsel %vm914_vm6, %v7413_v18, %v7414_v17 }
 0x244   : > { %2521 = vmatpush.msra.mxu0 %v2487_v49  ;;  %2541 = vmatpush.msra.mxu1 %v2488_v58 }
 0x245   : > { %6953 = vmatmul.msk.f32.vlgmr.msra.gmra.mxu0 %vm2502_vm13, %v6952_v60  ;;  %6956 = vmatmul.msk.f32.vlgmr.msra.gmra.mxu3 %vm2502_vm13, %v6952_v60 }
 0x246   : > { %2601 = vmatpush.msrb.mxu0 %v2491_v61  ;;  %6954 = vmatmul.msk.f32.vlgmr.msra.gmra.mxu1 %vm2502_vm13, %v6952_v60 }
 0x247   : > { %v7392_v59 = vpop.permute.xlu1 %7391  ;;  %6955 = vmatmul.msk.f32.vlgmr.msra.gmra.mxu2 %vm2502_vm13, %v6952_v60 }
 0x248   : > { %v7394_v4 = vunpack.i.h.bf16 %v7392_v59  ;;  %v7393_v5 = vunpack.i.l.bf16 %v7392_v59  ;;  %v7427_v57 = vpop.permute.xlu2 %7426 }
 0x249   : > { %v7429_v46 = vunpack.i.h.bf16 %v7427_v57  ;;  %v7428_v48 = vunpack.i.l.bf16 %v7427_v57 }
 0x24a   : > { %v2682_v12 = vsel %vm709_vm5, %v7393_v5, %v7394_v4 }
 0x24b   : > { %2715 = vmatpush.msra.mxu0 %v2682_v12  ;;  %v2884_v37 = vsel %vm914_vm6, %v7429_v46, %v7428_v48 }
 0x24d   : > { %6957 = vmatmul.msk.f32.vlgmr.msrb.gmra.mxu0 %vm2502_vm13, %v6952_v60 }
 0x24f   : > { %v7387_v3 = vpop.permute.xlu0 %7386  ;;  %v7407_v8 = vpop.permute.xlu1 %7406 }
 0x250   : > { %v7389_v26 = vunpack.i.h.bf16 %v7387_v3  ;;  %v7388_v54 = vunpack.i.l.bf16 %v7387_v3  ;;  %v7408_v56 = vunpack.i.l.bf16 %v7407_v8  ;;  %v7409_v27 = vunpack.i.h.bf16 %v7407_v8  ;;  %v7442_v51 = vpop.permute.xlu2 %7441 }
 0x251   : > { %v7444_v59 = vunpack.i.h.bf16 %v7442_v51 }
 0x252   : > { %2661 = vmatpush.msrb.mxu3 %v7388_v54  ;;  %v2492_v31 = vsel %vm504_vm2, %v7384_v21, %v7389_v26  ;;  %v2493_v13 = vsel %vm504_vm2, %v7389_v26, %v7388_v54  ;;  %v2688_v40 = vsel %vm709_vm5, %v7409_v27, %v7408_v56  ;;  %v7443_v21 = vunpack.i.l.bf16 %v7442_v51  ;;  %v6978_v54 = vld [vmem:[%s10652_s3 + $0x18] sm:$0xff]  ;;  %v7005_v51 = vld [vmem:[%s10652_s3 + $0x30] sm:$0xff] }
 0x253   : > { %2621 = vmatpush.msrb.mxu1 %v2492_v31  ;;  %2641 = vmatpush.msrb.mxu2 %v2493_v13  ;;  %vm5127_vm2 = vcmask 121856  }
 0x254   : > { %6960 = vmatmul.msk.f32.vlgmr.msrb.gmra.mxu3 %vm2502_vm13, %v6952_v60  ;;  %6958 = vmatmul.msk.f32.vlgmr.msrb.gmra.mxu1 %vm2502_vm13, %v6952_v60 }
 0x255   : > { %2775 = vmatpush.msra.mxu3 %v2685_v62  ;;  %6959 = vmatmul.msk.f32.vlgmr.msrb.gmra.mxu2 %vm2502_vm13, %v6952_v60 }
 0x256   : > { %6961 = vmatmul.msk.f32.vlgmr.msra.gmra.mxu0 %vm2502_vm13, %v2452_v55 }
 0x257   : > { %2855 = vmatpush.msrb.mxu3 %v7408_v56  ;;  %v7402_v16 = vpop.permute.xlu0 %7401  ;;  %v7422_v63 = vpop.permute.xlu1 %7421 }
 0x258   : > { %v7404_v1 = vunpack.i.h.bf16 %v7402_v16  ;;  %v7403_v6 = vunpack.i.l.bf16 %v7402_v16  ;;  %v7423_v23 = vunpack.i.l.bf16 %v7422_v63  ;;  %v7424_v14 = vunpack.i.h.bf16 %v7422_v63  ;;  %v7452_v11 = vpop.permute.xlu2 %7451 }
 0x259   : > { %v7454_v31 = vunpack.i.h.bf16 %v7452_v11  ;;  %v7453_v13 = vunpack.i.l.bf16 %v7452_v11  ;;  %v7014_v11 = vld [vmem:[%s10652_s3 + $0x38] sm:$0xff] }
 0x25a   : > { %v2683_v25 = vsel %vm709_vm5, %v7394_v4, %v7403_v6  ;;  %v2684_v28 = vsel %vm709_vm5, %v7403_v6, %v7398_v32  ;;  %v2686_v39 = vsel %vm709_vm5, %v7399_v10, %v7404_v1  ;;  %v2687_v45 = vsel %vm709_vm5, %v7404_v1, %v7409_v27 }
 0x25b   : > { %2735 = vmatpush.msra.mxu1 %v2683_v25  ;;  %2755 = vmatpush.msra.mxu2 %v2684_v28  ;;  %v2879_v7 = vsel %vm914_vm6, %v7414_v17, %v7423_v23  ;;  %v2883_v35 = vsel %vm914_vm6, %v7424_v14, %v7429_v46  ;;  %v6996_v28 = vld [vmem:[%s10652_s3 + $0x28] sm:$0xff]  ;;  %vm5468_vm5 = vcmask 908288  }
 0x25c   : > { %6964 = vmatmul.msk.f32.vlgmr.msra.gmra.mxu3 %vm2502_vm13, %v2452_v55  ;;  %2795 = vmatpush.msrb.mxu0 %v2686_v39 }
 0x25d   : > { %6962 = vmatmul.msk.f32.vlgmr.msra.gmra.mxu1 %vm2502_vm13, %v2452_v55  ;;  %6963 = vmatmul.msk.f32.vlgmr.msra.gmra.mxu2 %vm2502_vm13, %v2452_v55 }
 0x25e   : > { %2815 = vmatpush.msrb.mxu1 %v2687_v45  ;;  %2835 = vmatpush.msrb.mxu2 %v2688_v40 }
 0x25f   : > { %2911 = vmatpush.msra.mxu0 %v2878_v47  ;;  %v7417_v9 = vpop.permute.xlu0 %7416  ;;  %v7437_v15 = vpop.permute.xlu1 %7436 }
 0x260   : > { %2931 = vmatpush.msra.mxu1 %v2879_v7  ;;  %6965 = vmatmul.msk.f32.vlgmr.msrb.gmra.mxu0 %vm2502_vm13, %v2452_v55  ;;  %v7419_v44 = vunpack.i.h.bf16 %v7417_v9  ;;  %v7418_v43 = vunpack.i.l.bf16 %v7417_v9  ;;  %v7439_v53 = vunpack.i.h.bf16 %v7437_v15  ;;  %v7438_v20 = vunpack.i.l.bf16 %v7437_v15 }
 0x262   : > { %v2880_v33 = vsel %vm914_vm6, %v7423_v23, %v7418_v43  ;;  %v2881_v29 = vsel %vm914_vm6, %v7418_v43, %v7419_v44  ;;  %v2882_v30 = vsel %vm914_vm6, %v7419_v44, %v7424_v14  ;;  %v3105_v61 = vsel %vm512_vm4, %v7438_v20, %v7439_v53 }
 0x263   : > { %2951 = vmatpush.msra.mxu2 %v2880_v33  ;;  %2971 = vmatpush.msra.mxu3 %v2881_v29  ;;  %v3104_v2 = vsel %vm512_vm4, %v7443_v21, %v7438_v20  ;;  %v3106_v5 = vsel %vm512_vm4, %v7439_v53, %v7444_v59  ;;  %vm5410_vm6 = vcmask 916480  }
 0x264   : > { %6968 = vmatmul.msk.f32.vlgmr.msrb.gmra.mxu3 %vm2502_vm13, %v2452_v55  ;;  %2991 = vmatpush.msrb.mxu0 %v2882_v30 }
 0x265   : > { %6966 = vmatmul.msk.f32.vlgmr.msrb.gmra.mxu1 %vm2502_vm13, %v2452_v55  ;;  %6967 = vmatmul.msk.f32.vlgmr.msrb.gmra.mxu2 %vm2502_vm13, %v2452_v55  ;;  %v3480_v55 = vsel %vm1559_vm7, %v7453_v13, %v7454_v31 }
 0x266   : > { %3011 = vmatpush.msrb.mxu1 %v2883_v35  ;;  %3031 = vmatpush.msrb.mxu2 %v2884_v37 }
 0x267   : > { %3051 = vmatpush.msrb.mxu3 %v7428_v48  ;;  %v7432_v52 = vpop.permute.xlu0 %7431  ;;  %v3097_v8 = vpop.permute.xlu1 %3096 }
 0x268   : > { %6970 = vmatmul.msk.f32.vlgmr.msra.gmra.mxu0 %vm2502_vm13, %v6969_v50  ;;  %v7434_v34 = vunpack.i.h.bf16 %v7432_v52  ;;  %v7433_v60 = vunpack.i.l.bf16 %v7432_v52  ;;  %v3107_v26 = vsel %vm512_vm4, %v7444_v59, %v3097_v8 }
 0x26a   : > { %v3102_v49 = vsel %vm512_vm4, %v7433_v60, %v7434_v34  ;;  %v3103_v58 = vsel %vm512_vm4, %v7434_v34, %v7443_v21 }
 0x26b   : > { %3136 = vmatpush.msra.mxu0 %v3102_v49 }
 0x26c   : > { %6973 = vmatmul.msk.f32.vlgmr.msra.gmra.mxu3 %vm2502_vm13, %v6969_v50 }
 0x26d   : > { %3196 = vmatpush.msra.mxu3 %v3105_v61  ;;  %6971 = vmatmul.msk.f32.vlgmr.msra.gmra.mxu1 %vm2502_vm13, %v6969_v50 }
 0x26e   : > { %6972 = vmatmul.msk.f32.vlgmr.msra.gmra.mxu2 %vm2502_vm13, %v6969_v50  ;;  %3156 = vmatpush.msra.mxu1 %v3103_v58 }
 0x26f   : > { %3176 = vmatpush.msra.mxu2 %v3104_v2  ;;  %v7447_v4 = vpop.permute.xlu0 %7446 }
 0x270   : > { %6974 = vmatmul.msk.f32.vlgmr.msrb.gmra.mxu0 %vm2502_vm13, %v6969_v50  ;;  %v7449_v12 = vunpack.i.h.bf16 %v7447_v4  ;;  %v7448_v3 = vunpack.i.l.bf16 %v7447_v4 }
 0x271   : > { %3216 = vmatpush.msrb.mxu0 %v3106_v5 }
 0x272   : > { %v3109_v10 = vsel %vm512_vm4, %v7448_v3, %v7449_v12  ;;  %v3108_v32 = vsel %vm512_vm4, %v3097_v8, %v7448_v3  ;;  %v4278_v12 = vld [vmem:[%s10653_s4] sm:$0xff] }
 0x273   : > { %4281 = vperm.xlu1 %7525, %v4278_v12  }
 0x274   : > { %6977 = vmatmul.msk.f32.vlgmr.msrb.gmra.mxu3 %vm2502_vm13, %v6969_v50 }
 0x275   : > { %3276 = vmatpush.msrb.mxu3 %v3109_v10  ;;  %6975 = vmatmul.msk.f32.vlgmr.msrb.gmra.mxu1 %vm2502_vm13, %v6969_v50 }
 0x276   : > { %6976 = vmatmul.msk.f32.vlgmr.msrb.gmra.mxu2 %vm2502_vm13, %v6969_v50  ;;  %3236 = vmatpush.msrb.mxu1 %v3107_v26 }
 0x277   : > { %3256 = vmatpush.msrb.mxu2 %v3108_v32 }
 0x278   : > { %6979 = vmatmul.msk.f32.vlgmr.msra.gmra.mxu0 %vm2502_vm13, %v6978_v54 }
 0x279   : > { %3309 = vmatpush.msra.mxu0 %v8365_v0  ;;  %v7457_v0 = vpop.permute.xlu0 %7456 }
 0x27c   : > { %6982 = vmatmul.msk.f32.vlgmr.msra.gmra.mxu3 %vm2502_vm13, %v6978_v54 }
 0x27d   : > { %3369 = vmatpush.msra.mxu3 %v8362_v38  ;;  %6980 = vmatmul.msk.f32.vlgmr.msra.gmra.mxu1 %vm2502_vm13, %v6978_v54  ;;  %v6987_v38 = vld [vmem:[%s10652_s3 + $0x20] sm:$0xff] }
 0x27e   : > { %6981 = vmatmul.msk.f32.vlgmr.msra.gmra.mxu2 %vm2502_vm13, %v6978_v54  ;;  %3329 = vmatpush.msra.mxu1 %v8383_v19  ;;  %v7462_v19 = vpop.permute.xlu1 %7461 }
 0x27f   : > { %3349 = vmatpush.msra.mxu2 %v8358_v24  ;;  %v7459_v24 = vunpack.i.h.bf16 %v7457_v0  ;;  %v7463_v56 = vunpack.i.l.bf16 %v7462_v19  ;;  %v7464_v16 = vunpack.i.h.bf16 %v7462_v19 }
 0x280   : > { %6983 = vmatmul.msk.f32.vlgmr.msrb.gmra.mxu0 %vm2502_vm13, %v6978_v54 }
 0x281   : > { %3389 = vmatpush.msrb.mxu0 %v8385_v22  ;;  %v7458_v22 = vunpack.i.l.bf16 %v7457_v0  ;;  %v3484_v63 = vsel %vm1559_vm7, %v7459_v24, %v7464_v16  ;;  %v7472_v1 = vpop.permute.xlu0 %7471 }
 0x282   : > { %v7474_v18 = vunpack.i.h.bf16 %v7472_v1  ;;  %v7473_v27 = vunpack.i.l.bf16 %v7472_v1  ;;  %v7023_v1 = vld [vmem:[%s10652_s3 + $0x40] sm:$0xff] }
 0x283   : > { %v3483_v62 = vsel %vm1559_vm7, %v7458_v22, %v7459_v24 }
 0x284   : > { %6986 = vmatmul.msk.f32.vlgmr.msrb.gmra.mxu3 %vm2502_vm13, %v6978_v54  ;;  %v3684_v47 = vsel %vm1772_vm8, %v7473_v27, %v7474_v18 }
 0x285   : > { %6984 = vmatmul.msk.f32.vlgmr.msrb.gmra.mxu1 %vm2502_vm13, %v6978_v54  ;;  %3449 = vmatpush.msrb.mxu3 %v8417_v36  ;;  %v3481_v36 = vsel %vm1559_vm7, %v7454_v31, %v7463_v56 }
 0x286   : > { %6985 = vmatmul.msk.f32.vlgmr.msrb.gmra.mxu2 %vm2502_vm13, %v6978_v54  ;;  %3409 = vmatpush.msrb.mxu1 %v8397_v41  ;;  %v7467_v41 = vpop.permute.xlu2 %7466  ;;  %v7477_v23 = vpop.permute.xlu1 %7476 }
 0x287   : > { %3429 = vmatpush.msrb.mxu2 %v8400_v42  ;;  %v3482_v42 = vsel %vm1559_vm7, %v7463_v56, %v7458_v22  ;;  %v7469_v6 = vunpack.i.h.bf16 %v7467_v41  ;;  %v7468_v17 = vunpack.i.l.bf16 %v7467_v41  ;;  %v7479_v57 = vunpack.i.h.bf16 %v7477_v23 }
 0x288   : > { %6988 = vmatmul.msk.f32.vlgmr.msra.gmra.mxu0 %vm2502_vm13, %v6987_v38  ;;  %v7478_v40 = vunpack.i.l.bf16 %v7477_v23 }
 0x289   : > { %3513 = vmatpush.msra.mxu0 %v3480_v55  ;;  %v3485_v25 = vsel %vm1559_vm7, %v7464_v16, %v7469_v6  ;;  %v3486_v39 = vsel %vm1559_vm7, %v7469_v6, %v7468_v17  ;;  %v7487_v9 = vpop.permute.xlu0 %7486 }
 0x28a   : > { %v3687_v14 = vsel %vm1772_vm8, %v7478_v40, %v7479_v57  ;;  %v7489_v29 = vunpack.i.h.bf16 %v7487_v9  ;;  %v7488_v30 = vunpack.i.l.bf16 %v7487_v9 }
 0x28c   : > { %6991 = vmatmul.msk.f32.vlgmr.msra.gmra.mxu3 %vm2502_vm13, %v6987_v38  ;;  %v3690_v53 = vsel %vm1772_vm8, %v7489_v29, %v7488_v30 }
 0x28d   : > { %3573 = vmatpush.msra.mxu3 %v3483_v62  ;;  %6989 = vmatmul.msk.f32.vlgmr.msra.gmra.mxu1 %vm2502_vm13, %v6987_v38 }
 0x28e   : > { %6990 = vmatmul.msk.f32.vlgmr.msra.gmra.mxu2 %vm2502_vm13, %v6987_v38  ;;  %3533 = vmatpush.msra.mxu1 %v3481_v36  ;;  %v7482_v45 = vpop.permute.xlu2 %7481  ;;  %v7492_v33 = vpop.permute.xlu1 %7491 }
 0x28f   : > { %3553 = vmatpush.msra.mxu2 %v3482_v42  ;;  %v7483_v7 = vunpack.i.l.bf16 %v7482_v45  ;;  %v7484_v43 = vunpack.i.h.bf16 %v7482_v45  ;;  %v7494_v15 = vunpack.i.h.bf16 %v7492_v33  ;;  %v7493_v35 = vunpack.i.l.bf16 %v7492_v33 }
 0x290   : > { %6992 = vmatmul.msk.f32.vlgmr.msrb.gmra.mxu0 %vm2502_vm13, %v6987_v38 }
 0x291   : > { %3593 = vmatpush.msrb.mxu0 %v3484_v63  ;;  %v3685_v44 = vsel %vm1772_vm8, %v7474_v18, %v7483_v7  ;;  %v3686_v46 = vsel %vm1772_vm8, %v7483_v7, %v7478_v40  ;;  %v3688_v48 = vsel %vm1772_vm8, %v7479_v57, %v7484_v43  ;;  %v3689_v50 = vsel %vm1772_vm8, %v7484_v43, %v7489_v29  ;;  %v7502_v52 = vpop.permute.xlu0 %7501 }
 0x292   : > { %v3888_v60 = vsel %vm1985_vm9, %v7493_v35, %v7494_v15  ;;  %v7503_v21 = vunpack.i.l.bf16 %v7502_v52  ;;  %v7504_v58 = vunpack.i.h.bf16 %v7502_v52 }
 0x294   : > { %6995 = vmatmul.msk.f32.vlgmr.msrb.gmra.mxu3 %vm2502_vm13, %v6987_v38  ;;  %v3889_v59 = vsel %vm1985_vm9, %v7494_v15, %v7503_v21 }
 0x295   : > { %3653 = vmatpush.msrb.mxu3 %v7468_v17  ;;  %6993 = vmatmul.msk.f32.vlgmr.msrb.gmra.mxu1 %vm2502_vm13, %v6987_v38 }
 0x296   : > { %6994 = vmatmul.msk.f32.vlgmr.msrb.gmra.mxu2 %vm2502_vm13, %v6987_v38  ;;  %3613 = vmatpush.msrb.mxu1 %v3485_v25  ;;  %v7497_v37 = vpop.permute.xlu2 %7496  ;;  %v7507_v49 = vpop.permute.xlu1 %7506 }
 0x297   : > { %3633 = vmatpush.msrb.mxu2 %v3486_v39  ;;  %v7499_v20 = vunpack.i.h.bf16 %v7497_v37  ;;  %v7498_v34 = vunpack.i.l.bf16 %v7497_v37  ;;  %v7509_v3 = vunpack.i.h.bf16 %v7507_v49  ;;  %v7508_v8 = vunpack.i.l.bf16 %v7507_v49 }
 0x298   : > { %6997 = vmatmul.msk.f32.vlgmr.msra.gmra.mxu0 %vm2502_vm13, %v6996_v28 }
 0x299   : > { %3717 = vmatpush.msra.mxu0 %v3684_v47  ;;  %v3891_v61 = vsel %vm1985_vm9, %v7498_v34, %v7499_v20  ;;  %v3890_v2 = vsel %vm1985_vm9, %v7503_v21, %v7498_v34  ;;  %v3892_v4 = vsel %vm1985_vm9, %v7499_v20, %v7504_v58  ;;  %v7517_v26 = vpop.permute.xlu0 %7516  ;;  %v3893_v54 = vsel %vm1985_vm9, %v7504_v58, %v7509_v3 }
 0x29a   : > { %v3894_v13 = vsel %vm1985_vm9, %v7509_v3, %v7508_v8  ;;  %v7519_v0 = vunpack.i.h.bf16 %v7517_v26  ;;  %v7518_v38 = vunpack.i.l.bf16 %v7517_v26 }
 0x29c   : > { %7000 = vmatmul.msk.f32.vlgmr.msra.gmra.mxu3 %vm2502_vm13, %v6996_v28  ;;  %v4095_v22 = vsel %vm2198_vm10, %v7518_v38, %v7519_v0 }
 0x29d   : > { %3777 = vmatpush.msra.mxu3 %v3687_v14  ;;  %6998 = vmatmul.msk.f32.vlgmr.msra.gmra.mxu1 %vm2502_vm13, %v6996_v28 }
 0x29e   : > { %6999 = vmatmul.msk.f32.vlgmr.msra.gmra.mxu2 %vm2502_vm13, %v6996_v28  ;;  %3737 = vmatpush.msra.mxu1 %v3685_v44  ;;  %v7512_v5 = vpop.permute.xlu2 %7511  ;;  %v7522_v31 = vpop.permute.xlu1 %7521 }
 0x29f   : > { %3757 = vmatpush.msra.mxu2 %v3686_v46  ;;  %v7514_v10 = vunpack.i.h.bf16 %v7512_v5  ;;  %v7513_v32 = vunpack.i.l.bf16 %v7512_v5  ;;  %v7523_v24 = vunpack.i.l.bf16 %v7522_v31  ;;  %v7524_v56 = vunpack.i.h.bf16 %v7522_v31 }
 0x2a0   : > { %7001 = vmatmul.msk.f32.vlgmr.msrb.gmra.mxu0 %vm2502_vm13, %v6996_v28 }
 0x2a1   : > { %3797 = vmatpush.msrb.mxu0 %v3688_v48  ;;  %v4092_v19 = vsel %vm2198_vm10, %v7513_v32, %v7514_v10  ;;  %v4093_v55 = vsel %vm2198_vm10, %v7514_v10, %v7523_v24  ;;  %v4094_v62 = vsel %vm2198_vm10, %v7523_v24, %v7518_v38  ;;  %v4096_v36 = vsel %vm2198_vm10, %v7519_v0, %v7524_v56  ;;  %v4089_v41 = vpop.permute.xlu0 %4088 }
 0x2a2   : > { %v4097_v63 = vsel %vm2198_vm10, %v7524_v56, %v4089_v41 }
 0x2a4   : > { %7004 = vmatmul.msk.f32.vlgmr.msrb.gmra.mxu3 %vm2502_vm13, %v6996_v28 }
 0x2a5   : > { %3857 = vmatpush.msrb.mxu3 %v7488_v30  ;;  %7002 = vmatmul.msk.f32.vlgmr.msrb.gmra.mxu1 %vm2502_vm13, %v6996_v28 }
 0x2a6   : > { %7003 = vmatmul.msk.f32.vlgmr.msrb.gmra.mxu2 %vm2502_vm13, %v6996_v28  ;;  %3817 = vmatpush.msrb.mxu1 %v3689_v50  ;;  %v4091_v42 = vpop.permute.xlu2 %4090 }
 0x2a7   : > { %3837 = vmatpush.msrb.mxu2 %v3690_v53  ;;  %v4098_v6 = vsel %vm2198_vm10, %v4089_v41, %v4091_v42 }
 0x2a8   : > { %7006 = vmatmul.msk.f32.vlgmr.msra.gmra.mxu0 %vm2502_vm13, %v7005_v51 }
 0x2a9   : > { %3921 = vmatpush.msra.mxu0 %v3888_v60 }
 0x2ac   : > { %7009 = vmatmul.msk.f32.vlgmr.msra.gmra.mxu3 %vm2502_vm13, %v7005_v51 }
 0x2ad   : > { %3981 = vmatpush.msra.mxu3 %v3891_v61  ;;  %7007 = vmatmul.msk.f32.vlgmr.msra.gmra.mxu1 %vm2502_vm13, %v7005_v51 }
 0x2ae   : > { %7008 = vmatmul.msk.f32.vlgmr.msra.gmra.mxu2 %vm2502_vm13, %v7005_v51  ;;  %3941 = vmatpush.msra.mxu1 %v3889_v59 }
 0x2af   : > { %3961 = vmatpush.msra.mxu2 %v3890_v2 }
 0x2b0   : > { %7010 = vmatmul.msk.f32.vlgmr.msrb.gmra.mxu0 %vm2502_vm13, %v7005_v51 }
 0x2b1   : > { %4001 = vmatpush.msrb.mxu0 %v3892_v4 }
 0x2b4   : > { %7013 = vmatmul.msk.f32.vlgmr.msrb.gmra.mxu3 %vm2502_vm13, %v7005_v51 }
 0x2b5   : > { %4061 = vmatpush.msrb.mxu3 %v7508_v8  ;;  %7011 = vmatmul.msk.f32.vlgmr.msrb.gmra.mxu1 %vm2502_vm13, %v7005_v51 }
 0x2b6   : > { %7012 = vmatmul.msk.f32.vlgmr.msrb.gmra.mxu2 %vm2502_vm13, %v7005_v51  ;;  %4021 = vmatpush.msrb.mxu1 %v3893_v54 }
 0x2b7   : > { %4041 = vmatpush.msrb.mxu2 %v3894_v13 }
 0x2b8   : > { %7015 = vmatmul.msk.f32.vlgmr.msra.gmra.mxu0 %vm2502_vm13, %v7014_v11 }
 0x2b9   : > { %4125 = vmatpush.msra.mxu0 %v4092_v19 }
 0x2bc   : > { %7018 = vmatmul.msk.f32.vlgmr.msra.gmra.mxu3 %vm2502_vm13, %v7014_v11 }
 0x2bd   : > { %4185 = vmatpush.msra.mxu3 %v4095_v22  ;;  %7016 = vmatmul.msk.f32.vlgmr.msra.gmra.mxu1 %vm2502_vm13, %v7014_v11 }
 0x2be   : > { %7017 = vmatmul.msk.f32.vlgmr.msra.gmra.mxu2 %vm2502_vm13, %v7014_v11  ;;  %4145 = vmatpush.msra.mxu1 %v4093_v55 }
 0x2bf   : > { %4165 = vmatpush.msra.mxu2 %v4094_v62 }
 0x2c0   : > { %7019 = vmatmul.msk.f32.vlgmr.msrb.gmra.mxu0 %vm2502_vm13, %v7014_v11 }
 0x2c1   : > { %4205 = vmatpush.msrb.mxu0 %v4096_v36 }
 0x2c2   : > { %v8600_v16 = vpop.f32.mrf.mxu0 }
 0x2c3   : > { %v8610_v17 = vpop.f32.mrf.mxu1 }
 0x2c4   : > { %7022 = vmatmul.msk.f32.vlgmr.msrb.gmra.mxu3 %vm2502_vm13, %v7014_v11 }
 0x2c5   : > { %7020 = vmatmul.msk.f32.vlgmr.msrb.gmra.mxu1 %vm2502_vm13, %v7014_v11  ;;  %4265 = vmatpush.msrb.mxu3 %v4091_v42 }
 0x2c6   : > { %7021 = vmatmul.msk.f32.vlgmr.msrb.gmra.mxu2 %vm2502_vm13, %v7014_v11  ;;  %4225 = vmatpush.msrb.mxu1 %v4097_v63 }
 0x2c7   : > { %4245 = vmatpush.msrb.mxu2 %v4098_v6 }
 0x2c8   : > { %7024 = vmatmul.msk.f32.vlgmr.msra.gmra.mxu0 %vm2502_vm13, %v7023_v1  ;;  %v8617_v27 = vpop.f32.mrf.mxu3 }
 0x2ca   : > { %v8613_v18 = vpop.f32.mrf.mxu0  ;;  %v8620_v23 = vpop.f32.mrf.mxu2 }
 0x2cc   : > { %7027 = vmatmul.msk.f32.vlgmr.msra.gmra.mxu3 %vm2502_vm13, %v7023_v1 }
 0x2cd   : > { %7025 = vmatmul.msk.f32.vlgmr.msra.gmra.mxu1 %vm2502_vm13, %v7023_v1 }
 0x2ce   : > { %7026 = vmatmul.msk.f32.vlgmr.msra.gmra.mxu2 %vm2502_vm13, %v7023_v1 }
 0x2d0   : > { %7028 = vmatmul.msk.f32.vlgmr.msrb.gmra.mxu0 %vm2502_vm13, %v7023_v1 }
 0x2d1   : > { %v8623_v25 = vpop.f32.mrf.mxu1 }
 0x2d3   : > { %v8625_v28 = vpop.f32.mrf.mxu0 }
 0x2d4   : > { %7031 = vmatmul.msk.f32.vlgmr.msrb.gmra.mxu3 %vm2502_vm13, %v7023_v1 }
 0x2d5   : > { %7029 = vmatmul.msk.f32.vlgmr.msrb.gmra.mxu1 %vm2502_vm13, %v7023_v1 }
 0x2d6   : > { %7030 = vmatmul.msk.f32.vlgmr.msrb.gmra.mxu2 %vm2502_vm13, %v7023_v1 }
 0x2d7   : > { %v8630_v39 = vpop.f32.mrf.mxu3 }
 0x2d8   : > { %v8632_v45 = vpop.f32.mrf.mxu2 }
 0x2da   : > { %v2737_v57 = vpop.f32.mrf.mxu1 }
 0x2db   : > { %v2738_v36 = vadd.f32 %v2737_v57, %v8610_v17  ;;  %v2718_v57 = vadd.f32 %v8625_v28, %v8600_v16 }
 0x2dd   : > { %v2797_v40 = vpop.f32.mrf.mxu0 }
 0x2de   : > { %v2798_v1 = vadd.f32 %v2797_v40, %v8613_v18 }
 0x2df   : > { %v2777_v47 = vpop.f32.mrf.mxu3 }
 0x2e0   : > { %v2757_v7 = vpop.f32.mrf.mxu2 }
 0x2e2   : > { %v2817_v9 = vpop.f32.mrf.mxu1 }
 0x2e5   : > { %v8634_v14 = vpop.f32.mrf.mxu0 }
 0x2e7   : > { %v8636_v44 = vpop.f32.mrf.mxu3 }
 0x2e8   : > { %v8638_v43 = vpop.f32.mrf.mxu2 }
 0x2ea   : > { %v2933_v46 = vpop.f32.mrf.mxu1 }
 0x2eb   : > { %v3057_v42 = vadd.f32 %v2933_v46, %v2738_v36 }
 0x2ed   : > { %v2993_v48 = vpop.f32.mrf.mxu0 }
 0x2ef   : > { %v2973_v33 = vpop.f32.mrf.mxu3 }
 0x2f1   : > { %v2953_v29 = vpop.f32.mrf.mxu2 }
 0x2f2   : > { %v3013_v30 = vpop.f32.mrf.mxu1 }
 0x2f5   : > { %v8640_v15 = vpop.f32.mrf.mxu0 }
 0x2f7   : > { %v8642_v35 = vpop.f32.mrf.mxu3 }
 0x2f9   : > { %v8644_v37 = vpop.f32.mrf.mxu2 }
 0x2fa   : > { %v3158_v50 = vpop.f32.mrf.mxu1 }
 0x2fb   : > { %v3282_v6 = vadd.f32 %v3158_v50, %v3057_v42 }
 0x2fd   : > { %v3218_v51 = vpop.f32.mrf.mxu0 }
 0x2ff   : > { %v3198_v52 = vpop.f32.mrf.mxu3 }
 0x301   : > { %v3178_v53 = vpop.f32.mrf.mxu2 }
 0x302   : > { %v3238_v20 = vpop.f32.mrf.mxu1 }
 0x305   : > { %v8646_v34 = vpop.f32.mrf.mxu0 }
 0x307   : > { %v8648_v60 = vpop.f32.mrf.mxu3 }
 0x309   : > { %v8650_v21 = vpop.f32.mrf.mxu2 }
 0x30a   : > { %10654 = vst [vmem:[#allocation10_spill] sm:$0xff] %v8650_v21  ;;  %v3331_v49 = vpop.f32.mrf.mxu1 }
 0x30d   : > { %v3391_v58 = vpop.f32.mrf.mxu0 }
 0x30f   : > { %v3371_v61 = vpop.f32.mrf.mxu3 }
 0x311   : > { %v3351_v59 = vpop.f32.mrf.mxu2 }
 0x312   : > { %v3411_v2 = vpop.f32.mrf.mxu1 }
 0x315   : > { %v8652_v4 = vpop.f32.mrf.mxu0 }
 0x316   : > { %10655 = vst [vmem:[#allocation9_spill] sm:$0xff] %v8652_v4 }
 0x317   : > { %v8654_v5 = vpop.f32.mrf.mxu3 }
 0x318   : > { %10656 = vst [vmem:[#allocation13_spill] sm:$0xff] %v8654_v5  ;;  %v3455_v5 = vadd.f32 %v3331_v49, %v3282_v6 }
 0x319   : > { %v8656_v12 = vpop.f32.mrf.mxu2 }
 0x31a   : > { %10657 = vst [vmem:[#allocation7_spill] sm:$0xff] %v8656_v12  ;;  %v3535_v3 = vpop.f32.mrf.mxu1  ;;  %v3060_v12 = vadd.f32 %v2993_v48, %v2798_v1 }
 0x31b   : > { %v3659_v4 = vadd.f32 %v3535_v3, %v3455_v5 }
 0x31c   : > { %v3285_v21 = vadd.f32 %v3218_v51, %v3060_v12 }
 0x31d   : > { %v3595_v8 = vpop.f32.mrf.mxu0 }
 0x31e   : > { %v3458_v40 = vadd.f32 %v3391_v58, %v3285_v21 }
 0x31f   : > { %v3575_v10 = vpop.f32.mrf.mxu3 }
 0x321   : > { %v3555_v32 = vpop.f32.mrf.mxu2 }
 0x322   : > { %v3615_v26 = vpop.f32.mrf.mxu1 }
 0x325   : > { %v8658_v54 = vpop.f32.mrf.mxu0 }
 0x326   : > { %10658 = vst [vmem:[#allocation14_spill] sm:$0xff] %v8658_v54 }
 0x327   : > { %v8660_v11 = vpop.f32.mrf.mxu3 }
 0x328   : > { %10659 = vst [vmem:[#allocation12_spill] sm:$0xff] %v8660_v11  ;;  %v2778_v11 = vadd.f32 %v2777_v47, %v8617_v27  ;;  %v3056_v47 = vadd.f32 %v8634_v14, %v2718_v57 }
 0x329   : > { %v8662_v31 = vpop.f32.mrf.mxu2 }
 0x32a   : > { %10660 = vst [vmem:[#allocation8_spill] sm:$0xff] %v8662_v31  ;;  %v3739_v13 = vpop.f32.mrf.mxu1  ;;  %v3281_v51 = vadd.f32 %v8640_v15, %v3056_v47 }
 0x32b   : > { %v3863_v36 = vadd.f32 %v3739_v13, %v3659_v4 }
 0x32c   : > { %v3454_v58 = vadd.f32 %v8646_v34, %v3281_v51 }
 0x32d   : > { %v3799_v0 = vpop.f32.mrf.mxu0 }
 0x32f   : > { %v3779_v38 = vpop.f32.mrf.mxu3 }
 0x331   : > { %v3759_v19 = vpop.f32.mrf.mxu2 }
 0x332   : > { %v3819_v24 = vpop.f32.mrf.mxu1 }
 0x335   : > { %v8664_v22 = vpop.f32.mrf.mxu0 }
 0x336   : > { %10661 = vst [vmem:[#allocation16_spill] sm:$0xff] %v8664_v22  ;;  %v2758_v22 = vadd.f32 %v2757_v7, %v8620_v23  ;;  %v3662_v23 = vadd.f32 %v3595_v8, %v3458_v40  ;;  %v2858_v7 = vadd.f32 %v8636_v44, %v8630_v39  ;;  %v10665_v8 = vld [vmem:[#allocation10_spill] sm:$0xff] }
 0x337   : > { %v8666_v55 = vpop.f32.mrf.mxu3 }
 0x338   : > { %10662 = vst [vmem:[#allocation11_spill] sm:$0xff] %v8666_v55  ;;  %v3059_v55 = vadd.f32 %v2973_v33, %v2778_v11  ;;  %v3058_v46 = vadd.f32 %v2953_v29, %v2758_v22  ;;  %v3866_v29 = vadd.f32 %v3799_v0, %v3662_v23  ;;  %v3063_v14 = vadd.f32 %v8642_v35, %v2858_v7 }
 0x339   : > { %v8668_v56 = vpop.f32.mrf.mxu2 }
 0x33a   : > { %10663 = vst [vmem:[#allocation15_spill] sm:$0xff] %v8668_v56  ;;  %v3943_v62 = vpop.f32.mrf.mxu1  ;;  %v2818_v56 = vadd.f32 %v2817_v9, %v8623_v25  ;;  %v3284_v18 = vadd.f32 %v3198_v52, %v3059_v55  ;;  %v3283_v48 = vadd.f32 %v3178_v53, %v3058_v46  ;;  %v10668_v55 = vld [vmem:[#allocation7_spill] sm:$0xff]  ;;  %v10671_v46 = vld [vmem:[#allocation8_spill] sm:$0xff] }
 0x33b   : > { %v4067_v9 = vadd.f32 %v3943_v62, %v3863_v36  ;;  %v10669_v62 = vld [vmem:[#allocation12_spill] sm:$0xff] }
 0x33c   : > { %v3061_v50 = vadd.f32 %v3013_v30, %v2818_v56  ;;  %v3457_v49 = vadd.f32 %v3371_v61, %v3284_v18  ;;  %v3456_v16 = vadd.f32 %v3351_v59, %v3283_v48  ;;  %v2838_v30 = vadd.f32 %v8638_v43, %v8632_v45  ;;  %v10664_v45 = vld [vmem:[#allocation9_spill] sm:$0xff] }
 0x33d   : > { %v4003_v41 = vpop.f32.mrf.mxu0  ;;  %v3288_v59 = vadd.f32 %v8648_v60, %v3063_v14  ;;  %v3658_v43 = vadd.f32 %v10664_v45, %v3454_v58  ;;  %v4470_v58 = vld [vmem:[%s10600_s11 + $0xe0] sm:$0xff] }
 0x33e   : > { %v3286_v25 = vadd.f32 %v3238_v20, %v3061_v50  ;;  %v3661_v28 = vadd.f32 %v3575_v10, %v3457_v49  ;;  %v3660_v61 = vadd.f32 %v3555_v32, %v3456_v16  ;;  %v4070_v44 = vadd.f32 %v4003_v41, %v3866_v29  ;;  %v8685_v20 = vpop.permute.xlu1 %4281  ;;  %v10666_v10 = vld [vmem:[#allocation13_spill] sm:$0xff] }
 0x33f   : > { %v3983_v63 = vpop.f32.mrf.mxu3  ;;  %v3062_v15 = vadd.f32 %v8644_v37, %v2838_v30  ;;  %v3461_v32 = vadd.f32 %v10666_v10, %v3288_v59  ;;  %v10667_v37 = vld [vmem:[#allocation14_spill] sm:$0xff]  ;;  %v10672_v50 = vld [vmem:[#allocation11_spill] sm:$0xff] }
 0x340   : > { %v3459_v53 = vadd.f32 %v3411_v2, %v3286_v25  ;;  %v3865_v39 = vadd.f32 %v3779_v38, %v3661_v28  ;;  %v3864_v35 = vadd.f32 %v3759_v19, %v3660_v61  ;;  %v3862_v38 = vadd.f32 %v10667_v37, %v3658_v43  ;;  %v4472_v30 = vld [vmem:[%s10600_s11 + $0xf0] sm:$0xff]  ;;  %v4494_v37 = vld [vmem:[%s10600_s11 + $0x1a0] sm:$0xff] }
 0x341   : > { %v3963_v31 = vpop.f32.mrf.mxu2  ;;  %v3287_v34 = vadd.f32 %v10665_v8, %v3062_v15  ;;  %v3665_v19 = vadd.f32 %v10669_v62, %v3461_v32  ;;  %v10673_v23 = vld [vmem:[#allocation15_spill] sm:$0xff]  ;;  %4678 = vmatpush.msra.mxu0 %v4472_v30  ;;  %v4502_v15 = vld [vmem:[%s10600_s11 + $0x1e0] sm:$0xff] }
 0x342   : > { %v4023_v54 = vpop.f32.mrf.mxu1  ;;  %v3663_v4 = vadd.f32 %v3615_v26, %v3459_v53  ;;  %v4069_v2 = vadd.f32 %v3983_v63, %v3865_v39  ;;  %v4068_v60 = vadd.f32 %v3963_v31, %v3864_v35  ;;  %v10670_v63 = vld [vmem:[#allocation16_spill] sm:$0xff]  ;;  %v4530_v35 = vld [vmem:[%s10600_s11 + $0x2c0] sm:$0xff] }
 0x343   : > { %v3460_v56 = vadd.f32 %v10668_v55, %v3287_v34  ;;  %v3869_v36 = vadd.f32 %v10672_v50, %v3665_v19  ;;  %v4504_v53 = vld [vmem:[%s10600_s11 + $0x1f0] sm:$0xff]  ;;  %4679 = vmatpush.msra.mxu0 %v4470_v58  ;;  %v4498_v8 = vld [vmem:[%s10600_s11 + $0x1c0] sm:$0xff] }
 0x344   : > { %v3867_v11 = vadd.f32 %v3819_v24, %v3663_v4  ;;  %v4066_v24 = vadd.f32 %v10670_v63, %v3862_v38  ;;  %4698 = vmatpush.msra.mxu1 %v4504_v53  ;;  %v4532_v59 = vld [vmem:[%s10600_s11 + $0x2d0] sm:$0xff]  ;;  %v4522_v55 = vld [vmem:[%s10600_s11 + $0x280] sm:$0xff] }
 0x345   : > { %v4127_v17 = vpop.f32.mrf.mxu0  ;;  %v3664_v18 = vadd.f32 %v10671_v46, %v3460_v56  ;;  %v4468_v4 = vld [vmem:[%s10600_s11 + $0xd0] sm:$0xff]  ;;  %v4458_v56 = vld [vmem:[%s10600_s11 + $0x80] sm:$0xff] }
 0x346   : > { %v4071_v41 = vadd.f32 %v4023_v54, %v3867_v11  ;;  %v4270_v47 = vadd.f32 %v4127_v17, %v4066_v24  ;;  %4699 = vmatpush.msra.mxu1 %v4502_v15  ;;  %4680 = vmatpush.msra.mxu0 %v4468_v4  ;;  %v4528_v34 = vld [vmem:[%s10600_s11 + $0x2b0] sm:$0xff]  ;;  %v4526_v11 = vld [vmem:[%s10600_s11 + $0x2a0] sm:$0xff] }
 0x347   : > { %v4063_v27 = vpop.f32.mrf.mxu3  ;;  %v3868_v7 = vadd.f32 %v10673_v23, %v3664_v18  ;;  %v4464_v10 = vld [vmem:[%s10600_s11 + $0xb0] sm:$0xff]  ;;  %v4490_v62 = vld [vmem:[%s10600_s11 + $0x180] sm:$0xff] }
 0x348   : > { %v4073_v25 = vadd.f32 %v4063_v27, %v3869_v36  ;;  %v8721_v28 = vadd.f32 %v8685_v20, %v4270_v47  ;;  %v4536_v27 = vld [vmem:[%s10600_s11 + $0x2f0] sm:$0xff]  ;;  %v4518_v24 = vld [vmem:[%s10600_s11 + $0x260] sm:$0xff] }
 0x349   : > { %v4043_v33 = vpop.f32.mrf.mxu2  ;;  %4718 = vmatpush.msra.mxu2 %v4536_v27  ;;  %v4496_v32 = vld [vmem:[%s10600_s11 + $0x1b0] sm:$0xff]  ;;  %v4450_v50 = vld [vmem:[%s10600_s11 + $0x40] sm:$0xff] }
 0x34a   : > { %v4147_v52 = vpop.f32.mrf.mxu1  ;;  %v4072_v29 = vadd.f32 %v4043_v33, %v3868_v7  ;;  %v4524_v38 = vld [vmem:[%s10600_s11 + $0x290] sm:$0xff]  ;;  %v4482_v36 = vld [vmem:[%s10600_s11 + $0x140] sm:$0xff] }
 0x34b   : > { %v4271_v21 = vadd.f32 %v4147_v52, %v4067_v9  ;;  %v4488_v63 = vld [vmem:[%s10600_s11 + $0x170] sm:$0xff]  ;;  %v4510_v23 = vld [vmem:[%s10600_s11 + $0x220] sm:$0xff] }
 0x34c   : > { %v4452_v46 = vld [vmem:[%s10600_s11 + $0x50] sm:$0xff]  ;;  %v4446_v7 = vld [vmem:[%s10600_s11 + $0x20] sm:$0xff] }
 0x34d   : > { %v4285_v5 = vadd.f32 %v8685_v20, %v4271_v21  ;;  %v4207_v12 = vpop.f32.mrf.mxu0  ;;  %v4534_v21 = vld [vmem:[%s10600_s11 + $0x2e0] sm:$0xff]  ;;  %v4484_v18 = vld [vmem:[%s10600_s11 + $0x150] sm:$0xff] }
 0x34e   : > { %v4274_v3 = vadd.f32 %v4207_v12, %v4070_v44  ;;  %v7669_v44 = vld [vmem:[#allocation2] sm:$0xff]  ;;  %4719 = vmatpush.msra.mxu2 %v4534_v21  ;;  %v4292_v12 = vmax.f32 %v8721_v28, 0.0  ;;  %v4512_v47 = vld [vmem:[%s10600_s11 + $0x230] sm:$0xff] }
 0x34f   : > { %v8693_v13 = vmax.f32 %v4285_v5, 0.0  ;;  %v4187_v0 = vpop.f32.mrf.mxu3  ;;  %v4500_v5 = vld [vmem:[%s10600_s11 + $0x1d0] sm:$0xff]  ;;  %v4566_v27 = vld [vmem:[%s10600_s11 + $0x3e0] sm:$0xff] }
 0x350   : > { %v4288_v26 = vadd.f32 %v8685_v20, %v4274_v3  ;;  %v4273_v22 = vadd.f32 %v4187_v0, %v4069_v2  ;;  %4720 = vmatpush.msra.mxu2 %v4532_v59  ;;  %4700 = vmatpush.msra.mxu1 %v4500_v5  ;;  %v4462_v0 = vld [vmem:[%s10600_s11 + $0xa0] sm:$0xff]  ;;  %v4564_v53 = vld [vmem:[%s10600_s11 + $0x3d0] sm:$0xff] }
 0x351   : > { %v4167_v42 = vpop.f32.mrf.mxu2  ;;  %4366 = vrot.lane.b32.xlu0 %v8693_v13, %s10650_s25  ;;  %v4506_v30 = vld [vmem:[%s10600_s11 + $0x200] sm:$0xff]  ;;  %v4664_v21 = vld [vmem:[%s10600_s11 + $0x6f0] sm:$0xff] }
 0x352   : > { %v8702_v1 = vmax.f32 %v4288_v26, 0.0  ;;  %v4287_v6 = vadd.f32 %v8685_v20, %v4273_v22  ;;  %v4272_v57 = vadd.f32 %v4167_v42, %v4068_v60  ;;  %v4227_v31 = vpop.f32.mrf.mxu1  ;;  %4721 = vmatpush.msra.mxu2 %v4530_v35  ;;  %4701 = vmatpush.msra.mxu1 %v4498_v8  ;;  %v4460_v60 = vld [vmem:[%s10600_s11 + $0x90] sm:$0xff]  ;;  %v4662_v15 = vld [vmem:[%s10600_s11 + $0x6e0] sm:$0xff] }
 0x353   : > { %v4275_v40 = vadd.f32 %v4227_v31, %v4071_v41  ;;  %v4492_v22 = vld [vmem:[%s10600_s11 + $0x190] sm:$0xff]  ;;  %v4598_v59 = vld [vmem:[%s10600_s11 + $0x4e0] sm:$0xff] }
 0x354   : > { %4304 = vst [vmem:[#allocation2 + $0x28] sm:$0xff] %v8702_v1  ;;  %v8708_v54 = vmax.f32 %v4287_v6, 0.0  ;;  %v4286_v48 = vadd.f32 %v8685_v20, %v4272_v57  ;;  %4722 = vmatpush.msra.mxu2 %v4528_v34  ;;  %4702 = vmatpush.msra.mxu1 %v4496_v32  ;;  %v4520_v41 = vld [vmem:[%s10600_s11 + $0x270] sm:$0xff]  ;;  %v4454_v6 = vld [vmem:[%s10600_s11 + $0x60] sm:$0xff] }
 0x355   : > { %v4289_v49 = vadd.f32 %v8685_v20, %v4275_v40  ;;  %v4456_v42 = vld [vmem:[%s10600_s11 + $0x70] sm:$0xff]  ;;  %v4486_v57 = vld [vmem:[%s10600_s11 + $0x160] sm:$0xff] }
 0x356   : > { %4303 = vst [vmem:[#allocation2 + $0x20] sm:$0xff] %v8708_v54  ;;  %v8714_v9 = vmax.f32 %v4286_v48, 0.0  ;;  %v7541_v51 = vpack.i.bf16 %v8702_v1, %v8708_v54  ;;  %4723 = vmatpush.msra.mxu2 %v4526_v11  ;;  %4703 = vmatpush.msra.mxu1 %v4494_v37  ;;  %v4516_v31 = vld [vmem:[%s10600_s11 + $0x250] sm:$0xff]  ;;  %v4514_v40 = vld [vmem:[%s10600_s11 + $0x240] sm:$0xff] }
 0x357   : > { %v8718_v16 = vmax.f32 %v4289_v49, 0.0  ;;  %v4267_v17 = vpop.f32.mrf.mxu3  ;;  %v4448_v48 = vld [vmem:[%s10600_s11 + $0x30] sm:$0xff]  ;;  %v4630_v4 = vld [vmem:[%s10600_s11 + $0x5e0] sm:$0xff] }
 0x358   : > { %4302 = vst [vmem:[#allocation2 + $0x18] sm:$0xff] %v8714_v9  ;;  %v4277_v52 = vadd.f32 %v4267_v17, %v4073_v25  ;;  %7542 = vrot.lane.b32.xlu1 %v7541_v51, %s10651_s18  ;;  %7532 = vrot.lane.b32.xlu2 %v7541_v51, %s10648_s20  ;;  %v7551_v3 = vpack.i.bf16 %v4292_v12, %v8714_v9  ;;  %v4480_v49 = vld [vmem:[%s10600_s11 + $0x130] sm:$0xff]  ;;  %v4478_v25 = vld [vmem:[%s10600_s11 + $0x120] sm:$0xff] }
 0x359   : > { %4305 = vst [vmem:[#allocation2 + $0x30] sm:$0xff] %v8718_v16  ;;  %v4247_v14 = vpop.f32.mrf.mxu2  ;;  %v7526_v33 = vpack.i.bf16 %v8718_v16, %v8693_v13  ;;  %4724 = vmatpush.msra.mxu2 %v4524_v38  ;;  %4704 = vmatpush.msra.mxu1 %v4492_v22  ;;  %v4508_v17 = vld [vmem:[%s10600_s11 + $0x210] sm:$0xff]  ;;  %v4658_v8 = vld [vmem:[%s10600_s11 + $0x6c0] sm:$0xff] }
 0x35a   : > { %v8745_v61 = vadd.f32 %v8685_v20, %v4277_v52  ;;  %v4276_v39 = vadd.f32 %v4247_v14, %v4072_v29  ;;  %5001 = vst.msk [vmem:[#allocation2 + $0x18] sm:$0xff] %vm5000_vm14, %v7669_v44  ;;  %v4444_v29 = vld [vmem:[%s10600_s11 + $0x10] sm:$0xff]  ;;  %v4442_v14 = vld [vmem:[%s10600_s11] sm:$0xff] }
 0x35b   : > { %7527 = vrot.lane.b32.xlu0 %v7526_v33, %s10648_s20  ;;  %4725 = vmatpush.msra.mxu2 %v4522_v55  ;;  %v4476_v52 = vld [vmem:[%s10600_s11 + $0x110] sm:$0xff]  ;;  %v4474_v33 = vld [vmem:[%s10600_s11 + $0x100] sm:$0xff] }
 0x35c   : > { %v4299_v45 = vmax.f32 %v8745_v61, 0.0  ;;  %v4290_v43 = vadd.f32 %v8685_v20, %v4276_v39  ;;  %v4466_v20 = vld [vmem:[%s10600_s11 + $0xc0] sm:$0xff]  ;;  %4705 = vmatpush.msra.mxu1 %v4490_v62  ;;  %v4600_v58 = vld [vmem:[%s10600_s11 + $0x4f0] sm:$0xff]  ;;  %v4537_v61 = vld [vmem:[%s10600_s11 + $0x2f8] sm:$0xff] }
 0x35d   : > { %4681 = vmatpush.msra.mxu0 %v4466_v20  ;;  %4726 = vmatpush.msra.mxu2 %v4520_v41  ;;  %v4632_v39 = vld [vmem:[%s10600_s11 + $0x5f0] sm:$0xff]  ;;  %v4558_v20 = vld [vmem:[%s10600_s11 + $0x3a0] sm:$0xff] }
 0x35e   : > { %4307 = vst.msk [vmem:[#allocation2 + $0x40] sm:$0xff] %vm2448_vm11, %v4299_v45  ;;  %v8770_v2 = vmax.f32 %v4290_v43, 0.0  ;;  %4706 = vmatpush.msra.mxu1 %v4488_v63  ;;  %v4560_v5 = vld [vmem:[%s10600_s11 + $0x3b0] sm:$0xff]  ;;  %v4594_v34 = vld [vmem:[%s10600_s11 + $0x4c0] sm:$0xff] }
 0x35f   : > { %4308 = vst.msk [vmem:[#allocation2 + $0x40] sm:$0xff] %vm2450_vm12, %v7669_v44  ;;  %4682 = vmatpush.msra.mxu0 %v4464_v10  ;;  %4727 = vmatpush.msra.mxu2 %v4518_v24  ;;  %v4562_v44 = vld [vmem:[%s10600_s11 + $0x3c0] sm:$0xff]  ;;  %v4660_v43 = vld [vmem:[%s10600_s11 + $0x6d0] sm:$0xff] }
 0x360   : > { %4306 = vst [vmem:[#allocation2 + $0x38] sm:$0xff] %v8770_v2  ;;  %7552 = vrot.lane.b32.xlu1 %v7551_v3, %s10650_s25  ;;  %7547 = vrot.lane.b32.xlu2 %v7551_v3, %s10648_s20  ;;  %v7561_v19 = vpack.i.bf16 %v8770_v2, %v8718_v16  ;;  %v4596_v35 = vld [vmem:[%s10600_s11 + $0x4d0] sm:$0xff]  ;;  %v4626_v10 = vld [vmem:[%s10600_s11 + $0x5c0] sm:$0xff] }
 0x361   : > { %4683 = vmatpush.msra.mxu0 %v4462_v0  ;;  %4707 = vmatpush.msra.mxu1 %v4486_v57  ;;  %v4556_v32 = vld [vmem:[%s10600_s11 + $0x390] sm:$0xff]  ;;  %v4554_v38 = vld [vmem:[%s10600_s11 + $0x380] sm:$0xff] }
 0x362   : > { %4728 = vmatpush.msra.mxu2 %v4516_v31  ;;  %v4656_v11 = vld [vmem:[%s10600_s11 + $0x6b0] sm:$0xff]  ;;  %v4622_v22 = vld [vmem:[%s10600_s11 + $0x5a0] sm:$0xff] }
 0x363   : > { %7537 = vrot.lane.b32.xlu0 %v7541_v51, %s10650_s25  ;;  %4684 = vmatpush.msra.mxu0 %v4460_v60  ;;  %v4568_v51 = vld [vmem:[%s10600_s11 + $0x3f0] sm:$0xff]  ;;  %v4654_v60 = vld [vmem:[%s10600_s11 + $0x6a0] sm:$0xff] }
 0x364   : > { %4708 = vmatpush.msra.mxu1 %v4484_v18  ;;  %4729 = vmatpush.msra.mxu2 %v4514_v40  ;;  %v4592_v0 = vld [vmem:[%s10600_s11 + $0x4b0] sm:$0xff]  ;;  %v4550_v41 = vld [vmem:[%s10600_s11 + $0x360] sm:$0xff] }
 0x365   : > { %4685 = vmatpush.msra.mxu0 %v4458_v56  ;;  %4738 = vmatpush.msra.mxu3 %v4568_v51  ;;  %v4624_v37 = vld [vmem:[%s10600_s11 + $0x5b0] sm:$0xff]  ;;  %v4586_v63 = vld [vmem:[%s10600_s11 + $0x480] sm:$0xff] }
 0x366   : > { %v4316_v26 = vld [vmem:[#allocation2 + $0x40] sm:$0xff]  ;;  %4709 = vmatpush.msra.mxu1 %v4482_v36  ;;  %4730 = vmatpush.msra.mxu2 %v4512_v47  ;;  %v4552_v55 = vld [vmem:[%s10600_s11 + $0x370] sm:$0xff] }
 0x367   : > { %4686 = vmatpush.msra.mxu0 %v4456_v42  ;;  %4739 = vmatpush.msra.mxu3 %v4566_v27  ;;  %v4652_v56 = vld [vmem:[%s10600_s11 + $0x690] sm:$0xff]  ;;  %v4650_v42 = vld [vmem:[%s10600_s11 + $0x680] sm:$0xff] }
 0x368   : > { %7557 = vrot.lane.b32.xlu1 %v7551_v3, %s10651_s18  ;;  %4339 = vrot.lane.b32.xlu2 %v4316_v26, %s10648_s20  ;;  %v4628_v3 = vld [vmem:[%s10600_s11 + $0x5d0] sm:$0xff]  ;;  %v4618_v24 = vld [vmem:[%s10600_s11 + $0x580] sm:$0xff] }
 0x369   : > { %4687 = vmatpush.msra.mxu0 %v4454_v6  ;;  %4710 = vmatpush.msra.mxu1 %v4480_v49  ;;  %v4588_v62 = vld [vmem:[%s10600_s11 + $0x490] sm:$0xff]  ;;  %v4546_v18 = vld [vmem:[%s10600_s11 + $0x340] sm:$0xff] }
 0x36a   : > { %4731 = vmatpush.msra.mxu2 %v4510_v23  ;;  %4740 = vmatpush.msra.mxu3 %v4564_v53  ;;  %v4548_v6 = vld [vmem:[%s10600_s11 + $0x350] sm:$0xff]  ;;  %v4646_v40 = vld [vmem:[%s10600_s11 + $0x660] sm:$0xff] }
 0x36b   : > { %4405 = vrot.lane.b32.xlu0 %v8693_v13, %s10651_s18  ;;  %4688 = vmatpush.msra.mxu0 %v4452_v46  ;;  %v4648_v57 = vld [vmem:[%s10600_s11 + $0x670] sm:$0xff]  ;;  %v4614_v36 = vld [vmem:[%s10600_s11 + $0x560] sm:$0xff] }
 0x36c   : > { %4711 = vmatpush.msra.mxu1 %v4478_v25  ;;  %4732 = vmatpush.msra.mxu2 %v4508_v17  ;;  %v4584_v31 = vld [vmem:[%s10600_s11 + $0x470] sm:$0xff]  ;;  %v4642_v25 = vld [vmem:[%s10600_s11 + $0x640] sm:$0xff] }
 0x36d   : > { %4689 = vmatpush.msra.mxu0 %v4450_v50  ;;  %4741 = vmatpush.msra.mxu3 %v4562_v44  ;;  %v4616_v46 = vld [vmem:[%s10600_s11 + $0x570] sm:$0xff]  ;;  %v4582_v50 = vld [vmem:[%s10600_s11 + $0x460] sm:$0xff] }
 0x36e   : > { %4712 = vmatpush.msra.mxu1 %v4476_v52  ;;  %4733 = vmatpush.msra.mxu2 %v4506_v30  ;;  %v4544_v47 = vld [vmem:[%s10600_s11 + $0x330] sm:$0xff]  ;;  %v4578_v51 = vld [vmem:[%s10600_s11 + $0x440] sm:$0xff] }
 0x36f   : > { %4690 = vmatpush.msra.mxu0 %v4448_v48  ;;  %4742 = vmatpush.msra.mxu3 %v4560_v5  ;;  %v4644_v48 = vld [vmem:[%s10600_s11 + $0x650] sm:$0xff]  ;;  %v4610_v17 = vld [vmem:[%s10600_s11 + $0x540] sm:$0xff] }
 0x370   : > { %4417 = vrot.lane.b32.xlu1 %v4316_v26, %s10651_s18  ;;  %4378 = vrot.lane.b32.xlu2 %v4316_v26, %s10650_s25  ;;  %v4590_v26 = vld [vmem:[%s10600_s11 + $0x4a0] sm:$0xff]  ;;  %v4580_v49 = vld [vmem:[%s10600_s11 + $0x450] sm:$0xff] }
 0x371   : > { %4691 = vmatpush.msra.mxu0 %v4446_v7  ;;  %4713 = vmatpush.msra.mxu1 %v4474_v33  ;;  %v4612_v23 = vld [vmem:[%s10600_s11 + $0x550] sm:$0xff]  ;;  %v4542_v7 = vld [vmem:[%s10600_s11 + $0x320] sm:$0xff] }
 0x372   : > { %4798 = vmatpush.msrb.mxu2 %v4664_v21  ;;  %4743 = vmatpush.msra.mxu3 %v4558_v20  ;;  %v4640_v52 = vld [vmem:[%s10600_s11 + $0x630] sm:$0xff]  ;;  %v4538_v33 = vld [vmem:[%s10600_s11 + $0x300] sm:$0xff] }
 0x373   : > { %7562 = vrot.lane.b32.xlu0 %v7561_v19, %s10650_s25  ;;  %4692 = vmatpush.msra.mxu0 %v4444_v29  ;;  %v4540_v29 = vld [vmem:[%s10600_s11 + $0x310] sm:$0xff]  ;;  %v4638_v53 = vld [vmem:[%s10600_s11 + $0x620] sm:$0xff] }
 0x374   : > { %4778 = vmatpush.msrb.mxu1 %v4632_v39  ;;  %4799 = vmatpush.msrb.mxu2 %v4662_v15  ;;  %v4576_v27 = vld [vmem:[%s10600_s11 + $0x430] sm:$0xff]  ;;  %v4574_v21 = vld [vmem:[%s10600_s11 + $0x420] sm:$0xff] }
 0x375   : > { %4693 = vmatpush.msra.mxu0 %v4442_v14  ;;  %4744 = vmatpush.msra.mxu3 %v4556_v32  ;;  %v4608_v30 = vld [vmem:[%s10600_s11 + $0x530] sm:$0xff]  ;;  %v4666_v39 = vld [vmem:[%s10600_s11 + $0x700] sm:$0xf] }
 0x376   : > { %4779 = vmatpush.msrb.mxu1 %v4630_v4  ;;  %4800 = vmatpush.msrb.mxu2 %v4660_v43  ;;  %v4636_v44 = vld [vmem:[%s10600_s11 + $0x610] sm:$0xff]  ;;  %v4634_v4 = vld [vmem:[%s10600_s11 + $0x600] sm:$0xff] }
 0x377   : > { %4758 = vmatpush.msrb.mxu0 %v4600_v58  ;;  %4745 = vmatpush.msra.mxu3 %v4554_v38  ;;  %v4606_v58 = vld [vmem:[%s10600_s11 + $0x520] sm:$0xff]  ;;  %v4572_v15 = vld [vmem:[%s10600_s11 + $0x410] sm:$0xff] }
 0x378   : > { %7567 = vrot.lane.b32.xlu1 %v7561_v19, %s10651_s18  ;;  %4337 = vrot.lane.b32.xlu2 %v8770_v2, %s10648_s20  ;;  %v4620_v19 = vld [vmem:[%s10600_s11 + $0x590] sm:$0xff]  ;;  %v4570_v5 = vld [vmem:[%s10600_s11 + $0x400] sm:$0xff] }
 0x379   : > { %4759 = vmatpush.msrb.mxu0 %v4598_v59  ;;  %4780 = vmatpush.msrb.mxu1 %v4628_v3  ;;  %v4604_v59 = vld [vmem:[%s10600_s11 + $0x510] sm:$0xff]  ;;  %v4602_v43 = vld [vmem:[%s10600_s11 + $0x500] sm:$0xff] }
 0x37a   : > { %4801 = vmatpush.msrb.mxu2 %v4658_v8  ;;  %4746 = vmatpush.msra.mxu3 %v4552_v55 }
 0x37b   : > { %4760 = vmatpush.msrb.mxu0 %v4596_v35  ;;  %4781 = vmatpush.msrb.mxu1 %v4626_v10 }
 0x37c   : > { %4802 = vmatpush.msrb.mxu2 %v4656_v11  ;;  %4747 = vmatpush.msra.mxu3 %v4550_v41 }
 0x37d   : > { %4761 = vmatpush.msrb.mxu0 %v4594_v34  ;;  %4782 = vmatpush.msrb.mxu1 %v4624_v37 }
 0x37e   : > { %4803 = vmatpush.msrb.mxu2 %v4654_v60  ;;  %4748 = vmatpush.msra.mxu3 %v4548_v6 }
 0x37f   : > { %4762 = vmatpush.msrb.mxu0 %v4592_v0  ;;  %4783 = vmatpush.msrb.mxu1 %v4622_v22 }
 0x380   : > { %4804 = vmatpush.msrb.mxu2 %v4652_v56  ;;  %4749 = vmatpush.msra.mxu3 %v4546_v18 }
 0x381   : > { %4763 = vmatpush.msrb.mxu0 %v4590_v26  ;;  %4784 = vmatpush.msrb.mxu1 %v4620_v19 }
 0x382   : > { %4805 = vmatpush.msrb.mxu2 %v4650_v42  ;;  %4750 = vmatpush.msra.mxu3 %v4544_v47 }
 0x383   : > { %4764 = vmatpush.msrb.mxu0 %v4588_v62  ;;  %4785 = vmatpush.msrb.mxu1 %v4618_v24 }
 0x384   : > { %4806 = vmatpush.msrb.mxu2 %v4648_v57  ;;  %4751 = vmatpush.msra.mxu3 %v4542_v7 }
 0x385   : > { %4765 = vmatpush.msrb.mxu0 %v4586_v63  ;;  %4786 = vmatpush.msrb.mxu1 %v4616_v46 }
 0x386   : > { %4807 = vmatpush.msrb.mxu2 %v4646_v40  ;;  %4752 = vmatpush.msra.mxu3 %v4540_v29 }
 0x387   : > { %4766 = vmatpush.msrb.mxu0 %v4584_v31  ;;  %4787 = vmatpush.msrb.mxu1 %v4614_v36 }
 0x388   : > { %4808 = vmatpush.msrb.mxu2 %v4644_v48  ;;  %4753 = vmatpush.msra.mxu3 %v4538_v33  ;;  %v4569_v33 = vld [vmem:[%s10600_s11 + $0x3f8] sm:$0xff] }
 0x389   : > { %4767 = vmatpush.msrb.mxu0 %v4582_v50  ;;  %4788 = vmatpush.msrb.mxu1 %v4612_v23 }
 0x38a   : > { %4809 = vmatpush.msrb.mxu2 %v4642_v25  ;;  %7032 = vmatpush.msk.msrb.mxu3 %vm4671_vm15, %v4666_v39  ;;  %v4473_v25 = vld [vmem:[%s10600_s11 + $0xf8] sm:$0xff] }
 0x38b   : > { %4768 = vmatpush.msrb.mxu0 %v4580_v49  ;;  %4789 = vmatpush.msrb.mxu1 %v4610_v17  ;;  %v4469_v39 = vld [vmem:[%s10600_s11 + $0xd8] sm:$0xff] }
 0x38c   : > { %4810 = vmatpush.msrb.mxu2 %v4640_v52  ;;  %v4471_v52 = vld [vmem:[%s10600_s11 + $0xe8] sm:$0xff] }
 0x38d   : > { %4769 = vmatpush.msrb.mxu0 %v4578_v51  ;;  %4790 = vmatpush.msrb.mxu1 %v4608_v30 }
 0x38e   : > { %4811 = vmatpush.msrb.mxu2 %v4638_v53 }
 0x38f   : > { %4770 = vmatpush.msrb.mxu0 %v4576_v27  ;;  %4791 = vmatpush.msrb.mxu1 %v4606_v58 }
 0x390   : > { %4812 = vmatpush.msrb.mxu2 %v4636_v44  ;;  %v4505_v44 = vld [vmem:[%s10600_s11 + $0x1f8] sm:$0xff] }
 0x391   : > { %4771 = vmatpush.msrb.mxu0 %v4574_v21  ;;  %4792 = vmatpush.msrb.mxu1 %v4604_v59  ;;  %v4467_v59 = vld [vmem:[%s10600_s11 + $0xc8] sm:$0xff] }
 0x392   : > { %4813 = vmatpush.msrb.mxu2 %v4634_v4 }
 0x393   : > { %4772 = vmatpush.msrb.mxu0 %v4572_v15  ;;  %4793 = vmatpush.msrb.mxu1 %v4602_v43  ;;  %v4567_v15 = vld [vmem:[%s10600_s11 + $0x3e8] sm:$0xff] }
 0x394   : > { %v4535_v43 = vld [vmem:[%s10600_s11 + $0x2e8] sm:$0xff] }
 0x395   : > { %4773 = vmatpush.msrb.mxu0 %v4570_v5  ;;  %v4503_v5 = vld [vmem:[%s10600_s11 + $0x1e8] sm:$0xff] }
 0x3b2   : > { %v9068_v14 = vpop.permute.xlu2 %7532 }
 0x3b3   : > { %v7535_v34 = vunpack.i.h.bf16 %v9068_v14  ;;  %v7534_v10 = vunpack.i.l.bf16 %v9068_v14  ;;  %v4461_v14 = vld [vmem:[%s10600_s11 + $0x98] sm:$0xff] }
 0x3b5   : > { %v4344_v38 = vsel %vm1559_vm7, %v7534_v10, %v7535_v34 }
 0x3b6   : > { %v4359_v63 = vmax.f32 %v8708_v54, %v4344_v38  ;;  %v4533_v38 = vld [vmem:[%s10600_s11 + $0x2d8] sm:$0xff] }
 0x3ba   : > { %v7548_v3 = vpop.permute.xlu2 %7547 }
 0x3bb   : > { %v7549_v11 = vunpack.i.l.bf16 %v7548_v3  ;;  %v7550_v60 = vunpack.i.h.bf16 %v7548_v3 }
 0x3bd   : > { %v4343_v26 = vsel %vm1559_vm7, %v7549_v11, %v7534_v10  ;;  %v4565_v10 = vld [vmem:[%s10600_s11 + $0x3d8] sm:$0xff] }
 0x3be   : > { %v4358_v31 = vmax.f32 %v8714_v9, %v4343_v26 }
 0x3c2   : > { %v9110_v32 = vpop.permute.xlu2 %4339 }
 0x3c3   : > { %v4367_v35 = vpop.permute.xlu0 %4366  ;;  %v4363_v53 = vmax.f32 %v4299_v45, %v9110_v32 }
 0x3ca   : > { %v9104_v20 = vpop.permute.xlu1 %7542  ;;  %v9134_v50 = vpop.permute.xlu2 %4378 }
 0x3cb   : > { %v7545_v22 = vunpack.i.h.bf16 %v9104_v20  ;;  %v7544_v55 = vunpack.i.l.bf16 %v9104_v20  ;;  %v4402_v45 = vmax.f32 %v4363_v53, %v9134_v50  ;;  %v4455_v20 = vld [vmem:[%s10600_s11 + $0x68] sm:$0xff] }
 0x3cc   : > { %v4523_v53 = vld [vmem:[%s10600_s11 + $0x288] sm:$0xff] }
 0x3cd   : > { %v9106_v8 = vpop.permute.xlu0 %7527  ;;  %v4422_v40 = vsel %vm2198_vm10, %v7544_v55, %v7545_v22 }
 0x3ce   : > { %v7529_v37 = vunpack.i.l.bf16 %v9106_v8 }
 0x3d0   : > { %v4341_v24 = vsel %vm1559_vm7, %v7550_v60, %v7529_v37  ;;  %v4342_v6 = vsel %vm1559_vm7, %v7529_v37, %v7549_v11  ;;  %v4465_v11 = vld [vmem:[%s10600_s11 + $0xb8] sm:$0xff]  ;;  %v4563_v60 = vld [vmem:[%s10600_s11 + $0x3c8] sm:$0xff] }
 0x3d1   : > { %v4356_v36 = vmax.f32 %v4292_v12, %v4341_v24  ;;  %v4357_v7 = vmax.f32 %v8693_v13, %v4342_v6  ;;  %v4531_v6 = vld [vmem:[%s10600_s11 + $0x2c8] sm:$0xff] }
 0x3d2   : > { %v7553_v0 = vpop.permute.xlu1 %7552 }
 0x3d3   : > { %v7555_v62 = vunpack.i.h.bf16 %v7553_v0  ;;  %v7554_v19 = vunpack.i.l.bf16 %v7553_v0  ;;  %v4338_v0 = vpop.permute.xlu2 %4337 }
 0x3d4   : > { %v4347_v24 = vsel %vm1559_vm7, %v4338_v0, %v9110_v32 }
 0x3d5   : > { %v9119_v56 = vpop.permute.xlu0 %7537  ;;  %v4380_v47 = vsel %vm1985_vm9, %v7555_v62, %v4367_v35  ;;  %v4381_v48 = vsel %vm1985_vm9, %v4367_v35, %v7554_v19  ;;  %v7530_v35 = vunpack.i.h.bf16 %v9106_v8  ;;  %v4501_v8 = vld [vmem:[%s10600_s11 + $0x1d8] sm:$0xff]  ;;  %v4463_v62 = vld [vmem:[%s10600_s11 + $0xa8] sm:$0xff] }
 0x3d6   : > { %v7540_v41 = vunpack.i.h.bf16 %v9119_v56  ;;  %v7539_v42 = vunpack.i.l.bf16 %v9119_v56  ;;  %v4395_v28 = vmax.f32 %v4356_v36, %v4380_v47  ;;  %v4396_v12 = vmax.f32 %v4357_v7, %v4381_v48  ;;  %v4495_v47 = vld [vmem:[%s10600_s11 + $0x1a8] sm:$0xff] }
 0x3d8   : > { %v4383_v57 = vsel %vm1985_vm9, %v7539_v42, %v7540_v41  ;;  %v4382_v46 = vsel %vm1985_vm9, %v7554_v19, %v7539_v42  ;;  %v4499_v19 = vld [vmem:[%s10600_s11 + $0x1c8] sm:$0xff]  ;;  %v4345_v42 = vsel %vm1559_vm7, %v7535_v34, %v7530_v35  ;;  %v4497_v34 = vld [vmem:[%s10600_s11 + $0x1b8] sm:$0xff] }
 0x3d9   : > { %v4398_v18 = vmax.f32 %v4359_v63, %v4383_v57  ;;  %v4397_v51 = vmax.f32 %v4358_v31, %v4382_v46  ;;  %v4346_v63 = vsel %vm1559_vm7, %v7530_v35, %v4338_v0  ;;  %v4561_v57 = vld [vmem:[%s10600_s11 + $0x3b8] sm:$0xff]  ;;  %v4547_v0 = vld [vmem:[%s10600_s11 + $0x348] sm:$0xff] }
 0x3da   : > { %v7558_v54 = vpop.permute.xlu1 %7557  ;;  %v4361_v56 = vmax.f32 %v8718_v16, %v4346_v63  ;;  %v4557_v16 = vld [vmem:[%s10600_s11 + $0x398] sm:$0xff]  ;;  %v4479_v63 = vld [vmem:[%s10600_s11 + $0x128] sm:$0xff] }
 0x3db   : > { %v9140_v49 = vmax.f32 %v4398_v18, %v4422_v40  ;;  %v7560_v9 = vunpack.i.h.bf16 %v7558_v54  ;;  %v7559_v23 = vunpack.i.l.bf16 %v7558_v54  ;;  %v4529_v18 = vld [vmem:[%s10600_s11 + $0x2b8] sm:$0xff]  ;;  %v4559_v40 = vld [vmem:[%s10600_s11 + $0x3a8] sm:$0xff]  ;;  %v4360_v54 = vmax.f32 %v8702_v1, %v4345_v42 }
 0x3dc   : > { %v4527_v1 = vld [vmem:[%s10600_s11 + $0x2a8] sm:$0xff]  ;;  %v4449_v35 = vld [vmem:[%s10600_s11 + $0x38] sm:$0xff] }
 0x3dd   : > { %v4421_v17 = vsel %vm2198_vm10, %v7559_v23, %v7544_v55  ;;  %v4406_v29 = vpop.permute.xlu0 %4405  ;;  %4754 = vmatmul.f32.vlgmr.msra.gmra.mxu3 %v9140_v49  ;;  %v4443_v42 = vld [vmem:[%s10600_s11 + $0x8] sm:$0xff] }
 0x3de   : > { %v9151_v27 = vmax.f32 %v4397_v51, %v4421_v17  ;;  %v4419_v13 = vsel %vm2198_vm10, %v7560_v9, %v4406_v29  ;;  %v4420_v30 = vsel %vm2198_vm10, %v4406_v29, %v7559_v23  ;;  %4838 = vmatpush.msra.mxu3 %v4473_v25  ;;  %v4457_v25 = vld [vmem:[%s10600_s11 + $0x78] sm:$0xff] }
 0x3df   : > { %v9161_v21 = vmax.f32 %v4395_v28, %v4419_v13  ;;  %v9163_v58 = vmax.f32 %v4396_v12, %v4420_v30  ;;  %v4493_v51 = vld [vmem:[%s10600_s11 + $0x198] sm:$0xff] }
 0x3e0   : > { %4839 = vmatpush.msra.mxu3 %v4471_v52  ;;  %4734 = vmatmul.f32.vlgmr.msra.gmra.mxu2 %v9151_v27  ;;  %v4525_v12 = vld [vmem:[%s10600_s11 + $0x298] sm:$0xff]  ;;  %v4555_v52 = vld [vmem:[%s10600_s11 + $0x388] sm:$0xff] }
 0x3e1   : > { %4898 = vmatpush.msra.mxu2 %v4569_v33  ;;  %4694 = vmatmul.f32.vlgmr.msra.gmra.mxu0 %v9161_v21 }
 0x3e2   : > { %4714 = vmatmul.f32.vlgmr.msra.gmra.mxu1 %v9163_v58  ;;  %4840 = vmatpush.msra.mxu3 %v4469_v39  ;;  %v9184_v4 = vpop.permute.xlu1 %4417  ;;  %v4553_v39 = vld [vmem:[%s10600_s11 + $0x378] sm:$0xff] }
 0x3e3   : > { %4858 = vmatpush.msra.mxu0 %v4505_v44  ;;  %4878 = vmatpush.msra.mxu1 %v4537_v61  ;;  %v9194_v3 = vmax.f32 %v4402_v45, %v9184_v4  ;;  %v4453_v44 = vld [vmem:[%s10600_s11 + $0x58] sm:$0xff] }
 0x3e4   : > { %4899 = vmatpush.msra.mxu2 %v4567_v15  ;;  %4841 = vmatpush.msra.mxu3 %v4467_v59  ;;  %v4489_v61 = vld [vmem:[%s10600_s11 + $0x178] sm:$0xff]  ;;  %v4551_v15 = vld [vmem:[%s10600_s11 + $0x368] sm:$0xff] }
 0x3e5   : > { %4859 = vmatpush.msra.mxu0 %v4503_v5  ;;  %4879 = vmatpush.msra.mxu1 %v4535_v43  ;;  %v7563_v37 = vpop.permute.xlu0 %7562  ;;  %v4521_v45 = vld [vmem:[%s10600_s11 + $0x278] sm:$0xff]  ;;  %v4451_v59 = vld [vmem:[%s10600_s11 + $0x48] sm:$0xff] }
 0x3e6   : > { %4900 = vmatpush.msra.mxu2 %v4565_v10  ;;  %4842 = vmatpush.msra.mxu3 %v4465_v11  ;;  %v7565_v26 = vunpack.i.h.bf16 %v7563_v37  ;;  %v7564_v55 = vunpack.i.l.bf16 %v7563_v37  ;;  %v4519_v5 = vld [vmem:[%s10600_s11 + $0x268] sm:$0xff]  ;;  %v4549_v43 = vld [vmem:[%s10600_s11 + $0x358] sm:$0xff] }
 0x3e7   : > { %7033 = vmatmul.msk.f32.vlgmr.msrb.gmra.mxu3 %vm2448_vm11, %v9194_v3  ;;  %4860 = vmatpush.msra.mxu0 %v4501_v8  ;;  %v4485_v10 = vld [vmem:[%s10600_s11 + $0x158] sm:$0xff]  ;;  %v4447_v8 = vld [vmem:[%s10600_s11 + $0x28] sm:$0xff] }
 0x3e8   : > { %4880 = vmatpush.msra.mxu1 %v4533_v38  ;;  %4901 = vmatpush.msra.mxu2 %v4563_v60  ;;  %v4384_v32 = vsel %vm1985_vm9, %v7540_v41, %v7564_v55  ;;  %v4385_v31 = vsel %vm1985_vm9, %v7564_v55, %v7565_v26  ;;  %v4386_v46 = vsel %vm1985_vm9, %v7565_v26, %v9134_v50  ;;  %v4459_v50 = vld [vmem:[%s10600_s11 + $0x88] sm:$0xff]  ;;  %v4517_v11 = vld [vmem:[%s10600_s11 + $0x258] sm:$0xff] }
 0x3e9   : > { %4843 = vmatpush.msra.mxu3 %v4463_v62  ;;  %4861 = vmatpush.msra.mxu0 %v4499_v19  ;;  %v4362_v41 = vmax.f32 %v8770_v2, %v4347_v24  ;;  %v4399_v2 = vmax.f32 %v4360_v54, %v4384_v32  ;;  %v4400_v23 = vmax.f32 %v4361_v56, %v4385_v31  ;;  %v4483_v37 = vld [vmem:[%s10600_s11 + $0x148] sm:$0xff]  ;;  %v4545_v60 = vld [vmem:[%s10600_s11 + $0x338] sm:$0xff] }
 0x3ea   : > { %4881 = vmatpush.msra.mxu1 %v4531_v6  ;;  %4902 = vmatpush.msra.mxu2 %v4561_v57  ;;  %v7568_v36 = vpop.permute.xlu1 %7567  ;;  %v4515_v38 = vld [vmem:[%s10600_s11 + $0x248] sm:$0xff]  ;;  %v4445_v26 = vld [vmem:[%s10600_s11 + $0x18] sm:$0xff] }
 0x3eb   : > { %4844 = vmatpush.msra.mxu3 %v4461_v14  ;;  %4862 = vmatpush.msra.mxu0 %v4497_v34  ;;  %v7570_v48 = vunpack.i.h.bf16 %v7568_v36  ;;  %v7569_v9 = vunpack.i.l.bf16 %v7568_v36  ;;  %v4401_v7 = vmax.f32 %v4362_v41, %v4386_v46  ;;  %v4481_v55 = vld [vmem:[%s10600_s11 + $0x138] sm:$0xff]  ;;  %v4543_v19 = vld [vmem:[%s10600_s11 + $0x328] sm:$0xff] }
 0x3ec   : > { %4882 = vmatpush.msra.mxu1 %v4529_v18  ;;  %4903 = vmatpush.msra.mxu2 %v4559_v40  ;;  %v4513_v62 = vld [vmem:[%s10600_s11 + $0x238] sm:$0xff]  ;;  %v4511_v24 = vld [vmem:[%s10600_s11 + $0x228] sm:$0xff] }
 0x3ed   : > { %v4425_v17 = vsel %vm2198_vm10, %v7570_v48, %v9184_v4  ;;  %v4423_v29 = vsel %vm2198_vm10, %v7545_v22, %v7569_v9  ;;  %v4424_v28 = vsel %vm2198_vm10, %v7569_v9, %v7570_v48  ;;  %4845 = vmatpush.msra.mxu3 %v4459_v50  ;;  %4863 = vmatpush.msra.mxu0 %v4495_v47  ;;  %v4491_v22 = vld [vmem:[%s10600_s11 + $0x188] sm:$0xff]  ;;  %v4541_v6 = vld [vmem:[%s10600_s11 + $0x318] sm:$0xff] }
 0x3ee   : > { %v9282_v13 = vmax.f32 %v4399_v2, %v4423_v29  ;;  %4883 = vmatpush.msra.mxu1 %v4527_v1  ;;  %4904 = vmatpush.msra.mxu2 %v4557_v16  ;;  %v9290_v30 = vmax.f32 %v4400_v23, %v4424_v28  ;;  %v9292_v33 = vmax.f32 %v4401_v7, %v4425_v17  ;;  %v4487_v4 = vld [vmem:[%s10600_s11 + $0x168] sm:$0xff]  ;;  %v4601_v57 = vld [vmem:[%s10600_s11 + $0x4f8] sm:$0xff] }
 0x3ef   : > { %4846 = vmatpush.msra.mxu3 %v4457_v25  ;;  %4864 = vmatpush.msra.mxu0 %v4493_v51  ;;  %v4477_v14 = vld [vmem:[%s10600_s11 + $0x118] sm:$0xff]  ;;  %v4539_v32 = vld [vmem:[%s10600_s11 + $0x308] sm:$0xff] }
 0x3f0   : > { %4884 = vmatpush.msra.mxu1 %v4525_v12  ;;  %4905 = vmatpush.msra.mxu2 %v4555_v52  ;;  %v4509_v34 = vld [vmem:[%s10600_s11 + $0x218] sm:$0xff]  ;;  %v4599_v31 = vld [vmem:[%s10600_s11 + $0x4e8] sm:$0xff] }
 0x3f1   : > { %4847 = vmatpush.msra.mxu3 %v4455_v20  ;;  %4865 = vmatpush.msra.mxu0 %v4491_v22  ;;  %v4475_v46 = vld [vmem:[%s10600_s11 + $0x108] sm:$0xff]  ;;  %v4633_v40 = vld [vmem:[%s10600_s11 + $0x5f8] sm:$0xff] }
 0x3f2   : > { %4885 = vmatpush.msra.mxu1 %v4523_v53  ;;  %4774 = vmatmul.f32.vlgmr.msrb.gmra.mxu0 %v9282_v13  ;;  %v4507_v18 = vld [vmem:[%s10600_s11 + $0x208] sm:$0xff]  ;;  %v4665_v54 = vld [vmem:[%s10600_s11 + $0x6f8] sm:$0xff] }
 0x3f3   : > { %4794 = vmatmul.f32.vlgmr.msrb.gmra.mxu1 %v9290_v30  ;;  %4814 = vmatmul.f32.vlgmr.msrb.gmra.mxu2 %v9292_v33  ;;  %v4667_v56 = vld [vmem:[%s10600_s11 + $0x708] sm:$0xf]  ;;  %v4661_v50 = vld [vmem:[%s10600_s11 + $0x6d8] sm:$0xff] }
 0x3f4   : > { %4906 = vmatpush.msra.mxu2 %v4553_v39  ;;  %4848 = vmatpush.msra.mxu3 %v4453_v44  ;;  %v4595_v41 = vld [vmem:[%s10600_s11 + $0x4c8] sm:$0xff]  ;;  %v4589_v1 = vld [vmem:[%s10600_s11 + $0x498] sm:$0xff] }
 0x3f5   : > { %4866 = vmatpush.msra.mxu0 %v4489_v61  ;;  %4886 = vmatpush.msra.mxu1 %v4521_v45  ;;  %v4663_v36 = vld [vmem:[%s10600_s11 + $0x6e8] sm:$0xff]  ;;  %v4625_v16 = vld [vmem:[%s10600_s11 + $0x5b8] sm:$0xff] }
 0x3f6   : > { %4907 = vmatpush.msra.mxu2 %v4551_v15  ;;  %4849 = vmatpush.msra.mxu3 %v4451_v59  ;;  %v4591_v47 = vld [vmem:[%s10600_s11 + $0x4a8] sm:$0xff]  ;;  %v4657_v2 = vld [vmem:[%s10600_s11 + $0x6b8] sm:$0xff] }
 0x3f7   : > { %4867 = vmatpush.msra.mxu0 %v4487_v4  ;;  %4887 = vmatpush.msra.mxu1 %v4519_v5  ;;  %v4627_v48 = vld [vmem:[%s10600_s11 + $0x5c8] sm:$0xff]  ;;  %v4585_v51 = vld [vmem:[%s10600_s11 + $0x478] sm:$0xff] }
 0x3f8   : > { %4908 = vmatpush.msra.mxu2 %v4549_v43  ;;  %4850 = vmatpush.msra.mxu3 %v4449_v35  ;;  %v4659_v9 = vld [vmem:[%s10600_s11 + $0x6c8] sm:$0xff]  ;;  %v4653_v17 = vld [vmem:[%s10600_s11 + $0x698] sm:$0xff] }
 0x3f9   : > { %4868 = vmatpush.msra.mxu0 %v4485_v10  ;;  %4888 = vmatpush.msra.mxu1 %v4517_v11  ;;  %v4587_v23 = vld [vmem:[%s10600_s11 + $0x488] sm:$0xff]  ;;  %v4581_v52 = vld [vmem:[%s10600_s11 + $0x458] sm:$0xff] }
 0x3fa   : > { %4909 = vmatpush.msra.mxu2 %v4547_v0  ;;  %4851 = vmatpush.msra.mxu3 %v4447_v8  ;;  %v4623_v7 = vld [vmem:[%s10600_s11 + $0x5a8] sm:$0xff]  ;;  %v4617_v20 = vld [vmem:[%s10600_s11 + $0x578] sm:$0xff] }
 0x3fb   : > { %4869 = vmatpush.msra.mxu0 %v4483_v37  ;;  %4889 = vmatpush.msra.mxu1 %v4515_v38  ;;  %v4655_v25 = vld [vmem:[%s10600_s11 + $0x6a8] sm:$0xff]  ;;  %v4649_v22 = vld [vmem:[%s10600_s11 + $0x678] sm:$0xff] }
 0x3fc   : > { %4910 = vmatpush.msra.mxu2 %v4545_v60  ;;  %4852 = vmatpush.msra.mxu3 %v4445_v26  ;;  %v4583_v29 = vld [vmem:[%s10600_s11 + $0x468] sm:$0xff]  ;;  %v4577_v61 = vld [vmem:[%s10600_s11 + $0x438] sm:$0xff] }
 0x3fd   : > { %4870 = vmatpush.msra.mxu0 %v4481_v55  ;;  %4890 = vmatpush.msra.mxu1 %v4513_v62  ;;  %v4619_v28 = vld [vmem:[%s10600_s11 + $0x588] sm:$0xff]  ;;  %v4613_v45 = vld [vmem:[%s10600_s11 + $0x558] sm:$0xff] }
 0x3fe   : > { %4911 = vmatpush.msra.mxu2 %v4543_v19  ;;  %4853 = vmatpush.msra.mxu3 %v4443_v42  ;;  %v4651_v12 = vld [vmem:[%s10600_s11 + $0x688] sm:$0xff]  ;;  %v4645_v15 = vld [vmem:[%s10600_s11 + $0x658] sm:$0xff] }
 0x3ff   : > { %4871 = vmatpush.msra.mxu0 %v4479_v63  ;;  %4891 = vmatpush.msra.mxu1 %v4511_v24  ;;  %v4579_v53 = vld [vmem:[%s10600_s11 + $0x448] sm:$0xff]  ;;  %v4573_v43 = vld [vmem:[%s10600_s11 + $0x418] sm:$0xff] }
 0x400   : > { %4854 = vmatmul.f32.vlgmr.msra.gmra.mxu3 %v9161_v21  ;;  %4912 = vmatpush.msra.mxu2 %v4541_v6  ;;  %v4597_v21 = vld [vmem:[%s10600_s11 + $0x4d8] sm:$0xff]  ;;  %v4615_v39 = vld [vmem:[%s10600_s11 + $0x568] sm:$0xff] }
 0x401   : > { %4918 = vmatpush.msrb.mxu3 %v4601_v57  ;;  %4872 = vmatpush.msra.mxu0 %v4477_v14  ;;  %v4647_v44 = vld [vmem:[%s10600_s11 + $0x668] sm:$0xff]  ;;  %v4609_v35 = vld [vmem:[%s10600_s11 + $0x538] sm:$0xff] }
 0x402   : > { %4892 = vmatpush.msra.mxu1 %v4509_v34  ;;  %4913 = vmatpush.msra.mxu2 %v4539_v32  ;;  %v4575_v59 = vld [vmem:[%s10600_s11 + $0x428] sm:$0xff]  ;;  %v4641_v10 = vld [vmem:[%s10600_s11 + $0x638] sm:$0xff] }
 0x403   : > { %4919 = vmatpush.msrb.mxu3 %v4599_v31  ;;  %4873 = vmatpush.msra.mxu0 %v4475_v46  ;;  %v4611_v4 = vld [vmem:[%s10600_s11 + $0x548] sm:$0xff]  ;;  %v4605_v37 = vld [vmem:[%s10600_s11 + $0x518] sm:$0xff] }
 0x404   : > { %4893 = vmatpush.msra.mxu1 %v4507_v18  ;;  %4914 = vmatmul.f32.vlgmr.msra.gmra.mxu2 %v9140_v49  ;;  %v4631_v49 = vld [vmem:[%s10600_s11 + $0x5e8] sm:$0xff]  ;;  %v4637_v38 = vld [vmem:[%s10600_s11 + $0x618] sm:$0xff] }
 0x405   : > { %4874 = vmatmul.f32.vlgmr.msra.gmra.mxu0 %v9163_v58  ;;  %4894 = vmatmul.f32.vlgmr.msra.gmra.mxu1 %v9151_v27  ;;  %v4593_v58 = vld [vmem:[%s10600_s11 + $0x4b8] sm:$0xff]  ;;  %v4643_v5 = vld [vmem:[%s10600_s11 + $0x648] sm:$0xff] }
 0x406   : > { %4920 = vmatpush.msrb.mxu3 %v4597_v21  ;;  %4938 = vmatpush.msrb.mxu0 %v4633_v40  ;;  %v4629_v27 = vld [vmem:[%s10600_s11 + $0x5d8] sm:$0xff]  ;;  %v4571_v11 = vld [vmem:[%s10600_s11 + $0x408] sm:$0xff]  ;;  %v9549_v21 = vld [vmem:[#allocation2] sm:$0xff] }
 0x407   : > { %4958 = vmatpush.msrb.mxu1 %v4665_v54  ;;  %7034 = vmatpush.msk.msrb.mxu2 %vm4671_vm15, %v4667_v56  ;;  %v4607_v0 = vld [vmem:[%s10600_s11 + $0x528] sm:$0xff]  ;;  %v5285_v56 = vld [vmem:[#allocation2 + $0x18] sm:$0xff] }
 0x408   : > { %4921 = vmatpush.msrb.mxu3 %v4595_v41  ;;  %4939 = vmatpush.msrb.mxu0 %v4631_v49  ;;  %v4639_v8 = vld [vmem:[%s10600_s11 + $0x628] sm:$0xff]  ;;  %5538 = vst.msk [vmem:[#allocation2 + $0x18] sm:$0xff] %vm5000_vm14, %v9549_v21 }
 0x409   : > { %4959 = vmatpush.msrb.mxu1 %v4663_v36  ;;  %v4603_v60 = vld [vmem:[%s10600_s11 + $0x508] sm:$0xff] }
 0x40a   : > { %4922 = vmatpush.msrb.mxu3 %v4593_v58  ;;  %4940 = vmatpush.msrb.mxu0 %v4629_v27  ;;  %v4635_v26 = vld [vmem:[%s10600_s11 + $0x608] sm:$0xff] }
 0x40b   : > { %4960 = vmatpush.msrb.mxu1 %v4661_v50 }
 0x40c   : > { %4923 = vmatpush.msrb.mxu3 %v4591_v47  ;;  %4941 = vmatpush.msrb.mxu0 %v4627_v48 }
 0x40d   : > { %4961 = vmatpush.msrb.mxu1 %v4659_v9  ;;  %7035 = vmatmul.msk.f32.vlgmr.msrb.gmra.mxu2 %vm2448_vm11, %v9194_v3  ;;  %v4621_v3 = vld [vmem:[%s10600_s11 + $0x598] sm:$0xff] }
 0x40e   : > { %4924 = vmatpush.msrb.mxu3 %v4589_v1  ;;  %4942 = vmatpush.msrb.mxu0 %v4625_v16 }
 0x40f   : > { %4962 = vmatpush.msrb.mxu1 %v4657_v2 }
 0x410   : > { %4925 = vmatpush.msrb.mxu3 %v4587_v23  ;;  %4943 = vmatpush.msrb.mxu0 %v4623_v7 }
 0x411   : > { %4963 = vmatpush.msrb.mxu1 %v4655_v25 }
 0x412   : > { %4926 = vmatpush.msrb.mxu3 %v4585_v51  ;;  %4944 = vmatpush.msrb.mxu0 %v4621_v3 }
 0x413   : > { %4964 = vmatpush.msrb.mxu1 %v4653_v17 }
 0x414   : > { %4927 = vmatpush.msrb.mxu3 %v4583_v29  ;;  %4945 = vmatpush.msrb.mxu0 %v4619_v28 }
 0x415   : > { %4965 = vmatpush.msrb.mxu1 %v4651_v12 }
 0x416   : > { %4928 = vmatpush.msrb.mxu3 %v4581_v52  ;;  %4946 = vmatpush.msrb.mxu0 %v4617_v20  ;;  %v7036_v52 = vld [vmem:[%s10594_s5 + $0x8] sm:$0xff]  ;;  %v5002_v20 = vld [vmem:[%s10594_s5] sm:$0xff] }
 0x417   : > { %4966 = vmatpush.msrb.mxu1 %v4649_v22 }
 0x418   : > { %4929 = vmatpush.msrb.mxu3 %v4579_v53  ;;  %4947 = vmatpush.msrb.mxu0 %v4615_v39 }
 0x419   : > { %4967 = vmatpush.msrb.mxu1 %v4647_v44 }
 0x41a   : > { %4930 = vmatpush.msrb.mxu3 %v4577_v61  ;;  %4948 = vmatpush.msrb.mxu0 %v4613_v45  ;;  %v7044_v45 = vld [vmem:[%s10594_s5 + $0x18] sm:$0xff] }
 0x41b   : > { %4968 = vmatpush.msrb.mxu1 %v4645_v15 }
 0x41c   : > { %4931 = vmatpush.msrb.mxu3 %v4575_v59  ;;  %4949 = vmatpush.msrb.mxu0 %v4611_v4 }
 0x41d   : > { %4969 = vmatpush.msrb.mxu1 %v4643_v5 }
 0x41e   : > { %4932 = vmatpush.msrb.mxu3 %v4573_v43  ;;  %4950 = vmatpush.msrb.mxu0 %v4609_v35 }
 0x41f   : > { %4970 = vmatpush.msrb.mxu1 %v4641_v10 }
 0x420   : > { %4933 = vmatpush.msrb.mxu3 %v4571_v11  ;;  %4951 = vmatpush.msrb.mxu0 %v4607_v0 }
 0x421   : > { %4971 = vmatpush.msrb.mxu1 %v4639_v8  ;;  %4934 = vmatmul.f32.vlgmr.msrb.gmra.mxu3 %v9282_v13 }
 0x422   : > { %4952 = vmatpush.msrb.mxu0 %v4605_v37 }
 0x423   : > { %4972 = vmatpush.msrb.mxu1 %v4637_v38  ;;  %v7041_v38 = vld [vmem:[%s10594_s5 + $0x10] sm:$0xff] }
 0x424   : > { %4953 = vmatpush.msrb.mxu0 %v4603_v60 }
 0x425   : > { %4973 = vmatpush.msrb.mxu1 %v4635_v26  ;;  %4954 = vmatmul.f32.vlgmr.msrb.gmra.mxu0 %v9290_v30 }
 0x426   : > { %4974 = vmatmul.f32.vlgmr.msrb.gmra.mxu1 %v9292_v33 }
 0x45e   : > { %v4695_v55 = vpop.f32.mrf.mxu0 }
 0x45f   : > { %v4715_v62 = vpop.f32.mrf.mxu1 }
 0x460   : > { %v4716_v13 = vadd.f32 %v4715_v62, %v4695_v55  ;;  %v4755_v63 = vpop.f32.mrf.mxu3  ;;  %v5518_v55 = vld [vmem:[%s10595_s6] sm:$0xff] }
 0x463   : > { %v4735_v19 = vpop.f32.mrf.mxu2 }
 0x464   : > { %v4736_v42 = vadd.f32 %v4735_v19, %v4716_v13 }
 0x466   : > { %v4756_v24 = vadd.f32 %v4755_v63, %v4736_v42 }
 0x46a   : > { %v4835_v46 = vpop.f32.mrf.mxu3 }
 0x46f   : > { %v4775_v6 = vpop.f32.mrf.mxu0 }
 0x470   : > { %v4776_v57 = vadd.f32 %v4775_v6, %v4756_v24  ;;  %v4795_v14 = vpop.f32.mrf.mxu1 }
 0x472   : > { %v4796_v34 = vadd.f32 %v4795_v14, %v4776_v57  ;;  %v7047_v57 = vld [vmem:[%s10594_s5 + $0x20] sm:$0xff] }
 0x476   : > { %v4815_v32 = vpop.f32.mrf.mxu2 }
 0x477   : > { %v4816_v31 = vadd.f32 %v4815_v32, %v4796_v34 }
 0x479   : > { %v9547_v18 = vadd.f32 %v4835_v46, %v4816_v31 }
 0x47b   : > { %v7576_v30 = vpack.i.bf16 %v9547_v18, %v9549_v21 }
 0x47d   : > { %7577 = vrot.lane.b32.xlu1 %v7576_v30, %s7745_s12  ;;  %7572 = vrot.lane.b32.xlu2 %v7576_v30, %s7746_s22 }
 0x482   : > { %v4875_v40 = vpop.f32.mrf.mxu0  ;;  %v4895_v41 = vpop.f32.mrf.mxu1 }
 0x483   : > { %v4855_v33 = vpop.f32.mrf.mxu3 }
 0x484   : > { %v4876_v54 = vadd.f32 %v4875_v40, %v4855_v33 }
 0x486   : > { %v4896_v49 = vadd.f32 %v4895_v41, %v4876_v54  ;;  %v7050_v54 = vld [vmem:[%s10594_s5 + $0x28] sm:$0xff] }
 0x487   : > { %v4915_v36 = vpop.f32.mrf.mxu2 }
 0x488   : > { %v4916_v58 = vadd.f32 %v4915_v36, %v4896_v49 }
 0x490   : > { %v4995_v16 = vpop.f32.mrf.mxu2 }
 0x4a2   : > { %v4955_v47 = vpop.f32.mrf.mxu0 }
 0x4a3   : > { %v4975_v9 = vpop.f32.mrf.mxu1 }
 0x4a4   : > { %v4935_v27 = vpop.f32.mrf.mxu3 }
 0x4a5   : > { %v4936_v50 = vadd.f32 %v4935_v27, %v4916_v58 }
 0x4a7   : > { %v4956_v48 = vadd.f32 %v4955_v47, %v4936_v50  ;;  %v7056_v47 = vld [vmem:[%s10594_s5 + $0x38] sm:$0xff] }
 0x4a9   : > { %v4976_v1 = vadd.f32 %v4975_v9, %v4956_v48  ;;  %v7059_v48 = vld [vmem:[%s10594_s5 + $0x40] sm:$0xff] }
 0x4ab   : > { %v9557_v2 = vadd.f32 %v4995_v16, %v4976_v1 }
 0x4ad   : > { %5015 = vrot.lane.b32.xlu0 %v9557_v2, %s7746_s22  ;;  %5125 = vrot.lane.b32.xlu1 %v9557_v2, %s7747_s0  ;;  %v7591_v23 = vpack.i.bf16 %v9557_v2, %v9547_v18 }
 0x4ae   : > { %5069 = vrot.lane.b32.xlu2 %v9557_v2, %s7745_s12 }
 0x4b5   : > { %7582 = vrot.lane.b32.xlu0 %v7576_v30, %s7747_s0  ;;  %7592 = vrot.lane.b32.xlu1 %v7591_v23, %s7748_s21 }
 0x4b6   : > { %7587 = vrot.lane.b32.xlu2 %v7576_v30, %s10647_s27 }
 0x4bd   : > { %5183 = vrot.lane.b32.xlu0 %v9557_v2, %s10647_s27  ;;  %5293 = vrot.lane.b32.xlu1 %v5285_v56, %s10648_s20 }
 0x4be   : > { %5350 = vrot.lane.b32.xlu2 %v5285_v56, %s7748_s21 }
 0x4c5   : > { %7597 = vrot.lane.b32.xlu0 %v7591_v23, %s10648_s20  ;;  %7607 = vrot.lane.b32.xlu1 %v7591_v23, %s7749_s1 }
 0x4c6   : > { %7602 = vrot.lane.b32.xlu2 %v7591_v23, %s7750_s2 }
 0x4cd   : > { %5466 = vrot.lane.b32.xlu0 %v5285_v56, %s7750_s2 }
 0x4ce   : > { %5408 = vrot.lane.b32.xlu2 %v5285_v56, %s7749_s1  ;;  %v7053_v56 = vld [vmem:[%s10594_s5 + $0x30] sm:$0xff] }
 0x4d5   : > { %5521 = vperm.xlu0 %7611, %v5518_v55   ;;  %v5819_v55 = vld [vmem:[#allocation2 + $0x18] sm:$0xff] }
 0x4d6   : > { %6061 = vst.msk [vmem:[#allocation2 + $0x18] sm:$0xff] %vm5000_vm14, %v9549_v21 }
 0x4d7   : > { %v7573_v7 = vpop.permute.xlu2 %7572 }
 0x4d8   : > { %v7575_v25 = vunpack.i.h.bf16 %v7573_v7  ;;  %v7574_v51 = vunpack.i.l.bf16 %v7573_v7 }
 0x4da   : > { %v5018_v3 = vsel %vm5017_vm0, %v7574_v51, %v7575_v25 }
 0x4db   : > { %5040 = vmatpush.msra.mxu2 %v5018_v3 }
 0x4dc   : > { %7037 = vmatmul.msk.f32.vlgmr.msra.gmra.mxu2 %vm2502_vm13, %v7036_v52 }
 0x4ef   : > { %v7578_v17 = vpop.permute.xlu1 %7577 }
 0x4f0   : > { %v7580_v29 = vunpack.i.h.bf16 %v7578_v17  ;;  %v7579_v28 = vunpack.i.l.bf16 %v7578_v17 }
 0x4f2   : > { %v5072_v12 = vsel %vm5071_vm1, %v7579_v28, %v7580_v29 }
 0x4f3   : > { %5094 = vmatpush.msrb.mxu2 %v5072_v12 }
 0x4f4   : > { %7039 = vmatmul.msk.f32.vlgmr.msrb.gmra.mxu2 %vm2502_vm13, %v5002_v20 }
 0x508   : > { %v5070_v22 = vpop.permute.xlu2 %5069 }
 0x509   : > { %v5073_v5 = vsel %vm5071_vm1, %v7580_v29, %v5070_v22 }
 0x510   : > { %v7588_v53 = vpop.permute.xlu2 %7587 }
 0x511   : > { %v7590_v39 = vunpack.i.h.bf16 %v7588_v53  ;;  %v7589_v44 = vunpack.i.l.bf16 %v7588_v53 }
 0x513   : > { %v5185_v61 = vsel %vm512_vm4, %v7589_v44, %v7590_v39 }
 0x514   : > { %5207 = vmatpush.msra.mxu0 %v5185_v61 }
 0x515   : > { %7045 = vmatmul.msk.f32.vlgmr.msra.gmra.mxu0 %vm2502_vm13, %v7044_v45 }
 0x518   : > { %v5351_v43 = vpop.permute.xlu2 %5350 }
 0x51f   : > { %v5016_v15 = vpop.permute.xlu0 %5015  ;;  %v5126_v59 = vpop.permute.xlu1 %5125 }
 0x520   : > { %v5019_v4 = vsel %vm5017_vm0, %v7575_v25, %v5016_v15  ;;  %v7603_v62 = vpop.permute.xlu2 %7602 }
 0x521   : > { %5060 = vmatpush.msra.mxu3 %v5019_v4  ;;  %v7605_v63 = vunpack.i.h.bf16 %v7603_v62  ;;  %v7604_v24 = vunpack.i.l.bf16 %v7603_v62 }
 0x522   : > { %7038 = vmatmul.msk.f32.vlgmr.msra.gmra.mxu3 %vm2502_vm13, %v7036_v52 }
 0x523   : > { %5114 = vmatpush.msrb.mxu3 %v5073_v5  ;;  %v5469_v34 = vsel %vm5468_vm5, %v7604_v24, %v7605_v63 }
 0x527   : > { %v7583_v35 = vpop.permute.xlu0 %7582  ;;  %v7593_v10 = vpop.permute.xlu1 %7592 }
 0x528   : > { %v7585_v11 = vunpack.i.h.bf16 %v7583_v35  ;;  %v7584_v0 = vunpack.i.l.bf16 %v7583_v35  ;;  %v7595_v8 = vunpack.i.h.bf16 %v7593_v10  ;;  %v7594_v37 = vunpack.i.l.bf16 %v7593_v10  ;;  %v5409_v32 = vpop.permute.xlu2 %5408 }
 0x52a   : > { %7040 = vmatmul.msk.f32.vlgmr.msrb.gmra.mxu3 %vm2502_vm13, %v5002_v20  ;;  %v5128_v60 = vsel %vm5127_vm2, %v7584_v0, %v7585_v11  ;;  %v5129_v26 = vsel %vm5127_vm2, %v7585_v11, %v5126_v59  ;;  %v5353_v19 = vsel %vm5352_vm3, %v7594_v37, %v7595_v8  ;;  %v5354_v14 = vsel %vm5352_vm3, %v7595_v8, %v5351_v43  ;;  %v5528_v11 = vld [vmem:[%s10602_s13] sm:$0x3] }
 0x52b   : > { %5150 = vmatpush.msra.mxu2 %v5128_v60  ;;  %5170 = vmatpush.msra.mxu3 %v5129_v26  ;;  %v5530_v60 = vperm.slane %v5528_v11, 0 }
 0x52c   : > { %7042 = vmatmul.msk.f32.vlgmr.msra.gmra.mxu2 %vm2502_vm13, %v7041_v38 }
 0x52d   : > { %5274 = vmatpush.msrb.mxu3 %v9557_v2  ;;  %5254 = vmatpush.msrb.mxu2 %v9547_v18 }
 0x52f   : > { %5375 = vmatpush.msra.mxu2 %v5353_v19  ;;  %v5184_v13 = vpop.permute.xlu0 %5183  ;;  %v5294_v42 = vpop.permute.xlu1 %5293 }
 0x530   : > { %v5186_v6 = vsel %vm512_vm4, %v7590_v39, %v5184_v13 }
 0x531   : > { %5227 = vmatpush.msra.mxu1 %v5186_v6  ;;  %v5531_v6 = vperm.slane %v5528_v11, 1  ;;  %v7079_v11 = vld [vmem:[%s10596_s7 + $0x30] sm:$0xff] }
 0x532   : > { %7043 = vmatmul.msk.f32.vlgmr.msra.gmra.mxu3 %vm2502_vm13, %v7041_v38  ;;  %7046 = vmatmul.msk.f32.vlgmr.msra.gmra.mxu1 %vm2502_vm13, %v7044_v45 }
 0x533   : > { %5395 = vmatpush.msra.mxu3 %v5354_v14 }
 0x534   : > { %7048 = vmatmul.msk.f32.vlgmr.msrb.gmra.mxu2 %vm2502_vm13, %v7047_v57 }
 0x535   : > { %5491 = vmatpush.msrb.mxu2 %v5469_v34 }
 0x537   : > { %v7598_v31 = vpop.permute.xlu0 %7597  ;;  %v7608_v46 = vpop.permute.xlu1 %7607 }
 0x538   : > { %v7600_v18 = vunpack.i.h.bf16 %v7598_v31  ;;  %v7599_v30 = vunpack.i.l.bf16 %v7598_v31  ;;  %v7610_v33 = vunpack.i.h.bf16 %v7608_v46  ;;  %v7609_v40 = vunpack.i.l.bf16 %v7608_v46 }
 0x53a   : > { %v5412_v41 = vsel %vm5410_vm6, %v7610_v33, %v5409_v32  ;;  %7049 = vmatmul.msk.f32.vlgmr.msrb.gmra.mxu3 %vm2502_vm13, %v7047_v57  ;;  %v5295_v49 = vsel %vm1559_vm7, %v7599_v30, %v7600_v18  ;;  %v5296_v36 = vsel %vm1559_vm7, %v7600_v18, %v5294_v42  ;;  %v5411_v58 = vsel %vm5410_vm6, %v7609_v40, %v7610_v33  ;;  %v6049_v32 = vld [vmem:[%s10597_s8] sm:$0xff] }
 0x53b   : > { %5317 = vmatpush.msrb.mxu0 %v5295_v49  ;;  %5337 = vmatpush.msrb.mxu1 %v5296_v36 }
 0x53c   : > { %7051 = vmatmul.msk.f32.vlgmr.msrb.gmra.mxu0 %vm2502_vm13, %v7050_v54  ;;  %7054 = vmatmul.msk.f32.vlgmr.msra.gmra.mxu2 %vm2502_vm13, %v7053_v56 }
 0x53d   : > { %5433 = vmatpush.msra.mxu0 %v5411_v58  ;;  %5453 = vmatpush.msra.mxu1 %v5412_v41 }
 0x53e   : > { %7052 = vmatmul.msk.f32.vlgmr.msrb.gmra.mxu1 %vm2502_vm13, %v7050_v54 }
 0x53f   : > { %v5467_v27 = vpop.permute.xlu0 %5466 }
 0x540   : > { %v5470_v50 = vsel %vm5468_vm5, %v7605_v63, %v5467_v27  ;;  %v7062_v27 = vld [vmem:[%s10596_s7 + $0x8] sm:$0xff] }
 0x541   : > { %5511 = vmatpush.msrb.mxu3 %v5470_v50 }
 0x542   : > { %7055 = vmatmul.msk.f32.vlgmr.msra.gmra.mxu3 %vm2502_vm13, %v7053_v56 }
 0x544   : > { %7057 = vmatmul.msk.f32.vlgmr.msra.gmra.mxu0 %vm2502_vm13, %v7056_v47  ;;  %7060 = vmatmul.msk.f32.vlgmr.msrb.gmra.mxu2 %vm2502_vm13, %v7059_v48 }
 0x546   : > { %7058 = vmatmul.msk.f32.vlgmr.msra.gmra.mxu1 %vm2502_vm13, %v7056_v47 }
 0x547   : > { %v5522_v0 = vpop.permute.xlu0 %5521 }
 0x54a   : > { %7061 = vmatmul.msk.f32.vlgmr.msrb.gmra.mxu3 %vm2502_vm13, %v7059_v48 }
 0x55f   : > { %v5042_v9 = vpop.f32.mrf.mxu2 }
 0x577   : > { %v5096_v16 = vpop.f32.mrf.mxu2 }
 0x578   : > { %v5097_v25 = vadd.f32 %v5096_v16, %v5042_v9 }
 0x592   : > { %v5209_v7 = vpop.f32.mrf.mxu0 }
 0x5a5   : > { %v5062_v1 = vpop.f32.mrf.mxu3 }
 0x5ad   : > { %v5116_v2 = vpop.f32.mrf.mxu3 }
 0x5ae   : > { %v5117_v12 = vadd.f32 %v5116_v2, %v5062_v1  ;;  %v5539_v2 = vld [vmem:[%s10596_s7] sm:$0xff] }
 0x5af   : > { %v5152_v23 = vpop.f32.mrf.mxu2  ;;  %v5229_v3 = vpop.f32.mrf.mxu1 }
 0x5b0   : > { %v5175_v17 = vadd.f32 %v5152_v23, %v5097_v25 }
 0x5b2   : > { %v5232_v52 = vadd.f32 %v5209_v7, %v5175_v17 }
 0x5b5   : > { %v5172_v51 = vpop.f32.mrf.mxu3 }
 0x5b6   : > { %v5176_v20 = vadd.f32 %v5172_v51, %v5117_v12  ;;  %v7067_v51 = vld [vmem:[%s10596_s7 + $0x10] sm:$0xff] }
 0x5b7   : > { %v5256_v29 = vpop.f32.mrf.mxu2 }
 0x5b8   : > { %v5279_v22 = vadd.f32 %v5256_v29, %v5232_v52  ;;  %v5233_v61 = vadd.f32 %v5229_v3, %v5176_v20 }
 0x5b9   : > { %v5319_v28 = vpop.f32.mrf.mxu0 }
 0x5ba   : > { %v5342_v45 = vadd.f32 %v5319_v28, %v5279_v22  ;;  %v7070_v22 = vld [vmem:[%s10596_s7 + $0x18] sm:$0xff] }
 0x5bb   : > { %v5339_v39 = vpop.f32.mrf.mxu1 }
 0x5bd   : > { %v5276_v53 = vpop.f32.mrf.mxu3 }
 0x5be   : > { %v5280_v15 = vadd.f32 %v5276_v53, %v5233_v61 }
 0x5bf   : > { %v5377_v44 = vpop.f32.mrf.mxu2 }
 0x5c0   : > { %v5400_v59 = vadd.f32 %v5377_v44, %v5342_v45  ;;  %v5343_v43 = vadd.f32 %v5339_v39, %v5280_v15  ;;  %v7073_v39 = vld [vmem:[%s10596_s7 + $0x20] sm:$0xff] }
 0x5c1   : > { %v5435_v4 = vpop.f32.mrf.mxu0 }
 0x5c2   : > { %v5458_v35 = vadd.f32 %v5435_v4, %v5400_v59 }
 0x5c3   : > { %v5455_v38 = vpop.f32.mrf.mxu1 }
 0x5c5   : > { %v5397_v5 = vpop.f32.mrf.mxu3 }
 0x5c6   : > { %v5401_v8 = vadd.f32 %v5397_v5, %v5343_v43  ;;  %v7076_v5 = vld [vmem:[%s10596_s7 + $0x28] sm:$0xff] }
 0x5c7   : > { %v5493_v10 = vpop.f32.mrf.mxu2 }
 0x5c8   : > { %v5516_v37 = vadd.f32 %v5493_v10, %v5458_v35  ;;  %v5459_v62 = vadd.f32 %v5455_v38, %v5401_v8 }
 0x5ca   : > { %v5524_v26 = vadd.f32 %v5522_v0, %v5516_v37 }
 0x5cc   : > { %v5526_v19 = vmax.f32 %v5524_v26, 0.0 }
 0x5cd   : > { %v5513_v13 = vpop.f32.mrf.mxu3 }
 0x5ce   : > { %v5534_v42 = vmul.f32 %v5530_v60, %v5526_v19  ;;  %v5517_v63 = vadd.f32 %v5513_v13, %v5459_v62  ;;  %v7082_v60 = vld [vmem:[%s10596_s7 + $0x38] sm:$0xff]  ;;  %v7085_v13 = vld [vmem:[%s10596_s7 + $0x40] sm:$0xff] }
 0x5d0   : > { %v5525_v24 = vadd.f32 %v5522_v0, %v5517_v63  ;;  %v7622_v57 = vpack.i.bf16 %v5534_v42, %v9549_v21 }
 0x5d2   : > { %v5527_v14 = vmax.f32 %v5525_v24, 0.0  ;;  %7623 = vrot.lane.b32.xlu0 %v7622_v57, %s7747_s0  ;;  %7613 = vrot.lane.b32.xlu1 %v7622_v57, %s7746_s22 }
 0x5d4   : > { %v9653_v34 = vmul.f32 %v5531_v6, %v5527_v14  ;;  %v9739_v14 = vld [vmem:[#allocation2 + $0x18] sm:$0xff] }
 0x5d6   : > { %5552 = vrot.lane.b32.xlu2 %v9653_v34, %s7746_s22  ;;  %v7637_v21 = vpack.i.bf16 %v9653_v34, %v5534_v42 }
 0x5da   : > { %5717 = vrot.lane.b32.xlu0 %v9653_v34, %s10647_s27  ;;  %7618 = vrot.lane.b32.xlu1 %v7622_v57, %s7745_s12 }
 0x5de   : > { %5605 = vrot.lane.b32.xlu2 %v9653_v34, %s7745_s12 }
 0x5e2   : > { %7638 = vrot.lane.b32.xlu0 %v7637_v21, %s7748_s21  ;;  %5660 = vrot.lane.b32.xlu1 %v9653_v34, %s7747_s0 }
 0x5e6   : > { %7628 = vrot.lane.b32.xlu2 %v7622_v57, %s10647_s27  ;;  %s6736_s27 = scalar_lea.hbm %s10603_s14, %s7847_s17 }
 0x5e7   : > { %s6740_s0 = sshll.u32 %s6736_s27, 4  ;;  %s6741_s0 = int_to_ptr.hbm [resolvable:$true] %s6740_s0 }
 0x5e8   : > { %s7685_s18 = sshra.s32 %s6741_s0, 4  ;;  %s7686_s18 = int_to_ptr.hbm [resolvable:$true] %s7685_s18 }
 0x5e9   : > { %s7687_s17 = scalar_lea.hbm %s7686_s18, 1  ;;  %p7692_p0 = scmp.lt.s32.totalorder %s7686_s18, %s10603_s14 }
 0x5ea   : > { %7633 = vrot.lane.b32.xlu1 %v7637_v21, %s10648_s20  ;;  %5941 = vrot.lane.b32.xlu0 %v5819_v55, %s7749_s1  ;;  %p7688_p11 = scmp.ne.s32.totalorder %s7686_s18, %s7687_s17  ;;  %p7693_p1 = scmp.lt.s32.totalorder %s7691_s26, %s7687_s17 }
 0x5ec   : > { %p7689_p12 = pnand %p7688_p11, %p7864_p5  ;;  %p7694_p2 = por %p7693_p1, %p7692_p0 }
 0x5ee   : > { %5827 = vrot.lane.b32.xlu2 %v5819_v55, %s10648_s20  ;;  %p7690_p13 = pneg %p7689_p12 }
 0x5f0   : > { %p7695_p3 = pnand %p7694_p2, %p7690_p13 }
 0x5f2   : > { %6052 = vperm.xlu0 %7611, %v6049_v32   ;;  %5884 = vrot.lane.b32.xlu1 %v5819_v55, %s7748_s21  ;;  %s6728_s21 = scalar_lea.sflag [#allocation4], %s456_s28 }
 0x5f6   : > { %7643 = vrot.lane.b32.xlu2 %v7637_v21, %s7749_s1 }
 0x5fa   : > { %7648 = vrot.lane.b32.xlu1 %v7637_v21, %s7750_s2 }
 0x5fe   : > { %5998 = vrot.lane.b32.xlu2 %v5819_v55, %s7750_s2 }
 0x606   : > { %6072 = vrot.lane.b32.xlu2 %v9739_v14, %s10648_s20 }
 0x630   : > { %v5553_v31 = vpop.permute.xlu2 %5552 }
 0x638   : > { %v5606_v46 = vpop.permute.xlu2 %5605 }
 0x640   : > { %v7629_v41 = vpop.permute.xlu2 %7628 }
 0x641   : > { %v7631_v48 = vunpack.i.h.bf16 %v7629_v41  ;;  %v7630_v9 = vunpack.i.l.bf16 %v7629_v41  ;;  %v6119_v41 = vld [vmem:[%s10598_s9 + $0x78] sm:$0xff] }
 0x643   : > { %v5719_v17 = vsel %vm512_vm4, %v7630_v9, %v7631_v48  ;;  %v7101_v9 = vld [vmem:[%s10598_s9 + $0x168] sm:$0xff] }
 0x644   : > { %v7624_v18 = vpop.permute.xlu0 %7623  ;;  %v7614_v30 = vpop.permute.xlu1 %7613 }
 0x645   : > { %v7626_v33 = vunpack.i.h.bf16 %v7624_v18  ;;  %v7625_v40 = vunpack.i.l.bf16 %v7624_v18  ;;  %v7616_v54 = vunpack.i.h.bf16 %v7614_v30  ;;  %v7615_v56 = vunpack.i.l.bf16 %v7614_v30 }
 0x647   : > { %v5554_v49 = vsel %vm5017_vm0, %v7615_v56, %v7616_v54  ;;  %v5555_v36 = vsel %vm5017_vm0, %v7616_v54, %v5553_v31  ;;  %v5662_v58 = vsel %vm5127_vm2, %v7625_v40, %v7626_v33 }
 0x648   : > { %5576 = vmatpush.msrb.mxu0 %v5554_v49  ;;  %5596 = vmatpush.msrb.mxu1 %v5555_v36  ;;  %v5828_v25 = vpop.permute.xlu2 %5827  ;;  %v7103_v49 = vld [vmem:[%s10598_s9 + $0x178] sm:$0xff]  ;;  %v6118_v36 = vld [vmem:[%s10598_s9 + $0x70] sm:$0xff] }
 0x649   : > { %7064 = vmatmul.msk.f32.vlgmr.msrb.gmra.mxu1 %vm2502_vm13, %v7062_v27  ;;  %7063 = vmatmul.msk.f32.vlgmr.msrb.gmra.mxu0 %vm2502_vm13, %v7062_v27  ;;  %v7102_v27 = vld [vmem:[%s10598_s9 + $0x170] sm:$0xff] }
 0x64a   : > { %5684 = vmatpush.msra.mxu0 %v5662_v58 }
 0x64c   : > { %5788 = vmatpush.msrb.mxu0 %v5534_v42  ;;  %v5718_v50 = vpop.permute.xlu0 %5717  ;;  %v7619_v47 = vpop.permute.xlu1 %7618 }
 0x64d   : > { %v7621_v1 = vunpack.i.h.bf16 %v7619_v47  ;;  %v7620_v16 = vunpack.i.l.bf16 %v7619_v47  ;;  %v5720_v3 = vsel %vm512_vm4, %v7631_v48, %v5718_v50  ;;  %v6135_v50 = vld [vmem:[%s10598_s9 + $0xf8] sm:$0xff]  ;;  %v6117_v48 = vld [vmem:[%s10598_s9 + $0x68] sm:$0xff]  ;;  %vm6725_vm4 = vcmask 73728  }
 0x64f   : > { %v5607_v23 = vsel %vm5071_vm1, %v7620_v16, %v7621_v1  ;;  %v5608_v7 = vsel %vm5071_vm1, %v7621_v1, %v5606_v46  ;;  %v7119_v1 = vld [vmem:[%s10598_s9 + $0x1f8] sm:$0xff]  ;;  %v6134_v16 = vld [vmem:[%s10598_s9 + $0xf0] sm:$0xff] }
 0x650   : > { %5629 = vmatpush.msra.mxu2 %v5607_v23  ;;  %5649 = vmatpush.msra.mxu3 %v5608_v7  ;;  %v7644_v44 = vpop.permute.xlu2 %7643 }
 0x651   : > { %7065 = vmatmul.msk.f32.vlgmr.msra.gmra.mxu2 %vm2502_vm13, %v5539_v2  ;;  %7066 = vmatmul.msk.f32.vlgmr.msra.gmra.mxu3 %vm2502_vm13, %v5539_v2  ;;  %v7646_v45 = vunpack.i.h.bf16 %v7644_v44  ;;  %v7645_v15 = vunpack.i.l.bf16 %v7644_v44  ;;  %v7118_v2 = vld [vmem:[%s10598_s9 + $0x1f0] sm:$0xff]  ;;  %v7116_v44 = vld [vmem:[%s10598_s9 + $0x1e0] sm:$0xff] }
 0x652   : > { %5741 = vmatpush.msrb.mxu2 %v5719_v17  ;;  %5761 = vmatpush.msrb.mxu3 %v5720_v3  ;;  %v6133_v3 = vld [vmem:[%s10598_s9 + $0xe8] sm:$0xff] }
 0x653   : > { %7068 = vmatmul.msk.f32.vlgmr.msra.gmra.mxu0 %vm2502_vm13, %v7067_v51  ;;  %v5943_v0 = vsel %vm5410_vm6, %v7645_v15, %v7646_v45  ;;  %v6114_v15 = vld [vmem:[%s10598_s9 + $0x50] sm:$0xff] }
 0x654   : > { %v7639_v29 = vpop.permute.xlu0 %7638  ;;  %v5661_v28 = vpop.permute.xlu1 %5660 }
 0x655   : > { %v7641_v12 = vunpack.i.h.bf16 %v7639_v29  ;;  %v7640_v52 = vunpack.i.l.bf16 %v7639_v29  ;;  %v5663_v20 = vsel %vm5127_vm2, %v7626_v33, %v5661_v28  ;;  %v7117_v28 = vld [vmem:[%s10598_s9 + $0x1e8] sm:$0xff] }
 0x656   : > { %5704 = vmatpush.msra.mxu1 %v5663_v20 }
 0x657   : > { %v5886_v53 = vsel %vm5352_vm3, %v7640_v52, %v7641_v12  ;;  %7069 = vmatmul.msk.f32.vlgmr.msra.gmra.mxu1 %vm2502_vm13, %v7067_v51  ;;  %v7100_v51 = vld [vmem:[%s10598_s9 + $0x160] sm:$0xff] }
 0x658   : > { %5808 = vmatpush.msrb.mxu1 %v9653_v34  ;;  %5908 = vmatpush.msra.mxu0 %v5886_v53  ;;  %v5999_v55 = vpop.permute.xlu2 %5998  ;;  %v7099_v53 = vld [vmem:[%s10598_s9 + $0x158] sm:$0xff] }
 0x659   : > { %7071 = vmatmul.msk.f32.vlgmr.msrb.gmra.mxu2 %vm2502_vm13, %v7070_v22  ;;  %7072 = vmatmul.msk.f32.vlgmr.msrb.gmra.mxu3 %vm2502_vm13, %v7070_v22  ;;  %v6115_v22 = vld [vmem:[%s10598_s9 + $0x58] sm:$0xff] }
 0x65b   : > { %7074 = vmatmul.msk.f32.vlgmr.msrb.gmra.mxu0 %vm2502_vm13, %v7073_v39 }
 0x65c   : > { %v7634_v61 = vpop.permute.xlu1 %7633  ;;  %v5942_v43 = vpop.permute.xlu0 %5941 }
 0x65d   : > { %v7636_v59 = vunpack.i.h.bf16 %v7634_v61  ;;  %v7635_v4 = vunpack.i.l.bf16 %v7634_v61  ;;  %v5944_v8 = vsel %vm5410_vm6, %v7646_v45, %v5942_v43  ;;  %v6131_v61 = vld [vmem:[%s10598_s9 + $0xd8] sm:$0xff]  ;;  %v6113_v43 = vld [vmem:[%s10598_s9 + $0x48] sm:$0xff] }
 0x65f   : > { %v5829_v35 = vsel %vm1559_vm7, %v7635_v4, %v7636_v59  ;;  %v5830_v10 = vsel %vm1559_vm7, %v7636_v59, %v5828_v25  ;;  %7075 = vmatmul.msk.f32.vlgmr.msrb.gmra.mxu1 %vm2502_vm13, %v7073_v39  ;;  %v6116_v25 = vld [vmem:[%s10598_s9 + $0x60] sm:$0xff]  ;;  %v7098_v59 = vld [vmem:[%s10598_s9 + $0x150] sm:$0xff]  ;;  %v7115_v4 = vld [vmem:[%s10598_s9 + $0x1d8] sm:$0xff] }
 0x660   : > { %5851 = vmatpush.msra.mxu2 %v5829_v35  ;;  %5871 = vmatpush.msra.mxu3 %v5830_v10  ;;  %v7097_v35 = vld [vmem:[%s10598_s9 + $0x148] sm:$0xff] }
 0x661   : > { %7077 = vmatmul.msk.f32.vlgmr.msra.gmra.mxu2 %vm2502_vm13, %v7076_v5  ;;  %7078 = vmatmul.msk.f32.vlgmr.msra.gmra.mxu3 %vm2502_vm13, %v7076_v5  ;;  %v6130_v5 = vld [vmem:[%s10598_s9 + $0xd0] sm:$0xff] }
 0x662   : > { %5965 = vmatpush.msrb.mxu2 %v5943_v0  ;;  %5985 = vmatpush.msrb.mxu3 %v5944_v8  ;;  %v6129_v0 = vld [vmem:[%s10598_s9 + $0xc8] sm:$0xff] }
 0x663   : > { %7080 = vmatmul.msk.f32.vlgmr.msra.gmra.mxu0 %vm2502_vm13, %v7079_v11 }
 0x664   : > { %v5885_v37 = vpop.permute.xlu1 %5884  ;;  %6175 = vmatpush.msra.mxu2 %v7103_v49  ;;  %6195 = vmatpush.msra.mxu3 %v7119_v1  ;;  %v7093_v49 = vld [vmem:[%s10598_s9 + $0x128] sm:$0xff] }
 0x665   : > { %v5887_v38 = vsel %vm5352_vm3, %v7641_v12, %v5885_v37  ;;  %v6132_v12 = vld [vmem:[%s10598_s9 + $0xe0] sm:$0xff]  ;;  %v7109_v1 = vld [vmem:[%s10598_s9 + $0x1a8] sm:$0xff] }
 0x666   : > { %5928 = vmatpush.msra.mxu1 %v5887_v38  ;;  %6176 = vmatpush.msra.mxu2 %v7102_v27  ;;  %v6112_v38 = vld [vmem:[%s10598_s9 + $0x40] sm:$0xff]  ;;  %v6126_v27 = vld [vmem:[%s10598_s9 + $0xb0] sm:$0xff] }
 0x667   : > { %7081 = vmatmul.msk.f32.vlgmr.msra.gmra.mxu1 %vm2502_vm13, %v7079_v11  ;;  %6196 = vmatpush.msra.mxu3 %v7118_v2  ;;  %v7114_v11 = vld [vmem:[%s10598_s9 + $0x1d0] sm:$0xff]  ;;  %v6124_v2 = vld [vmem:[%s10598_s9 + $0xa0] sm:$0xff] }
 0x668   : > { %6177 = vmatpush.msra.mxu2 %v7101_v9  ;;  %v7091_v9 = vld [vmem:[%s10598_s9 + $0x118] sm:$0xff] }
 0x669   : > { %7083 = vmatmul.msk.f32.vlgmr.msrb.gmra.mxu2 %vm2502_vm13, %v7082_v60  ;;  %7084 = vmatmul.msk.f32.vlgmr.msrb.gmra.mxu3 %vm2502_vm13, %v7082_v60  ;;  %v7096_v60 = vld [vmem:[%s10598_s9 + $0x140] sm:$0xff] }
 0x66a   : > { %6178 = vmatpush.msra.mxu2 %v7100_v51  ;;  %6197 = vmatpush.msra.mxu3 %v7117_v28  ;;  %v6123_v51 = vld [vmem:[%s10598_s9 + $0x98] sm:$0xff]  ;;  %v6122_v28 = vld [vmem:[%s10598_s9 + $0x90] sm:$0xff] }
 0x66c   : > { %v7649_v26 = vpop.permute.xlu1 %7648  ;;  %6179 = vmatpush.msra.mxu2 %v7099_v53  ;;  %6198 = vmatpush.msra.mxu3 %v7116_v44  ;;  %v7135_v53 = vld [vmem:[%s10598_s9 + $0x278] sm:$0xff]  ;;  %v7105_v44 = vld [vmem:[%s10598_s9 + $0x188] sm:$0xff] }
 0x66d   : > { %v7651_v62 = vunpack.i.h.bf16 %v7649_v26  ;;  %v7650_v19 = vunpack.i.l.bf16 %v7649_v26 }
 0x66e   : > { %6180 = vmatpush.msra.mxu2 %v7098_v59  ;;  %6199 = vmatpush.msra.mxu3 %v7115_v4  ;;  %v7183_v59 = vld [vmem:[%s10598_s9 + $0x3f8] sm:$0xff]  ;;  %v7104_v4 = vld [vmem:[%s10598_s9 + $0x180] sm:$0xff] }
 0x66f   : > { %v6001_v42 = vsel %vm5468_vm5, %v7651_v62, %v5999_v55  ;;  %v6000_v63 = vsel %vm5468_vm5, %v7650_v19, %v7651_v62  ;;  %v7113_v62 = vld [vmem:[%s10598_s9 + $0x1c8] sm:$0xff]  ;;  %v6128_v19 = vld [vmem:[%s10598_s9 + $0xc0] sm:$0xff] }
 0x670   : > { %6022 = vmatpush.msrb.mxu0 %v6000_v63  ;;  %6042 = vmatpush.msrb.mxu1 %v6001_v42 }
 0x671   : > { %7086 = vmatmul.msk.f32.vlgmr.msrb.gmra.mxu0 %vm2502_vm13, %v7085_v13  ;;  %7087 = vmatmul.msk.f32.vlgmr.msrb.gmra.mxu1 %vm2502_vm13, %v7085_v13 }
 0x672   : > { %6215 = vmatpush.msra.mxu0 %v6119_v41  ;;  %6235 = vmatpush.msra.mxu1 %v6135_v50  ;;  %v7110_v50 = vld [vmem:[%s10598_s9 + $0x1b0] sm:$0xff] }
 0x673   : > { %6181 = vmatpush.msra.mxu2 %v7097_v35  ;;  %6200 = vmatpush.msra.mxu3 %v7114_v11  ;;  %v7164_v35 = vld [vmem:[%s10598_s9 + $0x360] sm:$0xff] }
 0x674   : > { %6216 = vmatpush.msra.mxu0 %v6118_v36  ;;  %6236 = vmatpush.msra.mxu1 %v6134_v16  ;;  %v7111_v36 = vld [vmem:[%s10598_s9 + $0x1b8] sm:$0xff]  ;;  %v6106_v16 = vld [vmem:[%s10598_s9 + $0x10] sm:$0xff]  ;;  %v7132_v11 = vld [vmem:[%s10598_s9 + $0x260] sm:$0xff] }
 0x675   : > { %6182 = vmatpush.msra.mxu2 %v7096_v60  ;;  %6201 = vmatpush.msra.mxu3 %v7113_v62  ;;  %v7149_v60 = vld [vmem:[%s10598_s9 + $0x2e8] sm:$0xff]  ;;  %v7130_v62 = vld [vmem:[%s10598_s9 + $0x250] sm:$0xff] }
 0x676   : > { %6217 = vmatpush.msra.mxu0 %v6117_v48  ;;  %6237 = vmatpush.msra.mxu1 %v6133_v3  ;;  %v6125_v48 = vld [vmem:[%s10598_s9 + $0xa8] sm:$0xff] }
 0x677   : > { %v7089_v3 = vld [vmem:[%s10598_s9 + $0x108] sm:$0xff] }
 0x678   : > { %6218 = vmatpush.msra.mxu0 %v6116_v25  ;;  %6238 = vmatpush.msra.mxu1 %v6132_v12  ;;  %v6105_v25 = vld [vmem:[%s10598_s9 + $0x8] sm:$0xff]  ;;  %v7167_v12 = vld [vmem:[%s10598_s9 + $0x378] sm:$0xff] }
 0x67a   : > { %6219 = vmatpush.msra.mxu0 %v6115_v22  ;;  %6239 = vmatpush.msra.mxu1 %v6131_v61  ;;  %v6121_v22 = vld [vmem:[%s10598_s9 + $0x88] sm:$0xff]  ;;  %v6120_v61 = vld [vmem:[%s10598_s9 + $0x80] sm:$0xff] }
 0x67c   : > { %6220 = vmatpush.msra.mxu0 %v6114_v15  ;;  %6240 = vmatpush.msra.mxu1 %v6130_v5  ;;  %v7165_v15 = vld [vmem:[%s10598_s9 + $0x368] sm:$0xff] }
 0x67d   : > { %v7133_v5 = vld [vmem:[%s10598_s9 + $0x268] sm:$0xff] }
 0x67e   : > { %6221 = vmatpush.msra.mxu0 %v6113_v43  ;;  %6241 = vmatpush.msra.mxu1 %v6129_v0  ;;  %v7151_v43 = vld [vmem:[%s10598_s9 + $0x2f8] sm:$0xff]  ;;  %v7150_v0 = vld [vmem:[%s10598_s9 + $0x2f0] sm:$0xff] }
 0x680   : > { %6222 = vmatpush.msra.mxu0 %v6112_v38  ;;  %6242 = vmatpush.msra.mxu1 %v6128_v19  ;;  %v7131_v38 = vld [vmem:[%s10598_s9 + $0x258] sm:$0xff]  ;;  %v7148_v19 = vld [vmem:[%s10598_s9 + $0x2e0] sm:$0xff] }
 0x6c6   : > { %v5578_v24 = vpop.f32.mrf.mxu0  ;;  %v5598_v6 = vpop.f32.mrf.mxu1 }
 0x6d0   : > { %v5686_v57 = vpop.f32.mrf.mxu0 }
 0x6d4   : > { %v5631_v34 = vpop.f32.mrf.mxu2  ;;  %v5651_v21 = vpop.f32.mrf.mxu3 }
 0x6d5   : > { %v5706_v32 = vpop.f32.mrf.mxu1  ;;  %v5632_v46 = vadd.f32 %v5631_v34, %v5578_v24  ;;  %v5652_v18 = vadd.f32 %v5651_v21, %v5598_v6  ;;  %v6111_v24 = vld [vmem:[%s10598_s9 + $0x38] sm:$0xff]  ;;  %v7112_v34 = vld [vmem:[%s10598_s9 + $0x1c0] sm:$0xff] }
 0x6d6   : > { %v7095_v6 = vld [vmem:[%s10598_s9 + $0x138] sm:$0xff]  ;;  %6223 = vmatpush.msra.mxu0 %v6111_v24  ;;  %6202 = vmatpush.msra.mxu3 %v7112_v34  ;;  %v7128_v34 = vld [vmem:[%s10598_s9 + $0x240] sm:$0xff] }
 0x6d7   : > { %v5709_v54 = vadd.f32 %v5686_v57, %v5632_v46  ;;  %v5710_v56 = vadd.f32 %v5706_v32, %v5652_v18  ;;  %v6127_v21 = vld [vmem:[%s10598_s9 + $0xb8] sm:$0xff]  ;;  %v6053_v32 = vpop.permute.xlu0 %6052  ;;  %v6110_v46 = vld [vmem:[%s10598_s9 + $0x30] sm:$0xff]  ;;  %6183 = vmatpush.msra.mxu2 %v7095_v6  ;;  %v7160_v6 = vld [vmem:[%s10598_s9 + $0x340] sm:$0xff] }
 0x6d8   : > { %v5790_v31 = vpop.f32.mrf.mxu0  ;;  %v7094_v18 = vld [vmem:[%s10598_s9 + $0x130] sm:$0xff]  ;;  %6243 = vmatpush.msra.mxu1 %v6127_v21  ;;  %6224 = vmatpush.msra.mxu0 %v6110_v46  ;;  %v7147_v24 = vld [vmem:[%s10598_s9 + $0x2d8] sm:$0xff] }
 0x6d9   : > { %6184 = vmatpush.msra.mxu2 %v7094_v18  ;;  %6203 = vmatpush.msra.mxu3 %v7111_v36  ;;  %v7146_v21 = vld [vmem:[%s10598_s9 + $0x2d0] sm:$0xff]  ;;  %v7127_v46 = vld [vmem:[%s10598_s9 + $0x238] sm:$0xff]  ;;  %v7145_v18 = vld [vmem:[%s10598_s9 + $0x2c8] sm:$0xff] }
 0x6da   : > { %6244 = vmatpush.msra.mxu1 %v6126_v27  ;;  %v7175_v36 = vld [vmem:[%s10598_s9 + $0x3b8] sm:$0xff] }
 0x6db   : > { %6185 = vmatpush.msra.mxu2 %v7093_v49  ;;  %6204 = vmatpush.msra.mxu3 %v7110_v50  ;;  %v7157_v49 = vld [vmem:[%s10598_s9 + $0x328] sm:$0xff]  ;;  %v7143_v27 = vld [vmem:[%s10598_s9 + $0x2b8] sm:$0xff]  ;;  %v7174_v50 = vld [vmem:[%s10598_s9 + $0x3b0] sm:$0xff] }
 0x6dc   : > { %v5743_v30 = vpop.f32.mrf.mxu2  ;;  %v5763_v33 = vpop.f32.mrf.mxu3  ;;  %6245 = vmatpush.msra.mxu1 %v6125_v48  ;;  %v7142_v48 = vld [vmem:[%s10598_s9 + $0x2b0] sm:$0xff] }
 0x6dd   : > { %v5810_v40 = vpop.f32.mrf.mxu1  ;;  %v5766_v58 = vadd.f32 %v5743_v30, %v5709_v54  ;;  %v5767_v47 = vadd.f32 %v5763_v33, %v5710_v56  ;;  %6205 = vmatpush.msra.mxu3 %v7109_v1  ;;  %v7173_v1 = vld [vmem:[%s10598_s9 + $0x3a8] sm:$0xff] }
 0x6de   : > { %6246 = vmatpush.msra.mxu1 %v6124_v2  ;;  %v7141_v2 = vld [vmem:[%s10598_s9 + $0x2a8] sm:$0xff] }
 0x6df   : > { %v5813_v17 = vadd.f32 %v5790_v31, %v5766_v58  ;;  %v5814_v52 = vadd.f32 %v5810_v40, %v5767_v47  ;;  %v6109_v40 = vld [vmem:[%s10598_s9 + $0x28] sm:$0xff]  ;;  %v6108_v58 = vld [vmem:[%s10598_s9 + $0x20] sm:$0xff]  ;;  %v6107_v47 = vld [vmem:[%s10598_s9 + $0x18] sm:$0xff] }
 0x6e0   : > { %v5910_v7 = vpop.f32.mrf.mxu0  ;;  %6225 = vmatpush.msra.mxu0 %v6109_v40  ;;  %6247 = vmatpush.msra.mxu1 %v6123_v51  ;;  %v7126_v40 = vld [vmem:[%s10598_s9 + $0x230] sm:$0xff]  ;;  %v7140_v51 = vld [vmem:[%s10598_s9 + $0x2a0] sm:$0xff] }
 0x6e2   : > { %6226 = vmatpush.msra.mxu0 %v6108_v58  ;;  %6248 = vmatpush.msra.mxu1 %v6122_v28  ;;  %v7125_v58 = vld [vmem:[%s10598_s9 + $0x228] sm:$0xff]  ;;  %v7139_v28 = vld [vmem:[%s10598_s9 + $0x298] sm:$0xff] }
 0x6e4   : > { %v5853_v23 = vpop.f32.mrf.mxu2  ;;  %v5873_v29 = vpop.f32.mrf.mxu3  ;;  %6227 = vmatpush.msra.mxu0 %v6107_v47  ;;  %6249 = vmatpush.msra.mxu1 %v6121_v22  ;;  %v7124_v47 = vld [vmem:[%s10598_s9 + $0x220] sm:$0xff]  ;;  %v7138_v22 = vld [vmem:[%s10598_s9 + $0x290] sm:$0xff] }
 0x6e5   : > { %v5930_v20 = vpop.f32.mrf.mxu1  ;;  %v5876_v39 = vadd.f32 %v5853_v23, %v5813_v17  ;;  %v5877_v45 = vadd.f32 %v5873_v29, %v5814_v52  ;;  %v7090_v23 = vld [vmem:[%s10598_s9 + $0x110] sm:$0xff]  ;;  %v7107_v17 = vld [vmem:[%s10598_s9 + $0x198] sm:$0xff]  ;;  %v6104_v29 = vld [vmem:[%s10598_s9] sm:$0xff] }
 0x6e6   : > { %6228 = vmatpush.msra.mxu0 %v6106_v16  ;;  %v7088_v52 = vld [vmem:[%s10598_s9 + $0x100] sm:$0xff]  ;;  %6250 = vmatpush.msra.mxu1 %v6120_v61  ;;  %v7123_v16 = vld [vmem:[%s10598_s9 + $0x218] sm:$0xff] }
 0x6e7   : > { %v5933_v10 = vadd.f32 %v5910_v7, %v5876_v39  ;;  %v5934_v8 = vadd.f32 %v5930_v20, %v5877_v45  ;;  %v7108_v7 = vld [vmem:[%s10598_s9 + $0x1a0] sm:$0xff]  ;;  %v7106_v20 = vld [vmem:[%s10598_s9 + $0x190] sm:$0xff] }
 0x6e8   : > { %6206 = vmatpush.msra.mxu3 %v7108_v7  ;;  %6229 = vmatpush.msra.mxu0 %v6105_v25  ;;  %v7166_v39 = vld [vmem:[%s10598_s9 + $0x370] sm:$0xff]  ;;  %v7172_v7 = vld [vmem:[%s10598_s9 + $0x3a0] sm:$0xff] }
 0x6e9   : > { %v7134_v45 = vld [vmem:[%s10598_s9 + $0x270] sm:$0xff]  ;;  %6390 = vmatpush.msrb.mxu1 %v7183_v59  ;;  %v7136_v61 = vld [vmem:[%s10598_s9 + $0x280] sm:$0xff] }
 0x6ea   : > { %6207 = vmatpush.msra.mxu3 %v7107_v17  ;;  %6230 = vmatpush.msra.mxu0 %v6104_v29  ;;  %v7122_v25 = vld [vmem:[%s10598_s9 + $0x210] sm:$0xff]  ;;  %v7171_v17 = vld [vmem:[%s10598_s9 + $0x398] sm:$0xff]  ;;  %v7121_v29 = vld [vmem:[%s10598_s9 + $0x208] sm:$0xff] }
 0x6ec   : > { %v5967_v37 = vpop.f32.mrf.mxu2  ;;  %v5987_v55 = vpop.f32.mrf.mxu3  ;;  %6370 = vmatpush.msrb.mxu0 %v7167_v12  ;;  %6208 = vmatpush.msra.mxu3 %v7106_v20  ;;  %v7152_v12 = vld [vmem:[%s10598_s9 + $0x300] sm:$0xff] }
 0x6ed   : > { %v5990_v26 = vadd.f32 %v5967_v37, %v5933_v10  ;;  %v5991_v13 = vadd.f32 %v5987_v55, %v5934_v8  ;;  %v7182_v10 = vld [vmem:[%s10598_s9 + $0x3f0] sm:$0xff]  ;;  %v7163_v8 = vld [vmem:[%s10598_s9 + $0x358] sm:$0xff]  ;;  %v7181_v37 = vld [vmem:[%s10598_s9 + $0x3e8] sm:$0xff] }
 0x6ee   : > { %v6024_v42 = vpop.f32.mrf.mxu0  ;;  %v6044_v63 = vpop.f32.mrf.mxu1  ;;  %6371 = vmatpush.msrb.mxu0 %v7166_v39  ;;  %6209 = vmatpush.msra.mxu3 %v7105_v44  ;;  %v7180_v55 = vld [vmem:[%s10598_s9 + $0x3e0] sm:$0xff]  ;;  %v7137_v39 = vld [vmem:[%s10598_s9 + $0x288] sm:$0xff] }
 0x6ef   : > { %v6047_v57 = vadd.f32 %v6024_v42, %v5990_v26  ;;  %v6048_v31 = vadd.f32 %v6044_v63, %v5991_v13  ;;  %6391 = vmatpush.msrb.mxu1 %v7182_v10  ;;  %v7162_v26 = vld [vmem:[%s10598_s9 + $0x350] sm:$0xff]  ;;  %v7161_v13 = vld [vmem:[%s10598_s9 + $0x348] sm:$0xff]  ;;  %v7179_v42 = vld [vmem:[%s10598_s9 + $0x3d8] sm:$0xff] }
 0x6f0   : > { %6372 = vmatpush.msrb.mxu0 %v7165_v15  ;;  %6210 = vmatpush.msra.mxu3 %v7104_v4  ;;  %v7129_v63 = vld [vmem:[%s10598_s9 + $0x248] sm:$0xff]  ;;  %v7120_v20 = vld [vmem:[%s10598_s9 + $0x200] sm:$0xff] }
 0x6f1   : > { %v6055_v30 = vadd.f32 %v6053_v32, %v6047_v57  ;;  %v6056_v33 = vadd.f32 %v6053_v32, %v6048_v31  ;;  %6392 = vmatpush.msrb.mxu1 %v7181_v37  ;;  %v7178_v57 = vld [vmem:[%s10598_s9 + $0x3d0] sm:$0xff]  ;;  %v7159_v32 = vld [vmem:[%s10598_s9 + $0x338] sm:$0xff]  ;;  %v7177_v31 = vld [vmem:[%s10598_s9 + $0x3c8] sm:$0xff] }
 0x6f2   : > { %6312 = vmatpush.msrb.mxu3 %v7151_v43  ;;  %6373 = vmatpush.msrb.mxu0 %v7164_v35  ;;  %v7168_v44 = vld [vmem:[%s10598_s9 + $0x380] sm:$0xff] }
 0x6f3   : > { %v9857_v54 = vmax.f32 %v6055_v30, 0.0  ;;  %v9859_v56 = vmax.f32 %v6056_v33, 0.0  ;;  %6393 = vmatpush.msrb.mxu1 %v7180_v55  ;;  %v7158_v30 = vld [vmem:[%s10598_s9 + $0x330] sm:$0xff]  ;;  %v7176_v33 = vld [vmem:[%s10598_s9 + $0x3c0] sm:$0xff] }
 0x6f4   : > { %6313 = vmatpush.msrb.mxu3 %v7150_v0  ;;  %6374 = vmatpush.msrb.mxu0 %v7163_v8 }
 0x6f5   : > { %6059 = vst [vmem:[#allocation2 + $0x8] sm:$0xff] %v9857_v54  ;;  %v7657_v41 = vpack.i.bf16 %v9859_v56, %v9857_v54  ;;  %6394 = vmatpush.msrb.mxu1 %v7179_v42 }
 0x6f6   : > { %6060 = vst [vmem:[#allocation2 + $0x10] sm:$0xff] %v9859_v56  ;;  %6314 = vmatpush.msrb.mxu3 %v7149_v60  ;;  %6375 = vmatpush.msrb.mxu0 %v7162_v26 }
 0x6f7   : > { %7658 = vrot.lane.b32.xlu0 %v7657_v41, %s7749_s1  ;;  %7653 = vrot.lane.b32.xlu1 %v7657_v41, %s10648_s20 }
 0x6f8   : > { %7663 = vrot.lane.b32.xlu2 %v7657_v41, %s7750_s2  ;;  %6315 = vmatpush.msrb.mxu3 %v7148_v19  ;;  %v7144_v41 = vld [vmem:[%s10598_s9 + $0x2c0] sm:$0xff] }
 0x6f9   : > { %6376 = vmatpush.msrb.mxu0 %v7161_v13  ;;  %6395 = vmatpush.msrb.mxu1 %v7178_v57  ;;  %v7199_v57 = vld [vmem:[%s10598_s9 + $0x478] sm:$0xff] }
 0x6fa   : > { %6316 = vmatpush.msrb.mxu3 %v7147_v24 }
 0x6fb   : > { %6377 = vmatpush.msrb.mxu0 %v7160_v6  ;;  %6396 = vmatpush.msrb.mxu1 %v7177_v31  ;;  %v7229_v31 = vld [vmem:[%s10598_s9 + $0x568] sm:$0xff] }
 0x6fc   : > { %6317 = vmatpush.msrb.mxu3 %v7146_v21 }
 0x6fd   : > { %6378 = vmatpush.msrb.mxu0 %v7159_v32  ;;  %6397 = vmatpush.msrb.mxu1 %v7176_v33  ;;  %v7198_v32 = vld [vmem:[%s10598_s9 + $0x470] sm:$0xff]  ;;  %v7215_v33 = vld [vmem:[%s10598_s9 + $0x4f8] sm:$0xff] }
 0x6fe   : > { %6318 = vmatpush.msrb.mxu3 %v7145_v18 }
 0x6ff   : > { %6096 = vrot.lane.b32.xlu0 %v9739_v14, %s7750_s2  ;;  %6084 = vrot.lane.b32.xlu1 %v9739_v14, %s7749_s1  ;;  %v7092_v14 = vld [vmem:[%s10598_s9 + $0x120] sm:$0xff]  ;;  %s457_s2 = scalar_lea.vmem [#allocation3], %s456_s28 }
 0x700   : > { %6186 = vmatpush.msra.mxu2 %v7092_v14  ;;  %6379 = vmatpush.msrb.mxu0 %v7158_v30  ;;  %v7156_v14 = vld [vmem:[%s10598_s9 + $0x320] sm:$0xff]  ;;  %v7197_v30 = vld [vmem:[%s10598_s9 + $0x468] sm:$0xff]  ;;  %s6738_s1 = sshll.u32 %s457_s2, 4  ;;  %s6739_s1 = int_to_ptr.vmem [resolvable:$true] %s6738_s1 }
 0x701   : > { %6319 = vmatpush.msrb.mxu3 %v7144_v41  ;;  %6398 = vmatpush.msrb.mxu1 %v7175_v36  ;;  %v7246_v41 = vld [vmem:[%s10598_s9 + $0x5f0] sm:$0xff] }
 0x702   : > { %6187 = vmatpush.msra.mxu2 %v7091_v9  ;;  %6380 = vmatpush.msrb.mxu0 %v7157_v49  ;;  %v7155_v9 = vld [vmem:[%s10598_s9 + $0x318] sm:$0xff]  ;;  %v7196_v49 = vld [vmem:[%s10598_s9 + $0x460] sm:$0xff] }
 0x703   : > { %6320 = vmatpush.msrb.mxu3 %v7143_v27  ;;  %6399 = vmatpush.msrb.mxu1 %v7174_v50  ;;  %v7227_v27 = vld [vmem:[%s10598_s9 + $0x558] sm:$0xff] }
 0x704   : > { %6188 = vmatpush.msra.mxu2 %v7090_v23  ;;  %6381 = vmatpush.msrb.mxu0 %v7156_v14  ;;  %v7154_v23 = vld [vmem:[%s10598_s9 + $0x310] sm:$0xff]  ;;  %v7245_v14 = vld [vmem:[%s10598_s9 + $0x5e8] sm:$0xff] }
 0x705   : > { %6321 = vmatpush.msrb.mxu3 %v7142_v48  ;;  %6400 = vmatpush.msrb.mxu1 %v7173_v1  ;;  %v7213_v48 = vld [vmem:[%s10598_s9 + $0x4e8] sm:$0xff]  ;;  %v7244_v1 = vld [vmem:[%s10598_s9 + $0x5e0] sm:$0xff] }
 0x706   : > { %6189 = vmatpush.msra.mxu2 %v7089_v3  ;;  %6382 = vmatpush.msrb.mxu0 %v7155_v9  ;;  %v7153_v3 = vld [vmem:[%s10598_s9 + $0x308] sm:$0xff]  ;;  %v7226_v9 = vld [vmem:[%s10598_s9 + $0x550] sm:$0xff] }
 0x707   : > { %6322 = vmatpush.msrb.mxu3 %v7141_v2  ;;  %6401 = vmatpush.msrb.mxu1 %v7172_v7  ;;  %v7225_v7 = vld [vmem:[%s10598_s9 + $0x548] sm:$0xff] }
 0x708   : > { %6190 = vmatpush.msra.mxu2 %v7088_v52  ;;  %6383 = vmatpush.msrb.mxu0 %v7154_v23  ;;  %v7170_v52 = vld [vmem:[%s10598_s9 + $0x390] sm:$0xff]  ;;  %v7212_v23 = vld [vmem:[%s10598_s9 + $0x4e0] sm:$0xff] }
 0x709   : > { %6323 = vmatpush.msrb.mxu3 %v7140_v51  ;;  %6402 = vmatpush.msrb.mxu1 %v7171_v17  ;;  %v7211_v17 = vld [vmem:[%s10598_s9 + $0x4d8] sm:$0xff] }
 0x70a   : > { %6292 = vmatpush.msrb.mxu2 %v7135_v53  ;;  %6384 = vmatpush.msrb.mxu0 %v7153_v3  ;;  %v7169_v53 = vld [vmem:[%s10598_s9 + $0x388] sm:$0xff] }
 0x70b   : > { %6324 = vmatpush.msrb.mxu3 %v7139_v28  ;;  %6403 = vmatpush.msrb.mxu1 %v7170_v52  ;;  %v7193_v3 = vld [vmem:[%s10598_s9 + $0x448] sm:$0xff]  ;;  %v7242_v28 = vld [vmem:[%s10598_s9 + $0x5d0] sm:$0xff] }
 0x70c   : > { %6293 = vmatpush.msrb.mxu2 %v7134_v45  ;;  %6385 = vmatpush.msrb.mxu0 %v7152_v12  ;;  %v6073_v45 = vpop.permute.xlu2 %6072  ;;  %v7192_v12 = vld [vmem:[%s10598_s9 + $0x440] sm:$0xff]  ;;  %v7210_v52 = vld [vmem:[%s10598_s9 + $0x4d0] sm:$0xff] }
 0x70d   : > { %6325 = vmatpush.msrb.mxu3 %v7138_v22  ;;  %6404 = vmatpush.msrb.mxu1 %v7169_v53  ;;  %v7241_v22 = vld [vmem:[%s10598_s9 + $0x5c8] sm:$0xff]  ;;  %v7191_v53 = vld [vmem:[%s10598_s9 + $0x438] sm:$0xff] }
 0x70e   : > { %6294 = vmatpush.msrb.mxu2 %v7133_v5 }
 0x70f   : > { %6326 = vmatpush.msrb.mxu3 %v7137_v39  ;;  %6405 = vmatpush.msrb.mxu1 %v7168_v44  ;;  %v7209_v39 = vld [vmem:[%s10598_s9 + $0x4c8] sm:$0xff]  ;;  %v7222_v44 = vld [vmem:[%s10598_s9 + $0x530] sm:$0xff] }
 0x710   : > { %6295 = vmatpush.msrb.mxu2 %v7132_v11 }
 0x711   : > { %6327 = vmatpush.msrb.mxu3 %v7136_v61  ;;  %v7240_v61 = vld [vmem:[%s10598_s9 + $0x5c0] sm:$0xff] }
 0x712   : > { %6296 = vmatpush.msrb.mxu2 %v7131_v38 }
 0x714   : > { %6297 = vmatpush.msrb.mxu2 %v7130_v62 }
 0x716   : > { %6298 = vmatpush.msrb.mxu2 %v7129_v63  ;;  %v7231_v63 = vld [vmem:[%s10598_s9 + $0x578] sm:$0xff] }
 0x718   : > { %6299 = vmatpush.msrb.mxu2 %v7128_v34  ;;  %v7230_v34 = vld [vmem:[%s10598_s9 + $0x570] sm:$0xff] }
 0x71a   : > { %6300 = vmatpush.msrb.mxu2 %v7127_v46  ;;  %v7247_v46 = vld [vmem:[%s10598_s9 + $0x5f8] sm:$0xff] }
 0x71c   : > { %6301 = vmatpush.msrb.mxu2 %v7126_v40  ;;  %v7228_v40 = vld [vmem:[%s10598_s9 + $0x560] sm:$0xff] }
 0x71e   : > { %6302 = vmatpush.msrb.mxu2 %v7125_v58  ;;  %v7214_v58 = vld [vmem:[%s10598_s9 + $0x4f0] sm:$0xff] }
 0x720   : > { %6303 = vmatpush.msrb.mxu2 %v7124_v47  ;;  %v7195_v47 = vld [vmem:[%s10598_s9 + $0x458] sm:$0xff] }
 0x722   : > { %6304 = vmatpush.msrb.mxu2 %v7123_v16  ;;  %v7194_v16 = vld [vmem:[%s10598_s9 + $0x450] sm:$0xff] }
 0x724   : > { %6305 = vmatpush.msrb.mxu2 %v7122_v25  ;;  %v7243_v25 = vld [vmem:[%s10598_s9 + $0x5d8] sm:$0xff] }
 0x726   : > { %6306 = vmatpush.msrb.mxu2 %v7121_v29  ;;  %v7224_v29 = vld [vmem:[%s10598_s9 + $0x540] sm:$0xff] }
 0x728   : > { %6307 = vmatpush.msrb.mxu2 %v7120_v20  ;;  %v7223_v20 = vld [vmem:[%s10598_s9 + $0x538] sm:$0xff] }
 0x752   : > { %v7664_v15 = vpop.permute.xlu2 %7663 }
 0x753   : > { %v7666_v11 = vunpack.i.h.bf16 %v7664_v15  ;;  %v7665_v0 = vunpack.i.l.bf16 %v7664_v15  ;;  %v7208_v15 = vld [vmem:[%s10598_s9 + $0x4c0] sm:$0xff] }
 0x755   : > { %v6098_v55 = vsel %vm5468_vm5, %v7665_v0, %v7666_v11  ;;  %v7206_v0 = vld [vmem:[%s10598_s9 + $0x4b0] sm:$0xff] }
 0x769   : > { %v7659_v59 = vpop.permute.xlu0 %7658  ;;  %v7654_v4 = vpop.permute.xlu1 %7653 }
 0x76a   : > { %v7661_v5 = vunpack.i.h.bf16 %v7659_v59  ;;  %v7660_v43 = vunpack.i.l.bf16 %v7659_v59  ;;  %v7656_v35 = vunpack.i.h.bf16 %v7654_v4  ;;  %v7655_v10 = vunpack.i.l.bf16 %v7654_v4  ;;  %v7221_v59 = vld [vmem:[%s10598_s9 + $0x528] sm:$0xff]  ;;  %v7239_v4 = vld [vmem:[%s10598_s9 + $0x5b8] sm:$0xff] }
 0x76c   : > { %v6074_v8 = vsel %vm1559_vm7, %v7655_v10, %v7656_v35  ;;  %v6086_v38 = vsel %vm5410_vm6, %v7660_v43, %v7661_v5  ;;  %v6075_v60 = vsel %vm1559_vm7, %v7656_v35, %v6073_v45  ;;  %v7190_v45 = vld [vmem:[%s10598_s9 + $0x430] sm:$0xff]  ;;  %v7207_v43 = vld [vmem:[%s10598_s9 + $0x4b8] sm:$0xff]  ;;  %v7220_v35 = vld [vmem:[%s10598_s9 + $0x520] sm:$0xff] }
 0x76d   : > { %v6078_v37 = vmax.f32 %v9857_v54, %v6074_v8  ;;  %v6079_v42 = vmax.f32 %v9859_v56, %v6075_v60  ;;  %v7238_v10 = vld [vmem:[%s10598_s9 + $0x5b0] sm:$0xff]  ;;  %v7219_v8 = vld [vmem:[%s10598_s9 + $0x518] sm:$0xff]  ;;  %v7205_v60 = vld [vmem:[%s10598_s9 + $0x4a8] sm:$0xff] }
 0x76f   : > { %v6090_v26 = vmax.f32 %v6078_v37, %v6086_v38  ;;  %v7237_v37 = vld [vmem:[%s10598_s9 + $0x5a8] sm:$0xff]  ;;  %v7187_v38 = vld [vmem:[%s10598_s9 + $0x418] sm:$0xff] }
 0x771   : > { %v10147_v62 = vmax.f32 %v6090_v26, %v6098_v55  ;;  %v6097_v19 = vpop.permute.xlu0 %6096  ;;  %v6085_v13 = vpop.permute.xlu1 %6084  ;;  %v7218_v26 = vld [vmem:[%s10598_s9 + $0x510] sm:$0xff]  ;;  %v7236_v55 = vld [vmem:[%s10598_s9 + $0x5a0] sm:$0xff] }
 0x772   : > { %v6087_v24 = vsel %vm5410_vm6, %v7661_v5, %v6085_v13  ;;  %v6099_v56 = vsel %vm5468_vm5, %v7666_v11, %v6097_v19  ;;  %v7189_v5 = vld [vmem:[%s10598_s9 + $0x428] sm:$0xff]  ;;  %v7188_v11 = vld [vmem:[%s10598_s9 + $0x420] sm:$0xff]  ;;  %v7186_v19 = vld [vmem:[%s10598_s9 + $0x410] sm:$0xff] }
 0x773   : > { %v6091_v54 = vmax.f32 %v6079_v42, %v6087_v24  ;;  %6231 = vmatmul.f32.vlgmr.msra.gmra.mxu0 %v10147_v62  ;;  %v6171_v6 = vrot.slane %v10147_v62, 1  ;;  %v6366_v36 = vrot.slane %v10147_v62, 3  ;;  %v6288_v50 = vrot.slane %v10147_v62, 2  ;;  %v7204_v13 = vld [vmem:[%s10598_s9 + $0x4a0] sm:$0xff]  ;;  %v7217_v42 = vld [vmem:[%s10598_s9 + $0x508] sm:$0xff] }
 0x774   : > { %6526 = vmatpush.msra.mxu0 %v7231_v63  ;;  %v7235_v63 = vld [vmem:[%s10598_s9 + $0x598] sm:$0xff]  ;;  %v7185_v24 = vld [vmem:[%s10598_s9 + $0x408] sm:$0xff] }
 0x775   : > { %v10163_v21 = vmax.f32 %v6091_v54, %v6099_v56  ;;  %6191 = vmatmul.f32.vlgmr.msra.gmra.mxu2 %v6171_v6  ;;  %v7203_v54 = vld [vmem:[%s10598_s9 + $0x498] sm:$0xff]  ;;  %v7216_v6 = vld [vmem:[%s10598_s9 + $0x500] sm:$0xff]  ;;  %v6522_v56 = vrot.slane %v10147_v62, 5 }
 0x776   : > { %6448 = vmatpush.msra.mxu2 %v7199_v57  ;;  %6527 = vmatpush.msra.mxu0 %v7230_v34  ;;  %v7234_v57 = vld [vmem:[%s10598_s9 + $0x590] sm:$0xff]  ;;  %v7184_v34 = vld [vmem:[%s10598_s9 + $0x400] sm:$0xff] }
 0x777   : > { %6251 = vmatmul.f32.vlgmr.msra.gmra.mxu1 %v10163_v21  ;;  %v6172_v18 = vrot.slane %v10163_v21, 1  ;;  %v6367_v2 = vrot.slane %v10163_v21, 3  ;;  %v6289_v51 = vrot.slane %v10163_v21, 2 }
 0x778   : > { %6449 = vmatpush.msra.mxu2 %v7198_v32  ;;  %6528 = vmatpush.msra.mxu0 %v7229_v31  ;;  %v7295_v32 = vld [vmem:[%s10598_s9 + $0x778] sm:$0xff]  ;;  %v7202_v31 = vld [vmem:[%s10598_s9 + $0x490] sm:$0xff] }
 0x779   : > { %6546 = vmatpush.msra.mxu1 %v7247_v46  ;;  %6211 = vmatmul.f32.vlgmr.msra.gmra.mxu3 %v6172_v18  ;;  %v7233_v46 = vld [vmem:[%s10598_s9 + $0x588] sm:$0xff]  ;;  %v6444_v18 = vrot.slane %v10147_v62, 4 }
 0x77a   : > { %6450 = vmatpush.msra.mxu2 %v7197_v30  ;;  %6468 = vmatpush.msra.mxu3 %v7215_v33  ;;  %v7263_v30 = vld [vmem:[%s10598_s9 + $0x678] sm:$0xff]  ;;  %v7294_v33 = vld [vmem:[%s10598_s9 + $0x770] sm:$0xff] }
 0x77b   : > { %6529 = vmatpush.msra.mxu0 %v7228_v40  ;;  %6547 = vmatpush.msra.mxu1 %v7246_v41  ;;  %v7201_v40 = vld [vmem:[%s10598_s9 + $0x488] sm:$0xff]  ;;  %v7232_v41 = vld [vmem:[%s10598_s9 + $0x580] sm:$0xff] }
 0x77c   : > { %6386 = vmatmul.f32.vlgmr.msrb.gmra.mxu0 %v6366_v36  ;;  %6451 = vmatpush.msra.mxu2 %v7196_v49  ;;  %v7262_v49 = vld [vmem:[%s10598_s9 + $0x670] sm:$0xff]  ;;  %v6523_v36 = vrot.slane %v10163_v21, 5 }
 0x77d   : > { %6469 = vmatpush.msra.mxu3 %v7214_v58  ;;  %6530 = vmatpush.msra.mxu0 %v7227_v27  ;;  %v7293_v58 = vld [vmem:[%s10598_s9 + $0x768] sm:$0xff]  ;;  %v7311_v27 = vld [vmem:[%s10598_s9 + $0x7f8] sm:$0xff] }
 0x77e   : > { %6548 = vmatpush.msra.mxu1 %v7245_v14  ;;  %6308 = vmatmul.f32.vlgmr.msrb.gmra.mxu2 %v6288_v50  ;;  %v7200_v14 = vld [vmem:[%s10598_s9 + $0x480] sm:$0xff]  ;;  %v7261_v50 = vld [vmem:[%s10598_s9 + $0x668] sm:$0xff] }
 0x77f   : > { %6452 = vmatpush.msra.mxu2 %v7195_v47  ;;  %6470 = vmatpush.msra.mxu3 %v7213_v48  ;;  %v7292_v47 = vld [vmem:[%s10598_s9 + $0x760] sm:$0xff]  ;;  %v6445_v48 = vrot.slane %v10163_v21, 4 }
 0x780   : > { %6531 = vmatpush.msra.mxu0 %v7226_v9  ;;  %6549 = vmatpush.msra.mxu1 %v7244_v1  ;;  %v7279_v9 = vld [vmem:[%s10598_s9 + $0x6f8] sm:$0xff]  ;;  %v7310_v1 = vld [vmem:[%s10598_s9 + $0x7f0] sm:$0xff] }
 0x781   : > { %6406 = vmatmul.f32.vlgmr.msrb.gmra.mxu1 %v6367_v2  ;;  %6453 = vmatpush.msra.mxu2 %v7194_v16  ;;  %v7260_v16 = vld [vmem:[%s10598_s9 + $0x660] sm:$0xff]  ;;  %v7291_v2 = vld [vmem:[%s10598_s9 + $0x758] sm:$0xff] }
 0x782   : > { %6471 = vmatpush.msra.mxu3 %v7212_v23  ;;  %6532 = vmatpush.msra.mxu0 %v7225_v7  ;;  %v7278_v23 = vld [vmem:[%s10598_s9 + $0x6f0] sm:$0xff]  ;;  %v7309_v7 = vld [vmem:[%s10598_s9 + $0x7e8] sm:$0xff] }
 0x783   : > { %6550 = vmatpush.msra.mxu1 %v7243_v25  ;;  %6328 = vmatmul.f32.vlgmr.msrb.gmra.mxu3 %v6289_v51  ;;  %v7259_v25 = vld [vmem:[%s10598_s9 + $0x658] sm:$0xff]  ;;  %v7290_v51 = vld [vmem:[%s10598_s9 + $0x750] sm:$0xff] }
 0x784   : > { %6454 = vmatpush.msra.mxu2 %v7193_v3  ;;  %6472 = vmatpush.msra.mxu3 %v7211_v17  ;;  %v7277_v3 = vld [vmem:[%s10598_s9 + $0x6e8] sm:$0xff]  ;;  %v7308_v17 = vld [vmem:[%s10598_s9 + $0x7e0] sm:$0xff] }
 0x785   : > { %6533 = vmatpush.msra.mxu0 %v7224_v29  ;;  %6551 = vmatpush.msra.mxu1 %v7242_v28  ;;  %v7258_v29 = vld [vmem:[%s10598_s9 + $0x650] sm:$0xff]  ;;  %v7289_v28 = vld [vmem:[%s10598_s9 + $0x748] sm:$0xff] }
 0x786   : > { %6455 = vmatpush.msra.mxu2 %v7192_v12  ;;  %6473 = vmatpush.msra.mxu3 %v7210_v52  ;;  %v7276_v12 = vld [vmem:[%s10598_s9 + $0x6e0] sm:$0xff]  ;;  %v7307_v52 = vld [vmem:[%s10598_s9 + $0x7d8] sm:$0xff] }
 0x787   : > { %6534 = vmatpush.msra.mxu0 %v7223_v20  ;;  %6552 = vmatpush.msra.mxu1 %v7241_v22  ;;  %v7257_v20 = vld [vmem:[%s10598_s9 + $0x648] sm:$0xff]  ;;  %v7288_v22 = vld [vmem:[%s10598_s9 + $0x740] sm:$0xff] }
 0x788   : > { %6456 = vmatpush.msra.mxu2 %v7191_v53  ;;  %6474 = vmatpush.msra.mxu3 %v7209_v39  ;;  %v7275_v53 = vld [vmem:[%s10598_s9 + $0x6d8] sm:$0xff]  ;;  %v7306_v39 = vld [vmem:[%s10598_s9 + $0x7d0] sm:$0xff] }
 0x789   : > { %6535 = vmatpush.msra.mxu0 %v7222_v44  ;;  %6553 = vmatpush.msra.mxu1 %v7240_v61  ;;  %v7256_v44 = vld [vmem:[%s10598_s9 + $0x640] sm:$0xff]  ;;  %v7287_v61 = vld [vmem:[%s10598_s9 + $0x738] sm:$0xff] }
 0x78a   : > { %6457 = vmatpush.msra.mxu2 %v7190_v45  ;;  %6475 = vmatpush.msra.mxu3 %v7208_v15  ;;  %v7274_v45 = vld [vmem:[%s10598_s9 + $0x6d0] sm:$0xff]  ;;  %v7305_v15 = vld [vmem:[%s10598_s9 + $0x7c8] sm:$0xff] }
 0x78b   : > { %6536 = vmatpush.msra.mxu0 %v7221_v59  ;;  %6554 = vmatpush.msra.mxu1 %v7239_v4  ;;  %v7255_v59 = vld [vmem:[%s10598_s9 + $0x638] sm:$0xff]  ;;  %v7286_v4 = vld [vmem:[%s10598_s9 + $0x730] sm:$0xff] }
 0x78c   : > { %6458 = vmatpush.msra.mxu2 %v7189_v5  ;;  %6476 = vmatpush.msra.mxu3 %v7207_v43  ;;  %v7273_v5 = vld [vmem:[%s10598_s9 + $0x6c8] sm:$0xff]  ;;  %v7304_v43 = vld [vmem:[%s10598_s9 + $0x7c0] sm:$0xff] }
 0x78d   : > { %6537 = vmatpush.msra.mxu0 %v7220_v35  ;;  %6555 = vmatpush.msra.mxu1 %v7238_v10  ;;  %v7254_v35 = vld [vmem:[%s10598_s9 + $0x630] sm:$0xff]  ;;  %v7285_v10 = vld [vmem:[%s10598_s9 + $0x728] sm:$0xff] }
 0x78e   : > { %6459 = vmatpush.msra.mxu2 %v7188_v11  ;;  %6477 = vmatpush.msra.mxu3 %v7206_v0  ;;  %v7272_v11 = vld [vmem:[%s10598_s9 + $0x6c0] sm:$0xff]  ;;  %v7303_v0 = vld [vmem:[%s10598_s9 + $0x7b8] sm:$0xff] }
 0x78f   : > { %6538 = vmatpush.msra.mxu0 %v7219_v8  ;;  %6556 = vmatpush.msra.mxu1 %v7237_v37  ;;  %v7253_v8 = vld [vmem:[%s10598_s9 + $0x628] sm:$0xff]  ;;  %v7284_v37 = vld [vmem:[%s10598_s9 + $0x720] sm:$0xff] }
 0x790   : > { %6460 = vmatpush.msra.mxu2 %v7187_v38  ;;  %6478 = vmatpush.msra.mxu3 %v7205_v60  ;;  %v7271_v38 = vld [vmem:[%s10598_s9 + $0x6b8] sm:$0xff]  ;;  %v7302_v60 = vld [vmem:[%s10598_s9 + $0x7b0] sm:$0xff] }
 0x791   : > { %6539 = vmatpush.msra.mxu0 %v7218_v26  ;;  %6557 = vmatpush.msra.mxu1 %v7236_v55  ;;  %v7252_v26 = vld [vmem:[%s10598_s9 + $0x620] sm:$0xff]  ;;  %v7283_v55 = vld [vmem:[%s10598_s9 + $0x718] sm:$0xff] }
 0x792   : > { %6461 = vmatpush.msra.mxu2 %v7186_v19  ;;  %6479 = vmatpush.msra.mxu3 %v7204_v13  ;;  %v7270_v19 = vld [vmem:[%s10598_s9 + $0x6b0] sm:$0xff]  ;;  %v7301_v13 = vld [vmem:[%s10598_s9 + $0x7a8] sm:$0xff] }
 0x793   : > { %6540 = vmatpush.msra.mxu0 %v7217_v42  ;;  %6558 = vmatpush.msra.mxu1 %v7235_v63  ;;  %v7251_v42 = vld [vmem:[%s10598_s9 + $0x618] sm:$0xff]  ;;  %v7282_v63 = vld [vmem:[%s10598_s9 + $0x710] sm:$0xff] }
 0x794   : > { %6462 = vmatpush.msra.mxu2 %v7185_v24  ;;  %6480 = vmatpush.msra.mxu3 %v7203_v54  ;;  %v7269_v24 = vld [vmem:[%s10598_s9 + $0x6a8] sm:$0xff]  ;;  %v7300_v54 = vld [vmem:[%s10598_s9 + $0x7a0] sm:$0xff] }
 0x795   : > { %6541 = vmatpush.msra.mxu0 %v7216_v6  ;;  %6559 = vmatpush.msra.mxu1 %v7234_v57  ;;  %v7250_v6 = vld [vmem:[%s10598_s9 + $0x610] sm:$0xff]  ;;  %v7281_v57 = vld [vmem:[%s10598_s9 + $0x708] sm:$0xff] }
 0x796   : > { %6542 = vmatmul.f32.vlgmr.msra.gmra.mxu0 %v6522_v56  ;;  %6463 = vmatpush.msra.mxu2 %v7184_v34  ;;  %v7268_v34 = vld [vmem:[%s10598_s9 + $0x6a0] sm:$0xff]  ;;  %v7299_v56 = vld [vmem:[%s10598_s9 + $0x798] sm:$0xff] }
 0x797   : > { %6682 = vmatpush.msrb.mxu0 %v7295_v32  ;;  %6481 = vmatpush.msra.mxu3 %v7202_v31  ;;  %v7249_v32 = vld [vmem:[%s10598_s9 + $0x608] sm:$0xff]  ;;  %v7280_v31 = vld [vmem:[%s10598_s9 + $0x700] sm:$0xff] }
 0x798   : > { %6560 = vmatpush.msra.mxu1 %v7233_v46  ;;  %6464 = vmatmul.f32.vlgmr.msra.gmra.mxu2 %v6444_v18  ;;  %v7267_v46 = vld [vmem:[%s10598_s9 + $0x698] sm:$0xff]  ;;  %v7298_v18 = vld [vmem:[%s10598_s9 + $0x790] sm:$0xff] }
 0x799   : > { %6604 = vmatpush.msrb.mxu2 %v7263_v30  ;;  %6683 = vmatpush.msrb.mxu0 %v7294_v33  ;;  %v7248_v30 = vld [vmem:[%s10598_s9 + $0x600] sm:$0xff]  ;;  %v6678_v33 = vrot.slane %v10147_v62, 7 }
 0x79a   : > { %6482 = vmatpush.msra.mxu3 %v7201_v40  ;;  %6561 = vmatpush.msra.mxu1 %v7232_v41  ;;  %v7266_v40 = vld [vmem:[%s10598_s9 + $0x690] sm:$0xff]  ;;  %v7297_v41 = vld [vmem:[%s10598_s9 + $0x788] sm:$0xff] }
 0x79b   : > { %6562 = vmatmul.f32.vlgmr.msra.gmra.mxu1 %v6523_v36  ;;  %6605 = vmatpush.msrb.mxu2 %v7262_v49  ;;  %v6600_v49 = vrot.slane %v10147_v62, 6  ;;  %v7265_v36 = vld [vmem:[%s10598_s9 + $0x688] sm:$0xff]  ;;  %v6601_v62 = vrot.slane %v10163_v21, 6 }
 0x79c   : > { %6684 = vmatpush.msrb.mxu0 %v7293_v58  ;;  %6702 = vmatpush.msrb.mxu1 %v7311_v27  ;;  %v7296_v58 = vld [vmem:[%s10598_s9 + $0x780] sm:$0xff]  ;;  %v6679_v27 = vrot.slane %v10163_v21, 7 }
 0x79d   : > { %6483 = vmatpush.msra.mxu3 %v7200_v14  ;;  %6606 = vmatpush.msrb.mxu2 %v7261_v50  ;;  %v7264_v14 = vld [vmem:[%s10598_s9 + $0x680] sm:$0xff] }
 0x79e   : > { %6484 = vmatmul.f32.vlgmr.msra.gmra.mxu3 %v6445_v48  ;;  %6685 = vmatpush.msrb.mxu0 %v7292_v47 }
 0x79f   : > { %6624 = vmatpush.msrb.mxu3 %v7279_v9  ;;  %6703 = vmatpush.msrb.mxu1 %v7310_v1 }
 0x7a0   : > { %6607 = vmatpush.msrb.mxu2 %v7260_v16  ;;  %6686 = vmatpush.msrb.mxu0 %v7291_v2 }
 0x7a1   : > { %6625 = vmatpush.msrb.mxu3 %v7278_v23  ;;  %6704 = vmatpush.msrb.mxu1 %v7309_v7 }
 0x7a2   : > { %6608 = vmatpush.msrb.mxu2 %v7259_v25  ;;  %6687 = vmatpush.msrb.mxu0 %v7290_v51 }
 0x7a3   : > { %6626 = vmatpush.msrb.mxu3 %v7277_v3  ;;  %6705 = vmatpush.msrb.mxu1 %v7308_v17 }
 0x7a4   : > { %6609 = vmatpush.msrb.mxu2 %v7258_v29  ;;  %6688 = vmatpush.msrb.mxu0 %v7289_v28 }
 0x7a5   : > { %6627 = vmatpush.msrb.mxu3 %v7276_v12  ;;  %6706 = vmatpush.msrb.mxu1 %v7307_v52 }
 0x7a6   : > { %6610 = vmatpush.msrb.mxu2 %v7257_v20  ;;  %6689 = vmatpush.msrb.mxu0 %v7288_v22 }
 0x7a7   : > { %6628 = vmatpush.msrb.mxu3 %v7275_v53  ;;  %6707 = vmatpush.msrb.mxu1 %v7306_v39 }
 0x7a8   : > { %6611 = vmatpush.msrb.mxu2 %v7256_v44  ;;  %6690 = vmatpush.msrb.mxu0 %v7287_v61 }
 0x7a9   : > { %6629 = vmatpush.msrb.mxu3 %v7274_v45  ;;  %6708 = vmatpush.msrb.mxu1 %v7305_v15 }
 0x7aa   : > { %6612 = vmatpush.msrb.mxu2 %v7255_v59  ;;  %6691 = vmatpush.msrb.mxu0 %v7286_v4 }
 0x7ab   : > { %6630 = vmatpush.msrb.mxu3 %v7273_v5  ;;  %6709 = vmatpush.msrb.mxu1 %v7304_v43 }
 0x7ac   : > { %6613 = vmatpush.msrb.mxu2 %v7254_v35  ;;  %6692 = vmatpush.msrb.mxu0 %v7285_v10  ;;  %v6723_v35 = vld [vmem:[%s10599_s10] sm:$0x1] }
 0x7ad   : > { %6631 = vmatpush.msrb.mxu3 %v7272_v11  ;;  %6710 = vmatpush.msrb.mxu1 %v7303_v0 }
 0x7ae   : > { %6614 = vmatpush.msrb.mxu2 %v7253_v8  ;;  %6693 = vmatpush.msrb.mxu0 %v7284_v37 }
 0x7af   : > { %6632 = vmatpush.msrb.mxu3 %v7271_v38  ;;  %6711 = vmatpush.msrb.mxu1 %v7302_v60 }
 0x7b0   : > { %6615 = vmatpush.msrb.mxu2 %v7252_v26  ;;  %6694 = vmatpush.msrb.mxu0 %v7283_v55 }
 0x7b1   : > { %6633 = vmatpush.msrb.mxu3 %v7270_v19  ;;  %6712 = vmatpush.msrb.mxu1 %v7301_v13 }
 0x7b2   : > { %6616 = vmatpush.msrb.mxu2 %v7251_v42  ;;  %6695 = vmatpush.msrb.mxu0 %v7282_v63 }
 0x7b3   : > { %6634 = vmatpush.msrb.mxu3 %v7269_v24  ;;  %6713 = vmatpush.msrb.mxu1 %v7300_v54 }
 0x7b4   : > { %6617 = vmatpush.msrb.mxu2 %v7250_v6  ;;  %6696 = vmatpush.msrb.mxu0 %v7281_v57 }
 0x7b5   : > { %6635 = vmatpush.msrb.mxu3 %v7268_v34  ;;  %6714 = vmatpush.msrb.mxu1 %v7299_v56 }
 0x7b6   : > { %6618 = vmatpush.msrb.mxu2 %v7249_v32  ;;  %6697 = vmatpush.msrb.mxu0 %v7280_v31 }
 0x7b7   : > { %6636 = vmatpush.msrb.mxu3 %v7267_v46  ;;  %6715 = vmatpush.msrb.mxu1 %v7298_v18 }
 0x7b8   : > { %6698 = vmatmul.f32.vlgmr.msrb.gmra.mxu0 %v6678_v33  ;;  %6619 = vmatpush.msrb.mxu2 %v7248_v30 }
 0x7b9   : > { %6637 = vmatpush.msrb.mxu3 %v7266_v40  ;;  %6716 = vmatpush.msrb.mxu1 %v7297_v41 }
 0x7ba   : > { %6620 = vmatmul.f32.vlgmr.msrb.gmra.mxu2 %v6600_v49 }
 0x7bb   : > { %6638 = vmatpush.msrb.mxu3 %v7265_v36  ;;  %6717 = vmatpush.msrb.mxu1 %v7296_v58 }
 0x7bc   : > { %6718 = vmatmul.f32.vlgmr.msrb.gmra.mxu1 %v6679_v27 }
 0x7bd   : > { %6639 = vmatpush.msrb.mxu3 %v7264_v14 }
 0x7be   : > { %6640 = vmatmul.f32.vlgmr.msrb.gmra.mxu3 %v6601_v62 }
 0x7f0   : > { %v6232_v9 = vpop.f32.mrf.mxu0 }
 0x7f4   : > { %v6252_v47 = vpop.f32.mrf.mxu1 }
 0x7f8   : > { %v6192_v48 = vpop.f32.mrf.mxu2 }
 0x7f9   : > { %v6387_v25 = vpop.f32.mrf.mxu0 }
 0x7fc   : > { %v6212_v50 = vpop.f32.mrf.mxu3 }
 0x7fd   : > { %v6213_v1 = vadd.f32 %v6212_v50, %v6192_v48 }
 0x7fe   : > { %v6407_v2 = vpop.f32.mrf.mxu1 }
 0x7ff   : > { %v6233_v7 = vadd.f32 %v6232_v9, %v6213_v1  ;;  %v6408_v12 = vadd.f32 %v6407_v2, %v6387_v25 }
 0x801   : > { %v6309_v23 = vpop.f32.mrf.mxu2  ;;  %v6253_v3 = vadd.f32 %v6252_v47, %v6233_v7 }
 0x806   : > { %v6329_v16 = vpop.f32.mrf.mxu3 }
 0x807   : > { %v6330_v51 = vadd.f32 %v6329_v16, %v6309_v23 }
 0x809   : > { %v6332_v29 = vadd.f32 %v6330_v51, %v6253_v3 }
 0x80b   : > { %v6410_v22 = vadd.f32 %v6408_v12, %v6332_v29 }
 0x813   : > { %v6543_v20 = vpop.f32.mrf.mxu0 }
 0x818   : > { %v6563_v28 = vpop.f32.mrf.mxu1 }
 0x819   : > { %v6564_v39 = vadd.f32 %v6563_v28, %v6543_v20 }
 0x81b   : > { %v6465_v21 = vpop.f32.mrf.mxu2 }
 0x821   : > { %v6485_v17 = vpop.f32.mrf.mxu3 }
 0x822   : > { %v6486_v52 = vadd.f32 %v6485_v17, %v6465_v21 }
 0x824   : > { %v6488_v53 = vadd.f32 %v6486_v52, %v6410_v22 }
 0x826   : > { %v6566_v15 = vadd.f32 %v6564_v39, %v6488_v53 }
 0x835   : > { %v6699_v4 = vpop.f32.mrf.mxu0 }
 0x839   : > { %v6719_v44 = vpop.f32.mrf.mxu1 }
 0x83a   : > { %v6720_v5 = vadd.f32 %v6719_v44, %v6699_v4 }
 0x83d   : > { %v6621_v61 = vpop.f32.mrf.mxu2 }
 0x841   : > { %v6641_v45 = vpop.f32.mrf.mxu3 }
 0x842   : > { %v6642_v59 = vadd.f32 %v6641_v45, %v6621_v61 }
 0x844   : > { %v6644_v43 = vadd.f32 %v6642_v59, %v6566_v15 }
 0x846   : > { %v6722_v10 = vadd.f32 %v6720_v5, %v6644_v43 }
 0x848   : > { %v6724_v11 = vadd.f32 %v6723_v35, %v6722_v10 }
 0x84a   : > { %6726 = vst.msk [vmem:[%s457_s2] sm:$0x1] %vm6725_vm4, %v6724_v11 }
 0x84b   : > { %7698 = shalt.err (!%p7695_p3)
}
 0x84c   : > { %7314 = dma.vmem_to_hbm [thread:$0]  (%p7864_p5), %s6739_s1, 16, %s6741_s0, %s6728_s21  }
 0x84d PF: > { %p7320_p4 = scmp.ge.s32.totalorder %s7733_s16, 2  ;;  %s6752_s28 = sand.u32 1, %s7721_s29  }
 0x84e   : > { %s6753_s27 = scalar_lea.sflag [#allocation4], %s6752_s28 }
 0x84f   : > { %p7317_p7 = pnand %p7320_p4, %p7868_p6 }
 0x851   : > { %p7318_p8 = pneg %p7317_p7 }
 0x853   : > { %7716 = dma.done.wait (%p7318_p8), %s6753_s27, 16  }
 0x854   : > { %7718 = vsyncadd (%p7318_p8), %s6753_s27, 4294967280  ;;  %s10674_s20 = sld [smem:[#allocation6_spill]]  ;;  %p24_p9 = scmp.ge.s32.totalorder %s7851_s19, 4  }
 0x855   : > { %s10675_s29 = smov %s7725_s30  ;;  %s10676_s30 = smov %s7729_s15 }
 0x856   : > { %s10678_s16 = smov %s7851_s19  ;;  %26 = sbr.rel (!%p24_p9) target bundleno = 10 (0xa), region = 152 }
 0x85a   : > { %s10677_s15 = smov %s10674_s20 }
 0x85b   :  { %6758 = vsyncpa [#allocation4], 1 }
 0x85c   :  { %6760 = vsyncpa [#allocation4 + $0x1], 1 }

</bundles_post_ra>
